<compile_context>
chip_gen: v6e
topology: v6e:2x2x1
jax: 0.10.0
libtpu: 0.0.40
codegen_flags: <defaults>
</compile_context>

<pallas_src>
import functools

import jax
import jax.numpy as jnp
from jax import lax
from jax.experimental import pallas as pl
from jax.experimental.pallas import tpu as pltpu

NUM_FT_FEATURES = 49152   # HalfKA feature space of self.ft
NUM_FFT_FEATURES = 768    # factorised feature space of self.fft (idx % 768)


def _halfka_kernel(stm_idx_ref, nstm_idx_ref,   # scalar prefetch (SMEM): (B, MAX_F) i32, sanitized
                   val_ref,                     # SMEM: (B, MAX_F) f32 (shared by both perspectives)
                   w_ref,                       # VMEM: (n_rows, pack*ft_out) f32 packed fused table
                   mask_ref,                    # VMEM: (pack, pack*ft_out) f32 one-hot group masks
                   b_ref,                       # VMEM: (1, ft_out) fused bias (bft + bfft)
                   wo_s_ref, wo_n_ref,          # VMEM: (1, ft_out) pre-split output weight halves
                   bo_ref,                      # VMEM: (1, 1) output bias
                   o_ref,                       # VMEM out block: (tile_b, 1)
                   acc_s_ref, acc_n_ref,        # VMEM scratch: (tile_b, pack*ft_out) f32
                   *, tile_b, ft_out, max_features, pack):
    base = pl.program_id(0) * tile_b
    rows = [base + p for p in range(tile_b)]    # loop-invariant scalars (hoisted)
    shift = max(pack.bit_length() - 1, 0)       # pack is a power of two

    acc_s_ref[...] = jnp.zeros_like(acc_s_ref)
    acc_n_ref[...] = jnp.zeros_like(acc_n_ref)

    def accumulate(acc_ref, p, idx, v):
        # Indices were sanitized in the wrapper: idx in [0, n_feat], where idx ==
        # n_feat is the appended all-zero row used for padding slots.
        if pack > 1:
            r = idx >> shift                    # packed table row
            g = idx & (pack - 1)                # 128-lane group within that row
            row = w_ref[pl.ds(r, 1), :] * mask_ref[pl.ds(g, 1), :]
        else:
            row = w_ref[pl.ds(idx, 1), :]
        acc_ref[pl.ds(p, 1), :] += v * row

    def slot_body(s, carry):
        # Unrolled over positions and both perspectives: 2*tile_b independent
        # scalar-load -> address -> vector-load -> fma chains per slot, so the
        # scheduler can hide scalar-unit and VMEM-load latency.
        for p in range(tile_b):
            v = val_ref[rows[p], s]
            accumulate(acc_s_ref, p, stm_idx_ref[rows[p], s], v)
            accumulate(acc_n_ref, p, nstm_idx_ref[rows[p], s], v)
        return carry

    lax.fori_loop(0, max_features, slot_body, 0)

    def fold_groups(acc):                       # (tile_b, pack*ft_out) -> (tile_b, ft_out)
        out = acc[:, :ft_out]
        for g in range(1, pack):
            out = out + acc[:, g * ft_out:(g + 1) * ft_out]
        return out

    bias = b_ref[...]
    stm_h = jnp.clip(fold_groups(acc_s_ref[...]) + bias, 0.0, 1.0)
    nstm_h = jnp.clip(fold_groups(acc_n_ref[...]) + bias, 0.0, 1.0)
    y = (jnp.sum(stm_h * wo_s_ref[...], axis=-1, keepdims=True)
         + jnp.sum(nstm_h * wo_n_ref[...], axis=-1, keepdims=True)
         + bo_ref[...])
    o_ref[...] = jax.nn.sigmoid(y)


def _prep_params(params):
    """One-time XLA-side parameter prep (cheap vs. the gather kernel)."""
    wft, bft, wfft, bfft, wo, bo = params
    n_feat, ft_out = wft.shape
    n_fft = wfft.shape[0]
    assert n_feat % n_fft == 0

    # Fuse the two embedding tables: w_fused[i] = wft[i] + wfft[i % n_fft].
    w_fused = (wft + jnp.tile(wfft, (n_feat // n_fft, 1))).astype(jnp.float32)

    # Pack `pack` consecutive fused rows per 128-lane VMEM row (lane-dense f32).
    pack = 128 // ft_out if (ft_out < 128 and 128 % ft_out == 0) else 1
    # Append one all-zero packed row: padding slots (idx < 0) are redirected here.
    w_fused = jnp.concatenate([w_fused, jnp.zeros((pack, ft_out), jnp.float32)], axis=0)
    w_packed = w_fused.reshape((n_feat + pack) // pack, pack * ft_out)

    # One-hot lane-group masks used to select the gathered row's group.
    mask_tbl = jnp.kron(jnp.eye(pack, dtype=jnp.float32),
                        jnp.ones((1, ft_out), jnp.float32))

    b_fused = (bft + bfft).astype(jnp.float32)
    wo_s = wo[:, :ft_out].astype(jnp.float32)
    wo_n = wo[:, ft_out:].astype(jnp.float32)
    return w_packed, mask_tbl, b_fused, wo_s, wo_n, bo.astype(jnp.float32), pack


def halfka_forward(stm_indices, nstm_indices, values, params, *, tile_b=32):
    """stm/nstm_indices: (B, MAX_F) int (negative = padding), values: (B, MAX_F) f32.
    Returns (B, 1) f32 win-probabilities."""
    wft = params[0]
    n_feat, ft_out = wft.shape
    batch, max_features = values.shape

    w_packed, mask_tbl, b_fused, wo_s, wo_n, bo, pack = _prep_params(params)

    # Hoisted index sanitization: clamp in-range indices, redirect padding
    # (idx < 0) to the appended all-zero table row -> no value masking needed.
    def sanitize(idx):
        idx = idx.astype(jnp.int32)
        return jnp.where(idx < 0, n_feat, jnp.clip(idx, 0, n_feat - 1)).astype(jnp.int32)

    stm_idx = sanitize(stm_indices)
    nstm_idx = sanitize(nstm_indices)
    vals = values.astype(jnp.float32)

    # Pad the batch to a multiple of tile_b (padded rows hit the zero row).
    pad = (-batch) % tile_b
    if pad:
        stm_idx = jnp.pad(stm_idx, ((0, pad), (0, 0)), constant_values=n_feat)
        nstm_idx = jnp.pad(nstm_idx, ((0, pad), (0, 0)), constant_values=n_feat)
        vals = jnp.pad(vals, ((0, pad), (0, 0)))
    padded_batch = batch + pad

    kernel = functools.partial(
        _halfka_kernel, tile_b=tile_b, ft_out=ft_out,
        max_features=max_features, pack=pack)

    vmem = pl.BlockSpec(memory_space=pltpu.MemorySpace.VMEM)   # whole array, resident
    smem = pl.BlockSpec(memory_space=pltpu.MemorySpace.SMEM)   # whole array, scalar access
    lanes = pack * ft_out

    grid_spec = pltpu.PrefetchScalarGridSpec(
        num_scalar_prefetch=2,                      # stm_idx, nstm_idx -> SMEM
        grid=(padded_batch // tile_b,),             # batch-tiled, pipelined
        in_specs=[
            smem,                                   # values (per-slot scalars)
            vmem,                                   # w_packed  (~6 MiB at ft_out=32)
            vmem,                                   # mask_tbl  (pack, 128)
            vmem,                                   # b_fused   (1, ft_out)
            vmem,                                   # wo_stm    (1, ft_out)
            vmem,                                   # wo_nstm   (1, ft_out)
            vmem,                                   # bo        (1, 1)
        ],
        out_specs=pl.BlockSpec((tile_b, 1), lambda i, *_: (i, 0)),
        scratch_shapes=[pltpu.VMEM((tile_b, lanes), jnp.float32),
                        pltpu.VMEM((tile_b, lanes), jnp.float32)],
    )

    out = pl.pallas_call(
        kernel,
        out_shape=jax.ShapeDtypeStruct((padded_batch, 1), jnp.float32),
        grid_spec=grid_spec,
        compiler_params=pltpu.CompilerParams(
            dimension_semantics=("parallel",),                 # shard tiles across TCs (v7x)
            vmem_limit_bytes=int(w_packed.size) * 4 + (24 << 20),
        ),
    )(stm_idx, nstm_idx, vals, w_packed, mask_tbl, b_fused, wo_s, wo_n, bo)
    return out[:batch]


def init_params(key, ft_out):
    ks = jax.random.split(key, 6)
    wft = jax.random.normal(ks[0], (NUM_FT_FEATURES, ft_out), jnp.float32) * 0.05
    bft = jax.random.normal(ks[1], (1, ft_out), jnp.float32) * 0.05 + 0.25
    wfft = jax.random.normal(ks[2], (NUM_FFT_FEATURES, ft_out), jnp.float32) * 0.05
    bfft = jax.random.normal(ks[3], (1, ft_out), jnp.float32) * 0.05 + 0.25
    bound = 1.0 / jnp.sqrt(jnp.float32(2 * ft_out))
    wo = jax.random.uniform(ks[4], (1, 2 * ft_out), jnp.float32, -bound, bound)
    bo = jax.random.uniform(ks[5], (1, 1), jnp.float32, -bound, bound)
    return (wft, bft, wfft, bfft, wo, bo)


def reference_forward(stm_indices, nstm_indices, values, params):
    """Pure-JAX reference of HalfKANetCuda.forward (negative indices skipped)."""
    wft, bft, wfft, bfft, wo, bo = params
    n_fft = wfft.shape[0]

    def transform(idx):
        safe = jnp.maximum(idx, 0)
        v = jnp.where(idx >= 0, values, 0.0)                   # (B, MAX_F)
        rows = wft[safe] + wfft[safe % n_fft]                  # (B, MAX_F, ft_out)
        return jnp.sum(v[:, :, None] * rows, axis=1) + bft + bfft

    stm_ft = jnp.clip(transform(stm_indices), 0.0, 1.0)
    nstm_ft = jnp.clip(transform(nstm_indices), 0.0, 1.0)
    hidden = jnp.concatenate([stm_ft, nstm_ft], axis=1)        # (B, 2*ft_out)
    return jax.nn.sigmoid(jnp.sum(hidden * wo, axis=-1, keepdims=True) + bo)


if __name__ == "__main__":
    ft_out = 32
    max_features = 32      # HALF_KA_CUDA.max_features()
    batch = 64
    tile_b = 32

    key = jax.random.PRNGKey(0)
    k_params, k_stm, k_nstm, k_val = jax.random.split(key, 4)

    params = init_params(k_params, ft_out)

    stm_indices = jax.random.randint(
        k_stm, (batch, max_features), 0, NUM_FT_FEATURES, jnp.int32)
    nstm_indices = jax.random.randint(
        k_nstm, (batch, max_features), 0, NUM_FT_FEATURES, jnp.int32)
    values = jax.random.uniform(
        k_val, (batch, max_features), jnp.float32, 0.5, 1.5)

    # Pad the tail slots of every other position with -1 (inactive feature), as the
    # data loader does when a board has fewer than max_features pieces.
    slot = jnp.arange(max_features)[None, :]
    n_active = jnp.where(jnp.arange(batch) % 2 == 0,
                         max_features - 5, max_features)[:, None]
    stm_indices = jnp.where(slot < n_active, stm_indices, -1)
    nstm_indices = jnp.where(slot < n_active, nstm_indices, -1)

    out = halfka_forward(stm_indices, nstm_indices, values, params, tile_b=tile_b)
    out = jax.block_until_ready(out)

    ref = reference_forward(stm_indices, nstm_indices, values, params)
    assert out.shape == (batch, 1)
    assert jnp.allclose(out, ref, atol=1e-4, rtol=1e-4)

    print("KERNEL_OK")
</pallas_src>

<mosaic_0001>
module attributes {stable_mosaic.version = 11 : i64} {
  func.func @_halfka_kernel(%arg0: i32, %arg1: memref<64x32xi32, #tpu.memory_space<smem>>, %arg2: memref<64x32xi32, #tpu.memory_space<smem>>, %arg3: memref<64x32xf32, #tpu.memory_space<smem>>, %arg4: memref<12289x128xf32, #tpu.memory_space<vmem>>, %arg5: memref<4x128xf32, #tpu.memory_space<vmem>>, %arg6: memref<1x32xf32, #tpu.memory_space<vmem>>, %arg7: memref<1x32xf32, #tpu.memory_space<vmem>>, %arg8: memref<1x32xf32, #tpu.memory_space<vmem>>, %arg9: memref<1x1xf32, #tpu.memory_space<vmem>>, %arg10: memref<32x1xf32, #tpu.memory_space<vmem>>, %arg11: memref<32x128xf32, #tpu.memory_space<vmem>>, %arg12: memref<32x128xf32, #tpu.memory_space<vmem>>) attributes {dimension_semantics = [#tpu.dimension_semantics<parallel>], iteration_bounds = array<i64: 2>, scalar_prefetch = 2 : i64, scratch_operands = 2 : i64, tpu.core_type = #tpu.core_type<tc>, window_params = [{transform_indices = @transform_0, window_bounds = array<i64: 64, 32>}, {pipeline_mode = #tpu.pipeline_mode<synchronous>, transform_indices = @transform_1, window_bounds = array<i64: 12289, 128>}, {pipeline_mode = #tpu.pipeline_mode<synchronous>, transform_indices = @transform_2, window_bounds = array<i64: 4, 128>}, {pipeline_mode = #tpu.pipeline_mode<synchronous>, transform_indices = @transform_3, window_bounds = array<i64: 1, 32>}, {pipeline_mode = #tpu.pipeline_mode<synchronous>, transform_indices = @transform_4, window_bounds = array<i64: 1, 32>}, {pipeline_mode = #tpu.pipeline_mode<synchronous>, transform_indices = @transform_5, window_bounds = array<i64: 1, 32>}, {pipeline_mode = #tpu.pipeline_mode<synchronous>, transform_indices = @transform_6, window_bounds = array<i64: 1, 1>}, {transform_indices = @transform_7, window_bounds = array<i64: 32, 1>}]} {
    %c32_i32 = arith.constant 32 : i32
    %0 = arith.muli %arg0, %c32_i32 : i32
    %c0_i32 = arith.constant 0 : i32
    %1 = arith.addi %0, %c0_i32 : i32
    %c1_i32 = arith.constant 1 : i32
    %2 = arith.addi %0, %c1_i32 : i32
    %c2_i32 = arith.constant 2 : i32
    %3 = arith.addi %0, %c2_i32 : i32
    %c3_i32 = arith.constant 3 : i32
    %4 = arith.addi %0, %c3_i32 : i32
    %c4_i32 = arith.constant 4 : i32
    %5 = arith.addi %0, %c4_i32 : i32
    %c5_i32 = arith.constant 5 : i32
    %6 = arith.addi %0, %c5_i32 : i32
    %c6_i32 = arith.constant 6 : i32
    %7 = arith.addi %0, %c6_i32 : i32
    %c7_i32 = arith.constant 7 : i32
    %8 = arith.addi %0, %c7_i32 : i32
    %c8_i32 = arith.constant 8 : i32
    %9 = arith.addi %0, %c8_i32 : i32
    %c9_i32 = arith.constant 9 : i32
    %10 = arith.addi %0, %c9_i32 : i32
    %c10_i32 = arith.constant 10 : i32
    %11 = arith.addi %0, %c10_i32 : i32
    %c11_i32 = arith.constant 11 : i32
    %12 = arith.addi %0, %c11_i32 : i32
    %c12_i32 = arith.constant 12 : i32
    %13 = arith.addi %0, %c12_i32 : i32
    %c13_i32 = arith.constant 13 : i32
    %14 = arith.addi %0, %c13_i32 : i32
    %c14_i32 = arith.constant 14 : i32
    %15 = arith.addi %0, %c14_i32 : i32
    %c15_i32 = arith.constant 15 : i32
    %16 = arith.addi %0, %c15_i32 : i32
    %c16_i32 = arith.constant 16 : i32
    %17 = arith.addi %0, %c16_i32 : i32
    %c17_i32 = arith.constant 17 : i32
    %18 = arith.addi %0, %c17_i32 : i32
    %c18_i32 = arith.constant 18 : i32
    %19 = arith.addi %0, %c18_i32 : i32
    %c19_i32 = arith.constant 19 : i32
    %20 = arith.addi %0, %c19_i32 : i32
    %c20_i32 = arith.constant 20 : i32
    %21 = arith.addi %0, %c20_i32 : i32
    %c21_i32 = arith.constant 21 : i32
    %22 = arith.addi %0, %c21_i32 : i32
    %c22_i32 = arith.constant 22 : i32
    %23 = arith.addi %0, %c22_i32 : i32
    %c23_i32 = arith.constant 23 : i32
    %24 = arith.addi %0, %c23_i32 : i32
    %c24_i32 = arith.constant 24 : i32
    %25 = arith.addi %0, %c24_i32 : i32
    %c25_i32 = arith.constant 25 : i32
    %26 = arith.addi %0, %c25_i32 : i32
    %c26_i32 = arith.constant 26 : i32
    %27 = arith.addi %0, %c26_i32 : i32
    %c27_i32 = arith.constant 27 : i32
    %28 = arith.addi %0, %c27_i32 : i32
    %c28_i32 = arith.constant 28 : i32
    %29 = arith.addi %0, %c28_i32 : i32
    %c29_i32 = arith.constant 29 : i32
    %30 = arith.addi %0, %c29_i32 : i32
    %c30_i32 = arith.constant 30 : i32
    %31 = arith.addi %0, %c30_i32 : i32
    %c31_i32 = arith.constant 31 : i32
    %32 = arith.addi %0, %c31_i32 : i32
    %cst = arith.constant 0.000000e+00 : f32
    %33 = vector.broadcast %cst : f32 to vector<32x128xf32>
    %c0 = arith.constant 0 : index
    %c0_0 = arith.constant 0 : index
    %34 = vector.load %arg11[%c0, %c0_0] : memref<32x128xf32, #tpu.memory_space<vmem>>, vector<32x128xf32>
    tpu.vector_store %arg11[%c0, %c0_0], %33 {strides = array<i32>} : memref<32x128xf32, #tpu.memory_space<vmem>>, vector<32x128xf32>,
    %cst_1 = arith.constant 0.000000e+00 : f32
    %35 = vector.broadcast %cst_1 : f32 to vector<32x128xf32>
    %c0_2 = arith.constant 0 : index
    %c0_3 = arith.constant 0 : index
    %36 = vector.load %arg12[%c0_2, %c0_3] : memref<32x128xf32, #tpu.memory_space<vmem>>, vector<32x128xf32>
    tpu.vector_store %arg12[%c0_2, %c0_3], %35 {strides = array<i32>} : memref<32x128xf32, #tpu.memory_space<vmem>>, vector<32x128xf32>,
    %c0_i32_4 = arith.constant 0 : i32
    %c32_i32_5 = arith.constant 32 : i32
    %37 = arith.addi %c0_i32_4, %c32_i32_5 : i32
    %c1_i32_6 = arith.constant 1 : i32
    scf.for %arg13 = %c0_i32_4 to %37 step %c1_i32_6  : i32 {
      %87 = arith.index_cast %1 : i32 to index
      %88 = arith.index_cast %arg13 : i32 to index
      %89 = memref.load %arg3[%87, %88] : memref<64x32xf32, #tpu.memory_space<smem>>
      %90 = arith.index_cast %1 : i32 to index
      %91 = arith.index_cast %arg13 : i32 to index
      %92 = memref.load %arg1[%90, %91] : memref<64x32xi32, #tpu.memory_space<smem>>
      %c2_i32_29 = arith.constant 2 : i32
      %93 = arith.shrsi %92, %c2_i32_29 : i32
      %c3_i32_30 = arith.constant 3 : i32
      %94 = arith.andi %92, %c3_i32_30 : i32
      %95 = arith.index_cast %93 : i32 to index
      %c0_31 = arith.constant 0 : index
      %96 = vector.load %arg4[%95, %c0_31] : memref<12289x128xf32, #tpu.memory_space<vmem>>, vector<1x128xf32>
      %97 = arith.index_cast %94 : i32 to index
      %c0_32 = arith.constant 0 : index
      %98 = vector.load %arg5[%97, %c0_32] : memref<4x128xf32, #tpu.memory_space<vmem>>, vector<1x128xf32>
      %99 = arith.mulf %96, %98 : vector<1x128xf32>
      %c0_33 = arith.constant 0 : index
      %c0_34 = arith.constant 0 : index
      %100 = vector.load %arg11[%c0_33, %c0_34] : memref<32x128xf32, #tpu.memory_space<vmem>>, vector<1x128xf32>
      %101 = vector.broadcast %89 : f32 to vector<1x128xf32>
      %102 = arith.mulf %101, %99 : vector<1x128xf32>
      %103 = arith.addf %100, %102 : vector<1x128xf32>
      %c0_35 = arith.constant 0 : index
      %c0_36 = arith.constant 0 : index
      %104 = vector.load %arg11[%c0_35, %c0_36] : memref<32x128xf32, #tpu.memory_space<vmem>>, vector<1x128xf32>
      tpu.vector_store %arg11[%c0_35, %c0_36], %103 {strides = array<i32>} : memref<32x128xf32, #tpu.memory_space<vmem>>, vector<1x128xf32>,
      %105 = arith.index_cast %1 : i32 to index
      %106 = arith.index_cast %arg13 : i32 to index
      %107 = memref.load %arg2[%105, %106] : memref<64x32xi32, #tpu.memory_space<smem>>
      %c2_i32_37 = arith.constant 2 : i32
      %108 = arith.shrsi %107, %c2_i32_37 : i32
      %c3_i32_38 = arith.constant 3 : i32
      %109 = arith.andi %107, %c3_i32_38 : i32
      %110 = arith.index_cast %108 : i32 to index
      %c0_39 = arith.constant 0 : index
      %111 = vector.load %arg4[%110, %c0_39] : memref<12289x128xf32, #tpu.memory_space<vmem>>, vector<1x128xf32>
      %112 = arith.index_cast %109 : i32 to index
      %c0_40 = arith.constant 0 : index
      %113 = vector.load %arg5[%112, %c0_40] : memref<4x128xf32, #tpu.memory_space<vmem>>, vector<1x128xf32>
      %114 = arith.mulf %111, %113 : vector<1x128xf32>
      %c0_41 = arith.constant 0 : index
      %c0_42 = arith.constant 0 : index
      %115 = vector.load %arg12[%c0_41, %c0_42] : memref<32x128xf32, #tpu.memory_space<vmem>>, vector<1x128xf32>
      %116 = vector.broadcast %89 : f32 to vector<1x128xf32>
      %117 = arith.mulf %116, %114 : vector<1x128xf32>
      %118 = arith.addf %115, %117 : vector<1x128xf32>
      %c0_43 = arith.constant 0 : index
      %c0_44 = arith.constant 0 : index
      %119 = vector.load %arg12[%c0_43, %c0_44] : memref<32x128xf32, #tpu.memory_space<vmem>>, vector<1x128xf32>
      tpu.vector_store %arg12[%c0_43, %c0_44], %118 {strides = array<i32>} : memref<32x128xf32, #tpu.memory_space<vmem>>, vector<1x128xf32>,
      %120 = arith.index_cast %2 : i32 to index
      %121 = arith.index_cast %arg13 : i32 to index
      %122 = memref.load %arg3[%120, %121] : memref<64x32xf32, #tpu.memory_space<smem>>
      %123 = arith.index_cast %2 : i32 to index
      %124 = arith.index_cast %arg13 : i32 to index
      %125 = memref.load %arg1[%123, %124] : memref<64x32xi32, #tpu.memory_space<smem>>
      %c2_i32_45 = arith.constant 2 : i32
      %126 = arith.shrsi %125, %c2_i32_45 : i32
      %c3_i32_46 = arith.constant 3 : i32
      %127 = arith.andi %125, %c3_i32_46 : i32
      %128 = arith.index_cast %126 : i32 to index
      %c0_47 = arith.constant 0 : index
      %129 = vector.load %arg4[%128, %c0_47] : memref<12289x128xf32, #tpu.memory_space<vmem>>, vector<1x128xf32>
      %130 = arith.index_cast %127 : i32 to index
      %c0_48 = arith.constant 0 : index
      %131 = vector.load %arg5[%130, %c0_48] : memref<4x128xf32, #tpu.memory_space<vmem>>, vector<1x128xf32>
      %132 = arith.mulf %129, %131 : vector<1x128xf32>
      %c1 = arith.constant 1 : index
      %c0_49 = arith.constant 0 : index
      %133 = vector.load %arg11[%c1, %c0_49] : memref<32x128xf32, #tpu.memory_space<vmem>>, vector<1x128xf32>
      %134 = vector.broadcast %122 : f32 to vector<1x128xf32>
      %135 = arith.mulf %134, %132 : vector<1x128xf32>
      %136 = arith.addf %133, %135 : vector<1x128xf32>
      %c1_50 = arith.constant 1 : index
      %c0_51 = arith.constant 0 : index
      %137 = vector.load %arg11[%c1_50, %c0_51] : memref<32x128xf32, #tpu.memory_space<vmem>>, vector<1x128xf32>
      tpu.vector_store %arg11[%c1_50, %c0_51], %136 {strides = array<i32>} : memref<32x128xf32, #tpu.memory_space<vmem>>, vector<1x128xf32>,
      %138 = arith.index_cast %2 : i32 to index
      %139 = arith.index_cast %arg13 : i32 to index
      %140 = memref.load %arg2[%138, %139] : memref<64x32xi32, #tpu.memory_space<smem>>
      %c2_i32_52 = arith.constant 2 : i32
      %141 = arith.shrsi %140, %c2_i32_52 : i32
      %c3_i32_53 = arith.constant 3 : i32
      %142 = arith.andi %140, %c3_i32_53 : i32
      %143 = arith.index_cast %141 : i32 to index
      %c0_54 = arith.constant 0 : index
      %144 = vector.load %arg4[%143, %c0_54] : memref<12289x128xf32, #tpu.memory_space<vmem>>, vector<1x128xf32>
      %145 = arith.index_cast %142 : i32 to index
      %c0_55 = arith.constant 0 : index
      %146 = vector.load %arg5[%145, %c0_55] : memref<4x128xf32, #tpu.memory_space<vmem>>, vector<1x128xf32>
      %147 = arith.mulf %144, %146 : vector<1x128xf32>
      %c1_56 = arith.constant 1 : index
      %c0_57 = arith.constant 0 : index
      %148 = vector.load %arg12[%c1_56, %c0_57] : memref<32x128xf32, #tpu.memory_space<vmem>>, vector<1x128xf32>
      %149 = vector.broadcast %122 : f32 to vector<1x128xf32>
      %150 = arith.mulf %149, %147 : vector<1x128xf32>
      %151 = arith.addf %148, %150 : vector<1x128xf32>
      %c1_58 = arith.constant 1 : index
      %c0_59 = arith.constant 0 : index
      %152 = vector.load %arg12[%c1_58, %c0_59] : memref<32x128xf32, #tpu.memory_space<vmem>>, vector<1x128xf32>
      tpu.vector_store %arg12[%c1_58, %c0_59], %151 {strides = array<i32>} : memref<32x128xf32, #tpu.memory_space<vmem>>, vector<1x128xf32>,
      %153 = arith.index_cast %3 : i32 to index
      %154 = arith.index_cast %arg13 : i32 to index
      %155 = memref.load %arg3[%153, %154] : memref<64x32xf32, #tpu.memory_space<smem>>
      %156 = arith.index_cast %3 : i32 to index
      %157 = arith.index_cast %arg13 : i32 to index
      %158 = memref.load %arg1[%156, %157] : memref<64x32xi32, #tpu.memory_space<smem>>
      %c2_i32_60 = arith.constant 2 : i32
      %159 = arith.shrsi %158, %c2_i32_60 : i32
      %c3_i32_61 = arith.constant 3 : i32
      %160 = arith.andi %158, %c3_i32_61 : i32
      %161 = arith.index_cast %159 : i32 to index
      %c0_62 = arith.constant 0 : index
      %162 = vector.load %arg4[%161, %c0_62] : memref<12289x128xf32, #tpu.memory_space<vmem>>, vector<1x128xf32>
      %163 = arith.index_cast %160 : i32 to index
      %c0_63 = arith.constant 0 : index
      %164 = vector.load %arg5[%163, %c0_63] : memref<4x128xf32, #tpu.memory_space<vmem>>, vector<1x128xf32>
      %165 = arith.mulf %162, %164 : vector<1x128xf32>
      %c2 = arith.constant 2 : index
      %c0_64 = arith.constant 0 : index
      %166 = vector.load %arg11[%c2, %c0_64] : memref<32x128xf32, #tpu.memory_space<vmem>>, vector<1x128xf32>
      %167 = vector.broadcast %155 : f32 to vector<1x128xf32>
      %168 = arith.mulf %167, %165 : vector<1x128xf32>
      %169 = arith.addf %166, %168 : vector<1x128xf32>
      %c2_65 = arith.constant 2 : index
      %c0_66 = arith.constant 0 : index
      %170 = vector.load %arg11[%c2_65, %c0_66] : memref<32x128xf32, #tpu.memory_space<vmem>>, vector<1x128xf32>
      tpu.vector_store %arg11[%c2_65, %c0_66], %169 {strides = array<i32>} : memref<32x128xf32, #tpu.memory_space<vmem>>, vector<1x128xf32>,
      %171 = arith.index_cast %3 : i32 to index
      %172 = arith.index_cast %arg13 : i32 to index
      %173 = memref.load %arg2[%171, %172] : memref<64x32xi32, #tpu.memory_space<smem>>
      %c2_i32_67 = arith.constant 2 : i32
      %174 = arith.shrsi %173, %c2_i32_67 : i32
      %c3_i32_68 = arith.constant 3 : i32
      %175 = arith.andi %173, %c3_i32_68 : i32
      %176 = arith.index_cast %174 : i32 to index
      %c0_69 = arith.constant 0 : index
      %177 = vector.load %arg4[%176, %c0_69] : memref<12289x128xf32, #tpu.memory_space<vmem>>, vector<1x128xf32>
      %178 = arith.index_cast %175 : i32 to index
      %c0_70 = arith.constant 0 : index
      %179 = vector.load %arg5[%178, %c0_70] : memref<4x128xf32, #tpu.memory_space<vmem>>, vector<1x128xf32>
      %180 = arith.mulf %177, %179 : vector<1x128xf32>
      %c2_71 = arith.constant 2 : index
      %c0_72 = arith.constant 0 : index
      %181 = vector.load %arg12[%c2_71, %c0_72] : memref<32x128xf32, #tpu.memory_space<vmem>>, vector<1x128xf32>
      %182 = vector.broadcast %155 : f32 to vector<1x128xf32>
      %183 = arith.mulf %182, %180 : vector<1x128xf32>
      %184 = arith.addf %181, %183 : vector<1x128xf32>
      %c2_73 = arith.constant 2 : index
      %c0_74 = arith.constant 0 : index
      %185 = vector.load %arg12[%c2_73, %c0_74] : memref<32x128xf32, #tpu.memory_space<vmem>>, vector<1x128xf32>
      tpu.vector_store %arg12[%c2_73, %c0_74], %184 {strides = array<i32>} : memref<32x128xf32, #tpu.memory_space<vmem>>, vector<1x128xf32>,
      %186 = arith.index_cast %4 : i32 to index
      %187 = arith.index_cast %arg13 : i32 to index
      %188 = memref.load %arg3[%186, %187] : memref<64x32xf32, #tpu.memory_space<smem>>
      %189 = arith.index_cast %4 : i32 to index
      %190 = arith.index_cast %arg13 : i32 to index
      %191 = memref.load %arg1[%189, %190] : memref<64x32xi32, #tpu.memory_space<smem>>
      %c2_i32_75 = arith.constant 2 : i32
      %192 = arith.shrsi %191, %c2_i32_75 : i32
      %c3_i32_76 = arith.constant 3 : i32
      %193 = arith.andi %191, %c3_i32_76 : i32
      %194 = arith.index_cast %192 : i32 to index
      %c0_77 = arith.constant 0 : index
      %195 = vector.load %arg4[%194, %c0_77] : memref<12289x128xf32, #tpu.memory_space<vmem>>, vector<1x128xf32>
      %196 = arith.index_cast %193 : i32 to index
      %c0_78 = arith.constant 0 : index
      %197 = vector.load %arg5[%196, %c0_78] : memref<4x128xf32, #tpu.memory_space<vmem>>, vector<1x128xf32>
      %198 = arith.mulf %195, %197 : vector<1x128xf32>
      %c3 = arith.constant 3 : index
      %c0_79 = arith.constant 0 : index
      %199 = vector.load %arg11[%c3, %c0_79] : memref<32x128xf32, #tpu.memory_space<vmem>>, vector<1x128xf32>
      %200 = vector.broadcast %188 : f32 to vector<1x128xf32>
      %201 = arith.mulf %200, %198 : vector<1x128xf32>
      %202 = arith.addf %199, %201 : vector<1x128xf32>
      %c3_80 = arith.constant 3 : index
      %c0_81 = arith.constant 0 : index
      %203 = vector.load %arg11[%c3_80, %c0_81] : memref<32x128xf32, #tpu.memory_space<vmem>>, vector<1x128xf32>
      tpu.vector_store %arg11[%c3_80, %c0_81], %202 {strides = array<i32>} : memref<32x128xf32, #tpu.memory_space<vmem>>, vector<1x128xf32>,
      %204 = arith.index_cast %4 : i32 to index
      %205 = arith.index_cast %arg13 : i32 to index
      %206 = memref.load %arg2[%204, %205] : memref<64x32xi32, #tpu.memory_space<smem>>
      %c2_i32_82 = arith.constant 2 : i32
      %207 = arith.shrsi %206, %c2_i32_82 : i32
      %c3_i32_83 = arith.constant 3 : i32
      %208 = arith.andi %206, %c3_i32_83 : i32
      %209 = arith.index_cast %207 : i32 to index
      %c0_84 = arith.constant 0 : index
      %210 = vector.load %arg4[%209, %c0_84] : memref<12289x128xf32, #tpu.memory_space<vmem>>, vector<1x128xf32>
      %211 = arith.index_cast %208 : i32 to index
      %c0_85 = arith.constant 0 : index
      %212 = vector.load %arg5[%211, %c0_85] : memref<4x128xf32, #tpu.memory_space<vmem>>, vector<1x128xf32>
      %213 = arith.mulf %210, %212 : vector<1x128xf32>
      %c3_86 = arith.constant 3 : index
      %c0_87 = arith.constant 0 : index
      %214 = vector.load %arg12[%c3_86, %c0_87] : memref<32x128xf32, #tpu.memory_space<vmem>>, vector<1x128xf32>
      %215 = vector.broadcast %188 : f32 to vector<1x128xf32>
      %216 = arith.mulf %215, %213 : vector<1x128xf32>
      %217 = arith.addf %214, %216 : vector<1x128xf32>
      %c3_88 = arith.constant 3 : index
      %c0_89 = arith.constant 0 : index
      %218 = vector.load %arg12[%c3_88, %c0_89] : memref<32x128xf32, #tpu.memory_space<vmem>>, vector<1x128xf32>
      tpu.vector_store %arg12[%c3_88, %c0_89], %217 {strides = array<i32>} : memref<32x128xf32, #tpu.memory_space<vmem>>, vector<1x128xf32>,
      %219 = arith.index_cast %5 : i32 to index
      %220 = arith.index_cast %arg13 : i32 to index
      %221 = memref.load %arg3[%219, %220] : memref<64x32xf32, #tpu.memory_space<smem>>
      %222 = arith.index_cast %5 : i32 to index
      %223 = arith.index_cast %arg13 : i32 to index
      %224 = memref.load %arg1[%222, %223] : memref<64x32xi32, #tpu.memory_space<smem>>
      %c2_i32_90 = arith.constant 2 : i32
      %225 = arith.shrsi %224, %c2_i32_90 : i32
      %c3_i32_91 = arith.constant 3 : i32
      %226 = arith.andi %224, %c3_i32_91 : i32
      %227 = arith.index_cast %225 : i32 to index
      %c0_92 = arith.constant 0 : index
      %228 = vector.load %arg4[%227, %c0_92] : memref<12289x128xf32, #tpu.memory_space<vmem>>, vector<1x128xf32>
      %229 = arith.index_cast %226 : i32 to index
      %c0_93 = arith.constant 0 : index
      %230 = vector.load %arg5[%229, %c0_93] : memref<4x128xf32, #tpu.memory_space<vmem>>, vector<1x128xf32>
      %231 = arith.mulf %228, %230 : vector<1x128xf32>
      %c4 = arith.constant 4 : index
      %c0_94 = arith.constant 0 : index
      %232 = vector.load %arg11[%c4, %c0_94] : memref<32x128xf32, #tpu.memory_space<vmem>>, vector<1x128xf32>
      %233 = vector.broadcast %221 : f32 to vector<1x128xf32>
      %234 = arith.mulf %233, %231 : vector<1x128xf32>
      %235 = arith.addf %232, %234 : vector<1x128xf32>
      %c4_95 = arith.constant 4 : index
      %c0_96 = arith.constant 0 : index
      %236 = vector.load %arg11[%c4_95, %c0_96] : memref<32x128xf32, #tpu.memory_space<vmem>>, vector<1x128xf32>
      tpu.vector_store %arg11[%c4_95, %c0_96], %235 {strides = array<i32>} : memref<32x128xf32, #tpu.memory_space<vmem>>, vector<1x128xf32>,
      %237 = arith.index_cast %5 : i32 to index
      %238 = arith.index_cast %arg13 : i32 to index
      %239 = memref.load %arg2[%237, %238] : memref<64x32xi32, #tpu.memory_space<smem>>
      %c2_i32_97 = arith.constant 2 : i32
      %240 = arith.shrsi %239, %c2_i32_97 : i32
      %c3_i32_98 = arith.constant 3 : i32
      %241 = arith.andi %239, %c3_i32_98 : i32
      %242 = arith.index_cast %240 : i32 to index
      %c0_99 = arith.constant 0 : index
      %243 = vector.load %arg4[%242, %c0_99] : memref<12289x128xf32, #tpu.memory_space<vmem>>, vector<1x128xf32>
      %244 = arith.index_cast %241 : i32 to index
      %c0_100 = arith.constant 0 : index
      %245 = vector.load %arg5[%244, %c0_100] : memref<4x128xf32, #tpu.memory_space<vmem>>, vector<1x128xf32>
      %246 = arith.mulf %243, %245 : vector<1x128xf32>
      %c4_101 = arith.constant 4 : index
      %c0_102 = arith.constant 0 : index
      %247 = vector.load %arg12[%c4_101, %c0_102] : memref<32x128xf32, #tpu.memory_space<vmem>>, vector<1x128xf32>
      %248 = vector.broadcast %221 : f32 to vector<1x128xf32>
      %249 = arith.mulf %248, %246 : vector<1x128xf32>
      %250 = arith.addf %247, %249 : vector<1x128xf32>
      %c4_103 = arith.constant 4 : index
      %c0_104 = arith.constant 0 : index
      %251 = vector.load %arg12[%c4_103, %c0_104] : memref<32x128xf32, #tpu.memory_space<vmem>>, vector<1x128xf32>
      tpu.vector_store %arg12[%c4_103, %c0_104], %250 {strides = array<i32>} : memref<32x128xf32, #tpu.memory_space<vmem>>, vector<1x128xf32>,
      %252 = arith.index_cast %6 : i32 to index
      %253 = arith.index_cast %arg13 : i32 to index
      %254 = memref.load %arg3[%252, %253] : memref<64x32xf32, #tpu.memory_space<smem>>
      %255 = arith.index_cast %6 : i32 to index
      %256 = arith.index_cast %arg13 : i32 to index
      %257 = memref.load %arg1[%255, %256] : memref<64x32xi32, #tpu.memory_space<smem>>
      %c2_i32_105 = arith.constant 2 : i32
      %258 = arith.shrsi %257, %c2_i32_105 : i32
      %c3_i32_106 = arith.constant 3 : i32
      %259 = arith.andi %257, %c3_i32_106 : i32
      %260 = arith.index_cast %258 : i32 to index
      %c0_107 = arith.constant 0 : index
      %261 = vector.load %arg4[%260, %c0_107] : memref<12289x128xf32, #tpu.memory_space<vmem>>, vector<1x128xf32>
      %262 = arith.index_cast %259 : i32 to index
      %c0_108 = arith.constant 0 : index
      %263 = vector.load %arg5[%262, %c0_108] : memref<4x128xf32, #tpu.memory_space<vmem>>, vector<1x128xf32>
      %264 = arith.mulf %261, %263 : vector<1x128xf32>
      %c5 = arith.constant 5 : index
      %c0_109 = arith.constant 0 : index
      %265 = vector.load %arg11[%c5, %c0_109] : memref<32x128xf32, #tpu.memory_space<vmem>>, vector<1x128xf32>
      %266 = vector.broadcast %254 : f32 to vector<1x128xf32>
      %267 = arith.mulf %266, %264 : vector<1x128xf32>
      %268 = arith.addf %265, %267 : vector<1x128xf32>
      %c5_110 = arith.constant 5 : index
      %c0_111 = arith.constant 0 : index
      %269 = vector.load %arg11[%c5_110, %c0_111] : memref<32x128xf32, #tpu.memory_space<vmem>>, vector<1x128xf32>
      tpu.vector_store %arg11[%c5_110, %c0_111], %268 {strides = array<i32>} : memref<32x128xf32, #tpu.memory_space<vmem>>, vector<1x128xf32>,
      %270 = arith.index_cast %6 : i32 to index
      %271 = arith.index_cast %arg13 : i32 to index
      %272 = memref.load %arg2[%270, %271] : memref<64x32xi32, #tpu.memory_space<smem>>
      %c2_i32_112 = arith.constant 2 : i32
      %273 = arith.shrsi %272, %c2_i32_112 : i32
      %c3_i32_113 = arith.constant 3 : i32
      %274 = arith.andi %272, %c3_i32_113 : i32
      %275 = arith.index_cast %273 : i32 to index
      %c0_114 = arith.constant 0 : index
      %276 = vector.load %arg4[%275, %c0_114] : memref<12289x128xf32, #tpu.memory_space<vmem>>, vector<1x128xf32>
      %277 = arith.index_cast %274 : i32 to index
      %c0_115 = arith.constant 0 : index
      %278 = vector.load %arg5[%277, %c0_115] : memref<4x128xf32, #tpu.memory_space<vmem>>, vector<1x128xf32>
      %279 = arith.mulf %276, %278 : vector<1x128xf32>
      %c5_116 = arith.constant 5 : index
      %c0_117 = arith.constant 0 : index
      %280 = vector.load %arg12[%c5_116, %c0_117] : memref<32x128xf32, #tpu.memory_space<vmem>>, vector<1x128xf32>
      %281 = vector.broadcast %254 : f32 to vector<1x128xf32>
      %282 = arith.mulf %281, %279 : vector<1x128xf32>
      %283 = arith.addf %280, %282 : vector<1x128xf32>
      %c5_118 = arith.constant 5 : index
      %c0_119 = arith.constant 0 : index
      %284 = vector.load %arg12[%c5_118, %c0_119] : memref<32x128xf32, #tpu.memory_space<vmem>>, vector<1x128xf32>
      tpu.vector_store %arg12[%c5_118, %c0_119], %283 {strides = array<i32>} : memref<32x128xf32, #tpu.memory_space<vmem>>, vector<1x128xf32>,
      %285 = arith.index_cast %7 : i32 to index
      %286 = arith.index_cast %arg13 : i32 to index
      %287 = memref.load %arg3[%285, %286] : memref<64x32xf32, #tpu.memory_space<smem>>
      %288 = arith.index_cast %7 : i32 to index
      %289 = arith.index_cast %arg13 : i32 to index
      %290 = memref.load %arg1[%288, %289] : memref<64x32xi32, #tpu.memory_space<smem>>
      %c2_i32_120 = arith.constant 2 : i32
      %291 = arith.shrsi %290, %c2_i32_120 : i32
      %c3_i32_121 = arith.constant 3 : i32
      %292 = arith.andi %290, %c3_i32_121 : i32
      %293 = arith.index_cast %291 : i32 to index
      %c0_122 = arith.constant 0 : index
      %294 = vector.load %arg4[%293, %c0_122] : memref<12289x128xf32, #tpu.memory_space<vmem>>, vector<1x128xf32>
      %295 = arith.index_cast %292 : i32 to index
      %c0_123 = arith.constant 0 : index
      %296 = vector.load %arg5[%295, %c0_123] : memref<4x128xf32, #tpu.memory_space<vmem>>, vector<1x128xf32>
      %297 = arith.mulf %294, %296 : vector<1x128xf32>
      %c6 = arith.constant 6 : index
      %c0_124 = arith.constant 0 : index
      %298 = vector.load %arg11[%c6, %c0_124] : memref<32x128xf32, #tpu.memory_space<vmem>>, vector<1x128xf32>
      %299 = vector.broadcast %287 : f32 to vector<1x128xf32>
      %300 = arith.mulf %299, %297 : vector<1x128xf32>
      %301 = arith.addf %298, %300 : vector<1x128xf32>
      %c6_125 = arith.constant 6 : index
      %c0_126 = arith.constant 0 : index
      %302 = vector.load %arg11[%c6_125, %c0_126] : memref<32x128xf32, #tpu.memory_space<vmem>>, vector<1x128xf32>
      tpu.vector_store %arg11[%c6_125, %c0_126], %301 {strides = array<i32>} : memref<32x128xf32, #tpu.memory_space<vmem>>, vector<1x128xf32>,
      %303 = arith.index_cast %7 : i32 to index
      %304 = arith.index_cast %arg13 : i32 to index
      %305 = memref.load %arg2[%303, %304] : memref<64x32xi32, #tpu.memory_space<smem>>
      %c2_i32_127 = arith.constant 2 : i32
      %306 = arith.shrsi %305, %c2_i32_127 : i32
      %c3_i32_128 = arith.constant 3 : i32
      %307 = arith.andi %305, %c3_i32_128 : i32
      %308 = arith.index_cast %306 : i32 to index
      %c0_129 = arith.constant 0 : index
      %309 = vector.load %arg4[%308, %c0_129] : memref<12289x128xf32, #tpu.memory_space<vmem>>, vector<1x128xf32>
      %310 = arith.index_cast %307 : i32 to index
      %c0_130 = arith.constant 0 : index
      %311 = vector.load %arg5[%310, %c0_130] : memref<4x128xf32, #tpu.memory_space<vmem>>, vector<1x128xf32>
      %312 = arith.mulf %309, %311 : vector<1x128xf32>
      %c6_131 = arith.constant 6 : index
      %c0_132 = arith.constant 0 : index
      %313 = vector.load %arg12[%c6_131, %c0_132] : memref<32x128xf32, #tpu.memory_space<vmem>>, vector<1x128xf32>
      %314 = vector.broadcast %287 : f32 to vector<1x128xf32>
      %315 = arith.mulf %314, %312 : vector<1x128xf32>
      %316 = arith.addf %313, %315 : vector<1x128xf32>
      %c6_133 = arith.constant 6 : index
      %c0_134 = arith.constant 0 : index
      %317 = vector.load %arg12[%c6_133, %c0_134] : memref<32x128xf32, #tpu.memory_space<vmem>>, vector<1x128xf32>
      tpu.vector_store %arg12[%c6_133, %c0_134], %316 {strides = array<i32>} : memref<32x128xf32, #tpu.memory_space<vmem>>, vector<1x128xf32>,
      %318 = arith.index_cast %8 : i32 to index
      %319 = arith.index_cast %arg13 : i32 to index
      %320 = memref.load %arg3[%318, %319] : memref<64x32xf32, #tpu.memory_space<smem>>
      %321 = arith.index_cast %8 : i32 to index
      %322 = arith.index_cast %arg13 : i32 to index
      %323 = memref.load %arg1[%321, %322] : memref<64x32xi32, #tpu.memory_space<smem>>
      %c2_i32_135 = arith.constant 2 : i32
      %324 = arith.shrsi %323, %c2_i32_135 : i32
      %c3_i32_136 = arith.constant 3 : i32
      %325 = arith.andi %323, %c3_i32_136 : i32
      %326 = arith.index_cast %324 : i32 to index
      %c0_137 = arith.constant 0 : index
      %327 = vector.load %arg4[%326, %c0_137] : memref<12289x128xf32, #tpu.memory_space<vmem>>, vector<1x128xf32>
      %328 = arith.index_cast %325 : i32 to index
      %c0_138 = arith.constant 0 : index
      %329 = vector.load %arg5[%328, %c0_138] : memref<4x128xf32, #tpu.memory_space<vmem>>, vector<1x128xf32>
      %330 = arith.mulf %327, %329 : vector<1x128xf32>
      %c7 = arith.constant 7 : index
      %c0_139 = arith.constant 0 : index
      %331 = vector.load %arg11[%c7, %c0_139] : memref<32x128xf32, #tpu.memory_space<vmem>>, vector<1x128xf32>
      %332 = vector.broadcast %320 : f32 to vector<1x128xf32>
      %333 = arith.mulf %332, %330 : vector<1x128xf32>
      %334 = arith.addf %331, %333 : vector<1x128xf32>
      %c7_140 = arith.constant 7 : index
      %c0_141 = arith.constant 0 : index
      %335 = vector.load %arg11[%c7_140, %c0_141] : memref<32x128xf32, #tpu.memory_space<vmem>>, vector<1x128xf32>
      tpu.vector_store %arg11[%c7_140, %c0_141], %334 {strides = array<i32>} : memref<32x128xf32, #tpu.memory_space<vmem>>, vector<1x128xf32>,
      %336 = arith.index_cast %8 : i32 to index
      %337 = arith.index_cast %arg13 : i32 to index
      %338 = memref.load %arg2[%336, %337] : memref<64x32xi32, #tpu.memory_space<smem>>
      %c2_i32_142 = arith.constant 2 : i32
      %339 = arith.shrsi %338, %c2_i32_142 : i32
      %c3_i32_143 = arith.constant 3 : i32
      %340 = arith.andi %338, %c3_i32_143 : i32
      %341 = arith.index_cast %339 : i32 to index
      %c0_144 = arith.constant 0 : index
      %342 = vector.load %arg4[%341, %c0_144] : memref<12289x128xf32, #tpu.memory_space<vmem>>, vector<1x128xf32>
      %343 = arith.index_cast %340 : i32 to index
      %c0_145 = arith.constant 0 : index
      %344 = vector.load %arg5[%343, %c0_145] : memref<4x128xf32, #tpu.memory_space<vmem>>, vector<1x128xf32>
      %345 = arith.mulf %342, %344 : vector<1x128xf32>
      %c7_146 = arith.constant 7 : index
      %c0_147 = arith.constant 0 : index
      %346 = vector.load %arg12[%c7_146, %c0_147] : memref<32x128xf32, #tpu.memory_space<vmem>>, vector<1x128xf32>
      %347 = vector.broadcast %320 : f32 to vector<1x128xf32>
      %348 = arith.mulf %347, %345 : vector<1x128xf32>
      %349 = arith.addf %346, %348 : vector<1x128xf32>
      %c7_148 = arith.constant 7 : index
      %c0_149 = arith.constant 0 : index
      %350 = vector.load %arg12[%c7_148, %c0_149] : memref<32x128xf32, #tpu.memory_space<vmem>>, vector<1x128xf32>
      tpu.vector_store %arg12[%c7_148, %c0_149], %349 {strides = array<i32>} : memref<32x128xf32, #tpu.memory_space<vmem>>, vector<1x128xf32>,
      %351 = arith.index_cast %9 : i32 to index
      %352 = arith.index_cast %arg13 : i32 to index
      %353 = memref.load %arg3[%351, %352] : memref<64x32xf32, #tpu.memory_space<smem>>
      %354 = arith.index_cast %9 : i32 to index
      %355 = arith.index_cast %arg13 : i32 to index
      %356 = memref.load %arg1[%354, %355] : memref<64x32xi32, #tpu.memory_space<smem>>
      %c2_i32_150 = arith.constant 2 : i32
      %357 = arith.shrsi %356, %c2_i32_150 : i32
      %c3_i32_151 = arith.constant 3 : i32
      %358 = arith.andi %356, %c3_i32_151 : i32
      %359 = arith.index_cast %357 : i32 to index
      %c0_152 = arith.constant 0 : index
      %360 = vector.load %arg4[%359, %c0_152] : memref<12289x128xf32, #tpu.memory_space<vmem>>, vector<1x128xf32>
      %361 = arith.index_cast %358 : i32 to index
      %c0_153 = arith.constant 0 : index
      %362 = vector.load %arg5[%361, %c0_153] : memref<4x128xf32, #tpu.memory_space<vmem>>, vector<1x128xf32>
      %363 = arith.mulf %360, %362 : vector<1x128xf32>
      %c8 = arith.constant 8 : index
      %c0_154 = arith.constant 0 : index
      %364 = vector.load %arg11[%c8, %c0_154] : memref<32x128xf32, #tpu.memory_space<vmem>>, vector<1x128xf32>
      %365 = vector.broadcast %353 : f32 to vector<1x128xf32>
      %366 = arith.mulf %365, %363 : vector<1x128xf32>
      %367 = arith.addf %364, %366 : vector<1x128xf32>
      %c8_155 = arith.constant 8 : index
      %c0_156 = arith.constant 0 : index
      %368 = vector.load %arg11[%c8_155, %c0_156] : memref<32x128xf32, #tpu.memory_space<vmem>>, vector<1x128xf32>
      tpu.vector_store %arg11[%c8_155, %c0_156], %367 {strides = array<i32>} : memref<32x128xf32, #tpu.memory_space<vmem>>, vector<1x128xf32>,
      %369 = arith.index_cast %9 : i32 to index
      %370 = arith.index_cast %arg13 : i32 to index
      %371 = memref.load %arg2[%369, %370] : memref<64x32xi32, #tpu.memory_space<smem>>
      %c2_i32_157 = arith.constant 2 : i32
      %372 = arith.shrsi %371, %c2_i32_157 : i32
      %c3_i32_158 = arith.constant 3 : i32
      %373 = arith.andi %371, %c3_i32_158 : i32
      %374 = arith.index_cast %372 : i32 to index
      %c0_159 = arith.constant 0 : index
      %375 = vector.load %arg4[%374, %c0_159] : memref<12289x128xf32, #tpu.memory_space<vmem>>, vector<1x128xf32>
      %376 = arith.index_cast %373 : i32 to index
      %c0_160 = arith.constant 0 : index
      %377 = vector.load %arg5[%376, %c0_160] : memref<4x128xf32, #tpu.memory_space<vmem>>, vector<1x128xf32>
      %378 = arith.mulf %375, %377 : vector<1x128xf32>
      %c8_161 = arith.constant 8 : index
      %c0_162 = arith.constant 0 : index
      %379 = vector.load %arg12[%c8_161, %c0_162] : memref<32x128xf32, #tpu.memory_space<vmem>>, vector<1x128xf32>
      %380 = vector.broadcast %353 : f32 to vector<1x128xf32>
      %381 = arith.mulf %380, %378 : vector<1x128xf32>
      %382 = arith.addf %379, %381 : vector<1x128xf32>
      %c8_163 = arith.constant 8 : index
      %c0_164 = arith.constant 0 : index
      %383 = vector.load %arg12[%c8_163, %c0_164] : memref<32x128xf32, #tpu.memory_space<vmem>>, vector<1x128xf32>
      tpu.vector_store %arg12[%c8_163, %c0_164], %382 {strides = array<i32>} : memref<32x128xf32, #tpu.memory_space<vmem>>, vector<1x128xf32>,
      %384 = arith.index_cast %10 : i32 to index
      %385 = arith.index_cast %arg13 : i32 to index
      %386 = memref.load %arg3[%384, %385] : memref<64x32xf32, #tpu.memory_space<smem>>
      %387 = arith.index_cast %10 : i32 to index
      %388 = arith.index_cast %arg13 : i32 to index
      %389 = memref.load %arg1[%387, %388] : memref<64x32xi32, #tpu.memory_space<smem>>
      %c2_i32_165 = arith.constant 2 : i32
      %390 = arith.shrsi %389, %c2_i32_165 : i32
      %c3_i32_166 = arith.constant 3 : i32
      %391 = arith.andi %389, %c3_i32_166 : i32
      %392 = arith.index_cast %390 : i32 to index
      %c0_167 = arith.constant 0 : index
      %393 = vector.load %arg4[%392, %c0_167] : memref<12289x128xf32, #tpu.memory_space<vmem>>, vector<1x128xf32>
      %394 = arith.index_cast %391 : i32 to index
      %c0_168 = arith.constant 0 : index
      %395 = vector.load %arg5[%394, %c0_168] : memref<4x128xf32, #tpu.memory_space<vmem>>, vector<1x128xf32>
      %396 = arith.mulf %393, %395 : vector<1x128xf32>
      %c9 = arith.constant 9 : index
      %c0_169 = arith.constant 0 : index
      %397 = vector.load %arg11[%c9, %c0_169] : memref<32x128xf32, #tpu.memory_space<vmem>>, vector<1x128xf32>
      %398 = vector.broadcast %386 : f32 to vector<1x128xf32>
      %399 = arith.mulf %398, %396 : vector<1x128xf32>
      %400 = arith.addf %397, %399 : vector<1x128xf32>
      %c9_170 = arith.constant 9 : index
      %c0_171 = arith.constant 0 : index
      %401 = vector.load %arg11[%c9_170, %c0_171] : memref<32x128xf32, #tpu.memory_space<vmem>>, vector<1x128xf32>
      tpu.vector_store %arg11[%c9_170, %c0_171], %400 {strides = array<i32>} : memref<32x128xf32, #tpu.memory_space<vmem>>, vector<1x128xf32>,
      %402 = arith.index_cast %10 : i32 to index
      %403 = arith.index_cast %arg13 : i32 to index
      %404 = memref.load %arg2[%402, %403] : memref<64x32xi32, #tpu.memory_space<smem>>
      %c2_i32_172 = arith.constant 2 : i32
      %405 = arith.shrsi %404, %c2_i32_172 : i32
      %c3_i32_173 = arith.constant 3 : i32
      %406 = arith.andi %404, %c3_i32_173 : i32
      %407 = arith.index_cast %405 : i32 to index
      %c0_174 = arith.constant 0 : index
      %408 = vector.load %arg4[%407, %c0_174] : memref<12289x128xf32, #tpu.memory_space<vmem>>, vector<1x128xf32>
      %409 = arith.index_cast %406 : i32 to index
      %c0_175 = arith.constant 0 : index
      %410 = vector.load %arg5[%409, %c0_175] : memref<4x128xf32, #tpu.memory_space<vmem>>, vector<1x128xf32>
      %411 = arith.mulf %408, %410 : vector<1x128xf32>
      %c9_176 = arith.constant 9 : index
      %c0_177 = arith.constant 0 : index
      %412 = vector.load %arg12[%c9_176, %c0_177] : memref<32x128xf32, #tpu.memory_space<vmem>>, vector<1x128xf32>
      %413 = vector.broadcast %386 : f32 to vector<1x128xf32>
      %414 = arith.mulf %413, %411 : vector<1x128xf32>
      %415 = arith.addf %412, %414 : vector<1x128xf32>
      %c9_178 = arith.constant 9 : index
      %c0_179 = arith.constant 0 : index
      %416 = vector.load %arg12[%c9_178, %c0_179] : memref<32x128xf32, #tpu.memory_space<vmem>>, vector<1x128xf32>
      tpu.vector_store %arg12[%c9_178, %c0_179], %415 {strides = array<i32>} : memref<32x128xf32, #tpu.memory_space<vmem>>, vector<1x128xf32>,
      %417 = arith.index_cast %11 : i32 to index
      %418 = arith.index_cast %arg13 : i32 to index
      %419 = memref.load %arg3[%417, %418] : memref<64x32xf32, #tpu.memory_space<smem>>
      %420 = arith.index_cast %11 : i32 to index
      %421 = arith.index_cast %arg13 : i32 to index
      %422 = memref.load %arg1[%420, %421] : memref<64x32xi32, #tpu.memory_space<smem>>
      %c2_i32_180 = arith.constant 2 : i32
      %423 = arith.shrsi %422, %c2_i32_180 : i32
      %c3_i32_181 = arith.constant 3 : i32
      %424 = arith.andi %422, %c3_i32_181 : i32
      %425 = arith.index_cast %423 : i32 to index
      %c0_182 = arith.constant 0 : index
      %426 = vector.load %arg4[%425, %c0_182] : memref<12289x128xf32, #tpu.memory_space<vmem>>, vector<1x128xf32>
      %427 = arith.index_cast %424 : i32 to index
      %c0_183 = arith.constant 0 : index
      %428 = vector.load %arg5[%427, %c0_183] : memref<4x128xf32, #tpu.memory_space<vmem>>, vector<1x128xf32>
      %429 = arith.mulf %426, %428 : vector<1x128xf32>
      %c10 = arith.constant 10 : index
      %c0_184 = arith.constant 0 : index
      %430 = vector.load %arg11[%c10, %c0_184] : memref<32x128xf32, #tpu.memory_space<vmem>>, vector<1x128xf32>
      %431 = vector.broadcast %419 : f32 to vector<1x128xf32>
      %432 = arith.mulf %431, %429 : vector<1x128xf32>
      %433 = arith.addf %430, %432 : vector<1x128xf32>
      %c10_185 = arith.constant 10 : index
      %c0_186 = arith.constant 0 : index
      %434 = vector.load %arg11[%c10_185, %c0_186] : memref<32x128xf32, #tpu.memory_space<vmem>>, vector<1x128xf32>
      tpu.vector_store %arg11[%c10_185, %c0_186], %433 {strides = array<i32>} : memref<32x128xf32, #tpu.memory_space<vmem>>, vector<1x128xf32>,
      %435 = arith.index_cast %11 : i32 to index
      %436 = arith.index_cast %arg13 : i32 to index
      %437 = memref.load %arg2[%435, %436] : memref<64x32xi32, #tpu.memory_space<smem>>
      %c2_i32_187 = arith.constant 2 : i32
      %438 = arith.shrsi %437, %c2_i32_187 : i32
      %c3_i32_188 = arith.constant 3 : i32
      %439 = arith.andi %437, %c3_i32_188 : i32
      %440 = arith.index_cast %438 : i32 to index
      %c0_189 = arith.constant 0 : index
      %441 = vector.load %arg4[%440, %c0_189] : memref<12289x128xf32, #tpu.memory_space<vmem>>, vector<1x128xf32>
      %442 = arith.index_cast %439 : i32 to index
      %c0_190 = arith.constant 0 : index
      %443 = vector.load %arg5[%442, %c0_190] : memref<4x128xf32, #tpu.memory_space<vmem>>, vector<1x128xf32>
      %444 = arith.mulf %441, %443 : vector<1x128xf32>
      %c10_191 = arith.constant 10 : index
      %c0_192 = arith.constant 0 : index
      %445 = vector.load %arg12[%c10_191, %c0_192] : memref<32x128xf32, #tpu.memory_space<vmem>>, vector<1x128xf32>
      %446 = vector.broadcast %419 : f32 to vector<1x128xf32>
      %447 = arith.mulf %446, %444 : vector<1x128xf32>
      %448 = arith.addf %445, %447 : vector<1x128xf32>
      %c10_193 = arith.constant 10 : index
      %c0_194 = arith.constant 0 : index
      %449 = vector.load %arg12[%c10_193, %c0_194] : memref<32x128xf32, #tpu.memory_space<vmem>>, vector<1x128xf32>
      tpu.vector_store %arg12[%c10_193, %c0_194], %448 {strides = array<i32>} : memref<32x128xf32, #tpu.memory_space<vmem>>, vector<1x128xf32>,
      %450 = arith.index_cast %12 : i32 to index
      %451 = arith.index_cast %arg13 : i32 to index
      %452 = memref.load %arg3[%450, %451] : memref<64x32xf32, #tpu.memory_space<smem>>
      %453 = arith.index_cast %12 : i32 to index
      %454 = arith.index_cast %arg13 : i32 to index
      %455 = memref.load %arg1[%453, %454] : memref<64x32xi32, #tpu.memory_space<smem>>
      %c2_i32_195 = arith.constant 2 : i32
      %456 = arith.shrsi %455, %c2_i32_195 : i32
      %c3_i32_196 = arith.constant 3 : i32
      %457 = arith.andi %455, %c3_i32_196 : i32
      %458 = arith.index_cast %456 : i32 to index
      %c0_197 = arith.constant 0 : index
      %459 = vector.load %arg4[%458, %c0_197] : memref<12289x128xf32, #tpu.memory_space<vmem>>, vector<1x128xf32>
      %460 = arith.index_cast %457 : i32 to index
      %c0_198 = arith.constant 0 : index
      %461 = vector.load %arg5[%460, %c0_198] : memref<4x128xf32, #tpu.memory_space<vmem>>, vector<1x128xf32>
      %462 = arith.mulf %459, %461 : vector<1x128xf32>
      %c11 = arith.constant 11 : index
      %c0_199 = arith.constant 0 : index
      %463 = vector.load %arg11[%c11, %c0_199] : memref<32x128xf32, #tpu.memory_space<vmem>>, vector<1x128xf32>
      %464 = vector.broadcast %452 : f32 to vector<1x128xf32>
      %465 = arith.mulf %464, %462 : vector<1x128xf32>
      %466 = arith.addf %463, %465 : vector<1x128xf32>
      %c11_200 = arith.constant 11 : index
      %c0_201 = arith.constant 0 : index
      %467 = vector.load %arg11[%c11_200, %c0_201] : memref<32x128xf32, #tpu.memory_space<vmem>>, vector<1x128xf32>
      tpu.vector_store %arg11[%c11_200, %c0_201], %466 {strides = array<i32>} : memref<32x128xf32, #tpu.memory_space<vmem>>, vector<1x128xf32>,
      %468 = arith.index_cast %12 : i32 to index
      %469 = arith.index_cast %arg13 : i32 to index
      %470 = memref.load %arg2[%468, %469] : memref<64x32xi32, #tpu.memory_space<smem>>
      %c2_i32_202 = arith.constant 2 : i32
      %471 = arith.shrsi %470, %c2_i32_202 : i32
      %c3_i32_203 = arith.constant 3 : i32
      %472 = arith.andi %470, %c3_i32_203 : i32
      %473 = arith.index_cast %471 : i32 to index
      %c0_204 = arith.constant 0 : index
      %474 = vector.load %arg4[%473, %c0_204] : memref<12289x128xf32, #tpu.memory_space<vmem>>, vector<1x128xf32>
      %475 = arith.index_cast %472 : i32 to index
      %c0_205 = arith.constant 0 : index
      %476 = vector.load %arg5[%475, %c0_205] : memref<4x128xf32, #tpu.memory_space<vmem>>, vector<1x128xf32>
      %477 = arith.mulf %474, %476 : vector<1x128xf32>
      %c11_206 = arith.constant 11 : index
      %c0_207 = arith.constant 0 : index
      %478 = vector.load %arg12[%c11_206, %c0_207] : memref<32x128xf32, #tpu.memory_space<vmem>>, vector<1x128xf32>
      %479 = vector.broadcast %452 : f32 to vector<1x128xf32>
      %480 = arith.mulf %479, %477 : vector<1x128xf32>
      %481 = arith.addf %478, %480 : vector<1x128xf32>
      %c11_208 = arith.constant 11 : index
      %c0_209 = arith.constant 0 : index
      %482 = vector.load %arg12[%c11_208, %c0_209] : memref<32x128xf32, #tpu.memory_space<vmem>>, vector<1x128xf32>
      tpu.vector_store %arg12[%c11_208, %c0_209], %481 {strides = array<i32>} : memref<32x128xf32, #tpu.memory_space<vmem>>, vector<1x128xf32>,
      %483 = arith.index_cast %13 : i32 to index
      %484 = arith.index_cast %arg13 : i32 to index
      %485 = memref.load %arg3[%483, %484] : memref<64x32xf32, #tpu.memory_space<smem>>
      %486 = arith.index_cast %13 : i32 to index
      %487 = arith.index_cast %arg13 : i32 to index
      %488 = memref.load %arg1[%486, %487] : memref<64x32xi32, #tpu.memory_space<smem>>
      %c2_i32_210 = arith.constant 2 : i32
      %489 = arith.shrsi %488, %c2_i32_210 : i32
      %c3_i32_211 = arith.constant 3 : i32
      %490 = arith.andi %488, %c3_i32_211 : i32
      %491 = arith.index_cast %489 : i32 to index
      %c0_212 = arith.constant 0 : index
      %492 = vector.load %arg4[%491, %c0_212] : memref<12289x128xf32, #tpu.memory_space<vmem>>, vector<1x128xf32>
      %493 = arith.index_cast %490 : i32 to index
      %c0_213 = arith.constant 0 : index
      %494 = vector.load %arg5[%493, %c0_213] : memref<4x128xf32, #tpu.memory_space<vmem>>, vector<1x128xf32>
      %495 = arith.mulf %492, %494 : vector<1x128xf32>
      %c12 = arith.constant 12 : index
      %c0_214 = arith.constant 0 : index
      %496 = vector.load %arg11[%c12, %c0_214] : memref<32x128xf32, #tpu.memory_space<vmem>>, vector<1x128xf32>
      %497 = vector.broadcast %485 : f32 to vector<1x128xf32>
      %498 = arith.mulf %497, %495 : vector<1x128xf32>
      %499 = arith.addf %496, %498 : vector<1x128xf32>
      %c12_215 = arith.constant 12 : index
      %c0_216 = arith.constant 0 : index
      %500 = vector.load %arg11[%c12_215, %c0_216] : memref<32x128xf32, #tpu.memory_space<vmem>>, vector<1x128xf32>
      tpu.vector_store %arg11[%c12_215, %c0_216], %499 {strides = array<i32>} : memref<32x128xf32, #tpu.memory_space<vmem>>, vector<1x128xf32>,
      %501 = arith.index_cast %13 : i32 to index
      %502 = arith.index_cast %arg13 : i32 to index
      %503 = memref.load %arg2[%501, %502] : memref<64x32xi32, #tpu.memory_space<smem>>
      %c2_i32_217 = arith.constant 2 : i32
      %504 = arith.shrsi %503, %c2_i32_217 : i32
      %c3_i32_218 = arith.constant 3 : i32
      %505 = arith.andi %503, %c3_i32_218 : i32
      %506 = arith.index_cast %504 : i32 to index
      %c0_219 = arith.constant 0 : index
      %507 = vector.load %arg4[%506, %c0_219] : memref<12289x128xf32, #tpu.memory_space<vmem>>, vector<1x128xf32>
      %508 = arith.index_cast %505 : i32 to index
      %c0_220 = arith.constant 0 : index
      %509 = vector.load %arg5[%508, %c0_220] : memref<4x128xf32, #tpu.memory_space<vmem>>, vector<1x128xf32>
      %510 = arith.mulf %507, %509 : vector<1x128xf32>
      %c12_221 = arith.constant 12 : index
      %c0_222 = arith.constant 0 : index
      %511 = vector.load %arg12[%c12_221, %c0_222] : memref<32x128xf32, #tpu.memory_space<vmem>>, vector<1x128xf32>
      %512 = vector.broadcast %485 : f32 to vector<1x128xf32>
      %513 = arith.mulf %512, %510 : vector<1x128xf32>
      %514 = arith.addf %511, %513 : vector<1x128xf32>
      %c12_223 = arith.constant 12 : index
      %c0_224 = arith.constant 0 : index
      %515 = vector.load %arg12[%c12_223, %c0_224] : memref<32x128xf32, #tpu.memory_space<vmem>>, vector<1x128xf32>
      tpu.vector_store %arg12[%c12_223, %c0_224], %514 {strides = array<i32>} : memref<32x128xf32, #tpu.memory_space<vmem>>, vector<1x128xf32>,
      %516 = arith.index_cast %14 : i32 to index
      %517 = arith.index_cast %arg13 : i32 to index
      %518 = memref.load %arg3[%516, %517] : memref<64x32xf32, #tpu.memory_space<smem>>
      %519 = arith.index_cast %14 : i32 to index
      %520 = arith.index_cast %arg13 : i32 to index
      %521 = memref.load %arg1[%519, %520] : memref<64x32xi32, #tpu.memory_space<smem>>
      %c2_i32_225 = arith.constant 2 : i32
      %522 = arith.shrsi %521, %c2_i32_225 : i32
      %c3_i32_226 = arith.constant 3 : i32
      %523 = arith.andi %521, %c3_i32_226 : i32
      %524 = arith.index_cast %522 : i32 to index
      %c0_227 = arith.constant 0 : index
      %525 = vector.load %arg4[%524, %c0_227] : memref<12289x128xf32, #tpu.memory_space<vmem>>, vector<1x128xf32>
      %526 = arith.index_cast %523 : i32 to index
      %c0_228 = arith.constant 0 : index
      %527 = vector.load %arg5[%526, %c0_228] : memref<4x128xf32, #tpu.memory_space<vmem>>, vector<1x128xf32>
      %528 = arith.mulf %525, %527 : vector<1x128xf32>
      %c13 = arith.constant 13 : index
      %c0_229 = arith.constant 0 : index
      %529 = vector.load %arg11[%c13, %c0_229] : memref<32x128xf32, #tpu.memory_space<vmem>>, vector<1x128xf32>
      %530 = vector.broadcast %518 : f32 to vector<1x128xf32>
      %531 = arith.mulf %530, %528 : vector<1x128xf32>
      %532 = arith.addf %529, %531 : vector<1x128xf32>
      %c13_230 = arith.constant 13 : index
      %c0_231 = arith.constant 0 : index
      %533 = vector.load %arg11[%c13_230, %c0_231] : memref<32x128xf32, #tpu.memory_space<vmem>>, vector<1x128xf32>
      tpu.vector_store %arg11[%c13_230, %c0_231], %532 {strides = array<i32>} : memref<32x128xf32, #tpu.memory_space<vmem>>, vector<1x128xf32>,
      %534 = arith.index_cast %14 : i32 to index
      %535 = arith.index_cast %arg13 : i32 to index
      %536 = memref.load %arg2[%534, %535] : memref<64x32xi32, #tpu.memory_space<smem>>
      %c2_i32_232 = arith.constant 2 : i32
      %537 = arith.shrsi %536, %c2_i32_232 : i32
      %c3_i32_233 = arith.constant 3 : i32
      %538 = arith.andi %536, %c3_i32_233 : i32
      %539 = arith.index_cast %537 : i32 to index
      %c0_234 = arith.constant 0 : index
      %540 = vector.load %arg4[%539, %c0_234] : memref<12289x128xf32, #tpu.memory_space<vmem>>, vector<1x128xf32>
      %541 = arith.index_cast %538 : i32 to index
      %c0_235 = arith.constant 0 : index
      %542 = vector.load %arg5[%541, %c0_235] : memref<4x128xf32, #tpu.memory_space<vmem>>, vector<1x128xf32>
      %543 = arith.mulf %540, %542 : vector<1x128xf32>
      %c13_236 = arith.constant 13 : index
      %c0_237 = arith.constant 0 : index
      %544 = vector.load %arg12[%c13_236, %c0_237] : memref<32x128xf32, #tpu.memory_space<vmem>>, vector<1x128xf32>
      %545 = vector.broadcast %518 : f32 to vector<1x128xf32>
      %546 = arith.mulf %545, %543 : vector<1x128xf32>
      %547 = arith.addf %544, %546 : vector<1x128xf32>
      %c13_238 = arith.constant 13 : index
      %c0_239 = arith.constant 0 : index
      %548 = vector.load %arg12[%c13_238, %c0_239] : memref<32x128xf32, #tpu.memory_space<vmem>>, vector<1x128xf32>
      tpu.vector_store %arg12[%c13_238, %c0_239], %547 {strides = array<i32>} : memref<32x128xf32, #tpu.memory_space<vmem>>, vector<1x128xf32>,
      %549 = arith.index_cast %15 : i32 to index
      %550 = arith.index_cast %arg13 : i32 to index
      %551 = memref.load %arg3[%549, %550] : memref<64x32xf32, #tpu.memory_space<smem>>
      %552 = arith.index_cast %15 : i32 to index
      %553 = arith.index_cast %arg13 : i32 to index
      %554 = memref.load %arg1[%552, %553] : memref<64x32xi32, #tpu.memory_space<smem>>
      %c2_i32_240 = arith.constant 2 : i32
      %555 = arith.shrsi %554, %c2_i32_240 : i32
      %c3_i32_241 = arith.constant 3 : i32
      %556 = arith.andi %554, %c3_i32_241 : i32
      %557 = arith.index_cast %555 : i32 to index
      %c0_242 = arith.constant 0 : index
      %558 = vector.load %arg4[%557, %c0_242] : memref<12289x128xf32, #tpu.memory_space<vmem>>, vector<1x128xf32>
      %559 = arith.index_cast %556 : i32 to index
      %c0_243 = arith.constant 0 : index
      %560 = vector.load %arg5[%559, %c0_243] : memref<4x128xf32, #tpu.memory_space<vmem>>, vector<1x128xf32>
      %561 = arith.mulf %558, %560 : vector<1x128xf32>
      %c14 = arith.constant 14 : index
      %c0_244 = arith.constant 0 : index
      %562 = vector.load %arg11[%c14, %c0_244] : memref<32x128xf32, #tpu.memory_space<vmem>>, vector<1x128xf32>
      %563 = vector.broadcast %551 : f32 to vector<1x128xf32>
      %564 = arith.mulf %563, %561 : vector<1x128xf32>
      %565 = arith.addf %562, %564 : vector<1x128xf32>
      %c14_245 = arith.constant 14 : index
      %c0_246 = arith.constant 0 : index
      %566 = vector.load %arg11[%c14_245, %c0_246] : memref<32x128xf32, #tpu.memory_space<vmem>>, vector<1x128xf32>
      tpu.vector_store %arg11[%c14_245, %c0_246], %565 {strides = array<i32>} : memref<32x128xf32, #tpu.memory_space<vmem>>, vector<1x128xf32>,
      %567 = arith.index_cast %15 : i32 to index
      %568 = arith.index_cast %arg13 : i32 to index
      %569 = memref.load %arg2[%567, %568] : memref<64x32xi32, #tpu.memory_space<smem>>
      %c2_i32_247 = arith.constant 2 : i32
      %570 = arith.shrsi %569, %c2_i32_247 : i32
      %c3_i32_248 = arith.constant 3 : i32
      %571 = arith.andi %569, %c3_i32_248 : i32
      %572 = arith.index_cast %570 : i32 to index
      %c0_249 = arith.constant 0 : index
      %573 = vector.load %arg4[%572, %c0_249] : memref<12289x128xf32, #tpu.memory_space<vmem>>, vector<1x128xf32>
      %574 = arith.index_cast %571 : i32 to index
      %c0_250 = arith.constant 0 : index
      %575 = vector.load %arg5[%574, %c0_250] : memref<4x128xf32, #tpu.memory_space<vmem>>, vector<1x128xf32>
      %576 = arith.mulf %573, %575 : vector<1x128xf32>
      %c14_251 = arith.constant 14 : index
      %c0_252 = arith.constant 0 : index
      %577 = vector.load %arg12[%c14_251, %c0_252] : memref<32x128xf32, #tpu.memory_space<vmem>>, vector<1x128xf32>
      %578 = vector.broadcast %551 : f32 to vector<1x128xf32>
      %579 = arith.mulf %578, %576 : vector<1x128xf32>
      %580 = arith.addf %577, %579 : vector<1x128xf32>
      %c14_253 = arith.constant 14 : index
      %c0_254 = arith.constant 0 : index
      %581 = vector.load %arg12[%c14_253, %c0_254] : memref<32x128xf32, #tpu.memory_space<vmem>>, vector<1x128xf32>
      tpu.vector_store %arg12[%c14_253, %c0_254], %580 {strides = array<i32>} : memref<32x128xf32, #tpu.memory_space<vmem>>, vector<1x128xf32>,
      %582 = arith.index_cast %16 : i32 to index
      %583 = arith.index_cast %arg13 : i32 to index
      %584 = memref.load %arg3[%582, %583] : memref<64x32xf32, #tpu.memory_space<smem>>
      %585 = arith.index_cast %16 : i32 to index
      %586 = arith.index_cast %arg13 : i32 to index
      %587 = memref.load %arg1[%585, %586] : memref<64x32xi32, #tpu.memory_space<smem>>
      %c2_i32_255 = arith.constant 2 : i32
      %588 = arith.shrsi %587, %c2_i32_255 : i32
      %c3_i32_256 = arith.constant 3 : i32
      %589 = arith.andi %587, %c3_i32_256 : i32
      %590 = arith.index_cast %588 : i32 to index
      %c0_257 = arith.constant 0 : index
      %591 = vector.load %arg4[%590, %c0_257] : memref<12289x128xf32, #tpu.memory_space<vmem>>, vector<1x128xf32>
      %592 = arith.index_cast %589 : i32 to index
      %c0_258 = arith.constant 0 : index
      %593 = vector.load %arg5[%592, %c0_258] : memref<4x128xf32, #tpu.memory_space<vmem>>, vector<1x128xf32>
      %594 = arith.mulf %591, %593 : vector<1x128xf32>
      %c15 = arith.constant 15 : index
      %c0_259 = arith.constant 0 : index
      %595 = vector.load %arg11[%c15, %c0_259] : memref<32x128xf32, #tpu.memory_space<vmem>>, vector<1x128xf32>
      %596 = vector.broadcast %584 : f32 to vector<1x128xf32>
      %597 = arith.mulf %596, %594 : vector<1x128xf32>
      %598 = arith.addf %595, %597 : vector<1x128xf32>
      %c15_260 = arith.constant 15 : index
      %c0_261 = arith.constant 0 : index
      %599 = vector.load %arg11[%c15_260, %c0_261] : memref<32x128xf32, #tpu.memory_space<vmem>>, vector<1x128xf32>
      tpu.vector_store %arg11[%c15_260, %c0_261], %598 {strides = array<i32>} : memref<32x128xf32, #tpu.memory_space<vmem>>, vector<1x128xf32>,
      %600 = arith.index_cast %16 : i32 to index
      %601 = arith.index_cast %arg13 : i32 to index
      %602 = memref.load %arg2[%600, %601] : memref<64x32xi32, #tpu.memory_space<smem>>
      %c2_i32_262 = arith.constant 2 : i32
      %603 = arith.shrsi %602, %c2_i32_262 : i32
      %c3_i32_263 = arith.constant 3 : i32
      %604 = arith.andi %602, %c3_i32_263 : i32
      %605 = arith.index_cast %603 : i32 to index
      %c0_264 = arith.constant 0 : index
      %606 = vector.load %arg4[%605, %c0_264] : memref<12289x128xf32, #tpu.memory_space<vmem>>, vector<1x128xf32>
      %607 = arith.index_cast %604 : i32 to index
      %c0_265 = arith.constant 0 : index
      %608 = vector.load %arg5[%607, %c0_265] : memref<4x128xf32, #tpu.memory_space<vmem>>, vector<1x128xf32>
      %609 = arith.mulf %606, %608 : vector<1x128xf32>
      %c15_266 = arith.constant 15 : index
      %c0_267 = arith.constant 0 : index
      %610 = vector.load %arg12[%c15_266, %c0_267] : memref<32x128xf32, #tpu.memory_space<vmem>>, vector<1x128xf32>
      %611 = vector.broadcast %584 : f32 to vector<1x128xf32>
      %612 = arith.mulf %611, %609 : vector<1x128xf32>
      %613 = arith.addf %610, %612 : vector<1x128xf32>
      %c15_268 = arith.constant 15 : index
      %c0_269 = arith.constant 0 : index
      %614 = vector.load %arg12[%c15_268, %c0_269] : memref<32x128xf32, #tpu.memory_space<vmem>>, vector<1x128xf32>
      tpu.vector_store %arg12[%c15_268, %c0_269], %613 {strides = array<i32>} : memref<32x128xf32, #tpu.memory_space<vmem>>, vector<1x128xf32>,
      %615 = arith.index_cast %17 : i32 to index
      %616 = arith.index_cast %arg13 : i32 to index
      %617 = memref.load %arg3[%615, %616] : memref<64x32xf32, #tpu.memory_space<smem>>
      %618 = arith.index_cast %17 : i32 to index
      %619 = arith.index_cast %arg13 : i32 to index
      %620 = memref.load %arg1[%618, %619] : memref<64x32xi32, #tpu.memory_space<smem>>
      %c2_i32_270 = arith.constant 2 : i32
      %621 = arith.shrsi %620, %c2_i32_270 : i32
      %c3_i32_271 = arith.constant 3 : i32
      %622 = arith.andi %620, %c3_i32_271 : i32
      %623 = arith.index_cast %621 : i32 to index
      %c0_272 = arith.constant 0 : index
      %624 = vector.load %arg4[%623, %c0_272] : memref<12289x128xf32, #tpu.memory_space<vmem>>, vector<1x128xf32>
      %625 = arith.index_cast %622 : i32 to index
      %c0_273 = arith.constant 0 : index
      %626 = vector.load %arg5[%625, %c0_273] : memref<4x128xf32, #tpu.memory_space<vmem>>, vector<1x128xf32>
      %627 = arith.mulf %624, %626 : vector<1x128xf32>
      %c16 = arith.constant 16 : index
      %c0_274 = arith.constant 0 : index
      %628 = vector.load %arg11[%c16, %c0_274] : memref<32x128xf32, #tpu.memory_space<vmem>>, vector<1x128xf32>
      %629 = vector.broadcast %617 : f32 to vector<1x128xf32>
      %630 = arith.mulf %629, %627 : vector<1x128xf32>
      %631 = arith.addf %628, %630 : vector<1x128xf32>
      %c16_275 = arith.constant 16 : index
      %c0_276 = arith.constant 0 : index
      %632 = vector.load %arg11[%c16_275, %c0_276] : memref<32x128xf32, #tpu.memory_space<vmem>>, vector<1x128xf32>
      tpu.vector_store %arg11[%c16_275, %c0_276], %631 {strides = array<i32>} : memref<32x128xf32, #tpu.memory_space<vmem>>, vector<1x128xf32>,
      %633 = arith.index_cast %17 : i32 to index
      %634 = arith.index_cast %arg13 : i32 to index
      %635 = memref.load %arg2[%633, %634] : memref<64x32xi32, #tpu.memory_space<smem>>
      %c2_i32_277 = arith.constant 2 : i32
      %636 = arith.shrsi %635, %c2_i32_277 : i32
      %c3_i32_278 = arith.constant 3 : i32
      %637 = arith.andi %635, %c3_i32_278 : i32
      %638 = arith.index_cast %636 : i32 to index
      %c0_279 = arith.constant 0 : index
      %639 = vector.load %arg4[%638, %c0_279] : memref<12289x128xf32, #tpu.memory_space<vmem>>, vector<1x128xf32>
      %640 = arith.index_cast %637 : i32 to index
      %c0_280 = arith.constant 0 : index
      %641 = vector.load %arg5[%640, %c0_280] : memref<4x128xf32, #tpu.memory_space<vmem>>, vector<1x128xf32>
      %642 = arith.mulf %639, %641 : vector<1x128xf32>
      %c16_281 = arith.constant 16 : index
      %c0_282 = arith.constant 0 : index
      %643 = vector.load %arg12[%c16_281, %c0_282] : memref<32x128xf32, #tpu.memory_space<vmem>>, vector<1x128xf32>
      %644 = vector.broadcast %617 : f32 to vector<1x128xf32>
      %645 = arith.mulf %644, %642 : vector<1x128xf32>
      %646 = arith.addf %643, %645 : vector<1x128xf32>
      %c16_283 = arith.constant 16 : index
      %c0_284 = arith.constant 0 : index
      %647 = vector.load %arg12[%c16_283, %c0_284] : memref<32x128xf32, #tpu.memory_space<vmem>>, vector<1x128xf32>
      tpu.vector_store %arg12[%c16_283, %c0_284], %646 {strides = array<i32>} : memref<32x128xf32, #tpu.memory_space<vmem>>, vector<1x128xf32>,
      %648 = arith.index_cast %18 : i32 to index
      %649 = arith.index_cast %arg13 : i32 to index
      %650 = memref.load %arg3[%648, %649] : memref<64x32xf32, #tpu.memory_space<smem>>
      %651 = arith.index_cast %18 : i32 to index
      %652 = arith.index_cast %arg13 : i32 to index
      %653 = memref.load %arg1[%651, %652] : memref<64x32xi32, #tpu.memory_space<smem>>
      %c2_i32_285 = arith.constant 2 : i32
      %654 = arith.shrsi %653, %c2_i32_285 : i32
      %c3_i32_286 = arith.constant 3 : i32
      %655 = arith.andi %653, %c3_i32_286 : i32
      %656 = arith.index_cast %654 : i32 to index
      %c0_287 = arith.constant 0 : index
      %657 = vector.load %arg4[%656, %c0_287] : memref<12289x128xf32, #tpu.memory_space<vmem>>, vector<1x128xf32>
      %658 = arith.index_cast %655 : i32 to index
      %c0_288 = arith.constant 0 : index
      %659 = vector.load %arg5[%658, %c0_288] : memref<4x128xf32, #tpu.memory_space<vmem>>, vector<1x128xf32>
      %660 = arith.mulf %657, %659 : vector<1x128xf32>
      %c17 = arith.constant 17 : index
      %c0_289 = arith.constant 0 : index
      %661 = vector.load %arg11[%c17, %c0_289] : memref<32x128xf32, #tpu.memory_space<vmem>>, vector<1x128xf32>
      %662 = vector.broadcast %650 : f32 to vector<1x128xf32>
      %663 = arith.mulf %662, %660 : vector<1x128xf32>
      %664 = arith.addf %661, %663 : vector<1x128xf32>
      %c17_290 = arith.constant 17 : index
      %c0_291 = arith.constant 0 : index
      %665 = vector.load %arg11[%c17_290, %c0_291] : memref<32x128xf32, #tpu.memory_space<vmem>>, vector<1x128xf32>
      tpu.vector_store %arg11[%c17_290, %c0_291], %664 {strides = array<i32>} : memref<32x128xf32, #tpu.memory_space<vmem>>, vector<1x128xf32>,
      %666 = arith.index_cast %18 : i32 to index
      %667 = arith.index_cast %arg13 : i32 to index
      %668 = memref.load %arg2[%666, %667] : memref<64x32xi32, #tpu.memory_space<smem>>
      %c2_i32_292 = arith.constant 2 : i32
      %669 = arith.shrsi %668, %c2_i32_292 : i32
      %c3_i32_293 = arith.constant 3 : i32
      %670 = arith.andi %668, %c3_i32_293 : i32
      %671 = arith.index_cast %669 : i32 to index
      %c0_294 = arith.constant 0 : index
      %672 = vector.load %arg4[%671, %c0_294] : memref<12289x128xf32, #tpu.memory_space<vmem>>, vector<1x128xf32>
      %673 = arith.index_cast %670 : i32 to index
      %c0_295 = arith.constant 0 : index
      %674 = vector.load %arg5[%673, %c0_295] : memref<4x128xf32, #tpu.memory_space<vmem>>, vector<1x128xf32>
      %675 = arith.mulf %672, %674 : vector<1x128xf32>
      %c17_296 = arith.constant 17 : index
      %c0_297 = arith.constant 0 : index
      %676 = vector.load %arg12[%c17_296, %c0_297] : memref<32x128xf32, #tpu.memory_space<vmem>>, vector<1x128xf32>
      %677 = vector.broadcast %650 : f32 to vector<1x128xf32>
      %678 = arith.mulf %677, %675 : vector<1x128xf32>
      %679 = arith.addf %676, %678 : vector<1x128xf32>
      %c17_298 = arith.constant 17 : index
      %c0_299 = arith.constant 0 : index
      %680 = vector.load %arg12[%c17_298, %c0_299] : memref<32x128xf32, #tpu.memory_space<vmem>>, vector<1x128xf32>
      tpu.vector_store %arg12[%c17_298, %c0_299], %679 {strides = array<i32>} : memref<32x128xf32, #tpu.memory_space<vmem>>, vector<1x128xf32>,
      %681 = arith.index_cast %19 : i32 to index
      %682 = arith.index_cast %arg13 : i32 to index
      %683 = memref.load %arg3[%681, %682] : memref<64x32xf32, #tpu.memory_space<smem>>
      %684 = arith.index_cast %19 : i32 to index
      %685 = arith.index_cast %arg13 : i32 to index
      %686 = memref.load %arg1[%684, %685] : memref<64x32xi32, #tpu.memory_space<smem>>
      %c2_i32_300 = arith.constant 2 : i32
      %687 = arith.shrsi %686, %c2_i32_300 : i32
      %c3_i32_301 = arith.constant 3 : i32
      %688 = arith.andi %686, %c3_i32_301 : i32
      %689 = arith.index_cast %687 : i32 to index
      %c0_302 = arith.constant 0 : index
      %690 = vector.load %arg4[%689, %c0_302] : memref<12289x128xf32, #tpu.memory_space<vmem>>, vector<1x128xf32>
      %691 = arith.index_cast %688 : i32 to index
      %c0_303 = arith.constant 0 : index
      %692 = vector.load %arg5[%691, %c0_303] : memref<4x128xf32, #tpu.memory_space<vmem>>, vector<1x128xf32>
      %693 = arith.mulf %690, %692 : vector<1x128xf32>
      %c18 = arith.constant 18 : index
      %c0_304 = arith.constant 0 : index
      %694 = vector.load %arg11[%c18, %c0_304] : memref<32x128xf32, #tpu.memory_space<vmem>>, vector<1x128xf32>
      %695 = vector.broadcast %683 : f32 to vector<1x128xf32>
      %696 = arith.mulf %695, %693 : vector<1x128xf32>
      %697 = arith.addf %694, %696 : vector<1x128xf32>
      %c18_305 = arith.constant 18 : index
      %c0_306 = arith.constant 0 : index
      %698 = vector.load %arg11[%c18_305, %c0_306] : memref<32x128xf32, #tpu.memory_space<vmem>>, vector<1x128xf32>
      tpu.vector_store %arg11[%c18_305, %c0_306], %697 {strides = array<i32>} : memref<32x128xf32, #tpu.memory_space<vmem>>, vector<1x128xf32>,
      %699 = arith.index_cast %19 : i32 to index
      %700 = arith.index_cast %arg13 : i32 to index
      %701 = memref.load %arg2[%699, %700] : memref<64x32xi32, #tpu.memory_space<smem>>
      %c2_i32_307 = arith.constant 2 : i32
      %702 = arith.shrsi %701, %c2_i32_307 : i32
      %c3_i32_308 = arith.constant 3 : i32
      %703 = arith.andi %701, %c3_i32_308 : i32
      %704 = arith.index_cast %702 : i32 to index
      %c0_309 = arith.constant 0 : index
      %705 = vector.load %arg4[%704, %c0_309] : memref<12289x128xf32, #tpu.memory_space<vmem>>, vector<1x128xf32>
      %706 = arith.index_cast %703 : i32 to index
      %c0_310 = arith.constant 0 : index
      %707 = vector.load %arg5[%706, %c0_310] : memref<4x128xf32, #tpu.memory_space<vmem>>, vector<1x128xf32>
      %708 = arith.mulf %705, %707 : vector<1x128xf32>
      %c18_311 = arith.constant 18 : index
      %c0_312 = arith.constant 0 : index
      %709 = vector.load %arg12[%c18_311, %c0_312] : memref<32x128xf32, #tpu.memory_space<vmem>>, vector<1x128xf32>
      %710 = vector.broadcast %683 : f32 to vector<1x128xf32>
      %711 = arith.mulf %710, %708 : vector<1x128xf32>
      %712 = arith.addf %709, %711 : vector<1x128xf32>
      %c18_313 = arith.constant 18 : index
      %c0_314 = arith.constant 0 : index
      %713 = vector.load %arg12[%c18_313, %c0_314] : memref<32x128xf32, #tpu.memory_space<vmem>>, vector<1x128xf32>
      tpu.vector_store %arg12[%c18_313, %c0_314], %712 {strides = array<i32>} : memref<32x128xf32, #tpu.memory_space<vmem>>, vector<1x128xf32>,
      %714 = arith.index_cast %20 : i32 to index
      %715 = arith.index_cast %arg13 : i32 to index
      %716 = memref.load %arg3[%714, %715] : memref<64x32xf32, #tpu.memory_space<smem>>
      %717 = arith.index_cast %20 : i32 to index
      %718 = arith.index_cast %arg13 : i32 to index
      %719 = memref.load %arg1[%717, %718] : memref<64x32xi32, #tpu.memory_space<smem>>
      %c2_i32_315 = arith.constant 2 : i32
      %720 = arith.shrsi %719, %c2_i32_315 : i32
      %c3_i32_316 = arith.constant 3 : i32
      %721 = arith.andi %719, %c3_i32_316 : i32
      %722 = arith.index_cast %720 : i32 to index
      %c0_317 = arith.constant 0 : index
      %723 = vector.load %arg4[%722, %c0_317] : memref<12289x128xf32, #tpu.memory_space<vmem>>, vector<1x128xf32>
      %724 = arith.index_cast %721 : i32 to index
      %c0_318 = arith.constant 0 : index
      %725 = vector.load %arg5[%724, %c0_318] : memref<4x128xf32, #tpu.memory_space<vmem>>, vector<1x128xf32>
      %726 = arith.mulf %723, %725 : vector<1x128xf32>
      %c19 = arith.constant 19 : index
      %c0_319 = arith.constant 0 : index
      %727 = vector.load %arg11[%c19, %c0_319] : memref<32x128xf32, #tpu.memory_space<vmem>>, vector<1x128xf32>
      %728 = vector.broadcast %716 : f32 to vector<1x128xf32>
      %729 = arith.mulf %728, %726 : vector<1x128xf32>
      %730 = arith.addf %727, %729 : vector<1x128xf32>
      %c19_320 = arith.constant 19 : index
      %c0_321 = arith.constant 0 : index
      %731 = vector.load %arg11[%c19_320, %c0_321] : memref<32x128xf32, #tpu.memory_space<vmem>>, vector<1x128xf32>
      tpu.vector_store %arg11[%c19_320, %c0_321], %730 {strides = array<i32>} : memref<32x128xf32, #tpu.memory_space<vmem>>, vector<1x128xf32>,
      %732 = arith.index_cast %20 : i32 to index
      %733 = arith.index_cast %arg13 : i32 to index
      %734 = memref.load %arg2[%732, %733] : memref<64x32xi32, #tpu.memory_space<smem>>
      %c2_i32_322 = arith.constant 2 : i32
      %735 = arith.shrsi %734, %c2_i32_322 : i32
      %c3_i32_323 = arith.constant 3 : i32
      %736 = arith.andi %734, %c3_i32_323 : i32
      %737 = arith.index_cast %735 : i32 to index
      %c0_324 = arith.constant 0 : index
      %738 = vector.load %arg4[%737, %c0_324] : memref<12289x128xf32, #tpu.memory_space<vmem>>, vector<1x128xf32>
      %739 = arith.index_cast %736 : i32 to index
      %c0_325 = arith.constant 0 : index
      %740 = vector.load %arg5[%739, %c0_325] : memref<4x128xf32, #tpu.memory_space<vmem>>, vector<1x128xf32>
      %741 = arith.mulf %738, %740 : vector<1x128xf32>
      %c19_326 = arith.constant 19 : index
      %c0_327 = arith.constant 0 : index
      %742 = vector.load %arg12[%c19_326, %c0_327] : memref<32x128xf32, #tpu.memory_space<vmem>>, vector<1x128xf32>
      %743 = vector.broadcast %716 : f32 to vector<1x128xf32>
      %744 = arith.mulf %743, %741 : vector<1x128xf32>
      %745 = arith.addf %742, %744 : vector<1x128xf32>
      %c19_328 = arith.constant 19 : index
      %c0_329 = arith.constant 0 : index
      %746 = vector.load %arg12[%c19_328, %c0_329] : memref<32x128xf32, #tpu.memory_space<vmem>>, vector<1x128xf32>
      tpu.vector_store %arg12[%c19_328, %c0_329], %745 {strides = array<i32>} : memref<32x128xf32, #tpu.memory_space<vmem>>, vector<1x128xf32>,
      %747 = arith.index_cast %21 : i32 to index
      %748 = arith.index_cast %arg13 : i32 to index
      %749 = memref.load %arg3[%747, %748] : memref<64x32xf32, #tpu.memory_space<smem>>
      %750 = arith.index_cast %21 : i32 to index
      %751 = arith.index_cast %arg13 : i32 to index
      %752 = memref.load %arg1[%750, %751] : memref<64x32xi32, #tpu.memory_space<smem>>
      %c2_i32_330 = arith.constant 2 : i32
      %753 = arith.shrsi %752, %c2_i32_330 : i32
      %c3_i32_331 = arith.constant 3 : i32
      %754 = arith.andi %752, %c3_i32_331 : i32
      %755 = arith.index_cast %753 : i32 to index
      %c0_332 = arith.constant 0 : index
      %756 = vector.load %arg4[%755, %c0_332] : memref<12289x128xf32, #tpu.memory_space<vmem>>, vector<1x128xf32>
      %757 = arith.index_cast %754 : i32 to index
      %c0_333 = arith.constant 0 : index
      %758 = vector.load %arg5[%757, %c0_333] : memref<4x128xf32, #tpu.memory_space<vmem>>, vector<1x128xf32>
      %759 = arith.mulf %756, %758 : vector<1x128xf32>
      %c20 = arith.constant 20 : index
      %c0_334 = arith.constant 0 : index
      %760 = vector.load %arg11[%c20, %c0_334] : memref<32x128xf32, #tpu.memory_space<vmem>>, vector<1x128xf32>
      %761 = vector.broadcast %749 : f32 to vector<1x128xf32>
      %762 = arith.mulf %761, %759 : vector<1x128xf32>
      %763 = arith.addf %760, %762 : vector<1x128xf32>
      %c20_335 = arith.constant 20 : index
      %c0_336 = arith.constant 0 : index
      %764 = vector.load %arg11[%c20_335, %c0_336] : memref<32x128xf32, #tpu.memory_space<vmem>>, vector<1x128xf32>
      tpu.vector_store %arg11[%c20_335, %c0_336], %763 {strides = array<i32>} : memref<32x128xf32, #tpu.memory_space<vmem>>, vector<1x128xf32>,
      %765 = arith.index_cast %21 : i32 to index
      %766 = arith.index_cast %arg13 : i32 to index
      %767 = memref.load %arg2[%765, %766] : memref<64x32xi32, #tpu.memory_space<smem>>
      %c2_i32_337 = arith.constant 2 : i32
      %768 = arith.shrsi %767, %c2_i32_337 : i32
      %c3_i32_338 = arith.constant 3 : i32
      %769 = arith.andi %767, %c3_i32_338 : i32
      %770 = arith.index_cast %768 : i32 to index
      %c0_339 = arith.constant 0 : index
      %771 = vector.load %arg4[%770, %c0_339] : memref<12289x128xf32, #tpu.memory_space<vmem>>, vector<1x128xf32>
      %772 = arith.index_cast %769 : i32 to index
      %c0_340 = arith.constant 0 : index
      %773 = vector.load %arg5[%772, %c0_340] : memref<4x128xf32, #tpu.memory_space<vmem>>, vector<1x128xf32>
      %774 = arith.mulf %771, %773 : vector<1x128xf32>
      %c20_341 = arith.constant 20 : index
      %c0_342 = arith.constant 0 : index
      %775 = vector.load %arg12[%c20_341, %c0_342] : memref<32x128xf32, #tpu.memory_space<vmem>>, vector<1x128xf32>
      %776 = vector.broadcast %749 : f32 to vector<1x128xf32>
      %777 = arith.mulf %776, %774 : vector<1x128xf32>
      %778 = arith.addf %775, %777 : vector<1x128xf32>
      %c20_343 = arith.constant 20 : index
      %c0_344 = arith.constant 0 : index
      %779 = vector.load %arg12[%c20_343, %c0_344] : memref<32x128xf32, #tpu.memory_space<vmem>>, vector<1x128xf32>
      tpu.vector_store %arg12[%c20_343, %c0_344], %778 {strides = array<i32>} : memref<32x128xf32, #tpu.memory_space<vmem>>, vector<1x128xf32>,
      %780 = arith.index_cast %22 : i32 to index
      %781 = arith.index_cast %arg13 : i32 to index
      %782 = memref.load %arg3[%780, %781] : memref<64x32xf32, #tpu.memory_space<smem>>
      %783 = arith.index_cast %22 : i32 to index
      %784 = arith.index_cast %arg13 : i32 to index
      %785 = memref.load %arg1[%783, %784] : memref<64x32xi32, #tpu.memory_space<smem>>
      %c2_i32_345 = arith.constant 2 : i32
      %786 = arith.shrsi %785, %c2_i32_345 : i32
      %c3_i32_346 = arith.constant 3 : i32
      %787 = arith.andi %785, %c3_i32_346 : i32
      %788 = arith.index_cast %786 : i32 to index
      %c0_347 = arith.constant 0 : index
      %789 = vector.load %arg4[%788, %c0_347] : memref<12289x128xf32, #tpu.memory_space<vmem>>, vector<1x128xf32>
      %790 = arith.index_cast %787 : i32 to index
      %c0_348 = arith.constant 0 : index
      %791 = vector.load %arg5[%790, %c0_348] : memref<4x128xf32, #tpu.memory_space<vmem>>, vector<1x128xf32>
      %792 = arith.mulf %789, %791 : vector<1x128xf32>
      %c21 = arith.constant 21 : index
      %c0_349 = arith.constant 0 : index
      %793 = vector.load %arg11[%c21, %c0_349] : memref<32x128xf32, #tpu.memory_space<vmem>>, vector<1x128xf32>
      %794 = vector.broadcast %782 : f32 to vector<1x128xf32>
      %795 = arith.mulf %794, %792 : vector<1x128xf32>
      %796 = arith.addf %793, %795 : vector<1x128xf32>
      %c21_350 = arith.constant 21 : index
      %c0_351 = arith.constant 0 : index
      %797 = vector.load %arg11[%c21_350, %c0_351] : memref<32x128xf32, #tpu.memory_space<vmem>>, vector<1x128xf32>
      tpu.vector_store %arg11[%c21_350, %c0_351], %796 {strides = array<i32>} : memref<32x128xf32, #tpu.memory_space<vmem>>, vector<1x128xf32>,
      %798 = arith.index_cast %22 : i32 to index
      %799 = arith.index_cast %arg13 : i32 to index
      %800 = memref.load %arg2[%798, %799] : memref<64x32xi32, #tpu.memory_space<smem>>
      %c2_i32_352 = arith.constant 2 : i32
      %801 = arith.shrsi %800, %c2_i32_352 : i32
      %c3_i32_353 = arith.constant 3 : i32
      %802 = arith.andi %800, %c3_i32_353 : i32
      %803 = arith.index_cast %801 : i32 to index
      %c0_354 = arith.constant 0 : index
      %804 = vector.load %arg4[%803, %c0_354] : memref<12289x128xf32, #tpu.memory_space<vmem>>, vector<1x128xf32>
      %805 = arith.index_cast %802 : i32 to index
      %c0_355 = arith.constant 0 : index
      %806 = vector.load %arg5[%805, %c0_355] : memref<4x128xf32, #tpu.memory_space<vmem>>, vector<1x128xf32>
      %807 = arith.mulf %804, %806 : vector<1x128xf32>
      %c21_356 = arith.constant 21 : index
      %c0_357 = arith.constant 0 : index
      %808 = vector.load %arg12[%c21_356, %c0_357] : memref<32x128xf32, #tpu.memory_space<vmem>>, vector<1x128xf32>
      %809 = vector.broadcast %782 : f32 to vector<1x128xf32>
      %810 = arith.mulf %809, %807 : vector<1x128xf32>
      %811 = arith.addf %808, %810 : vector<1x128xf32>
      %c21_358 = arith.constant 21 : index
      %c0_359 = arith.constant 0 : index
      %812 = vector.load %arg12[%c21_358, %c0_359] : memref<32x128xf32, #tpu.memory_space<vmem>>, vector<1x128xf32>
      tpu.vector_store %arg12[%c21_358, %c0_359], %811 {strides = array<i32>} : memref<32x128xf32, #tpu.memory_space<vmem>>, vector<1x128xf32>,
      %813 = arith.index_cast %23 : i32 to index
      %814 = arith.index_cast %arg13 : i32 to index
      %815 = memref.load %arg3[%813, %814] : memref<64x32xf32, #tpu.memory_space<smem>>
      %816 = arith.index_cast %23 : i32 to index
      %817 = arith.index_cast %arg13 : i32 to index
      %818 = memref.load %arg1[%816, %817] : memref<64x32xi32, #tpu.memory_space<smem>>
      %c2_i32_360 = arith.constant 2 : i32
      %819 = arith.shrsi %818, %c2_i32_360 : i32
      %c3_i32_361 = arith.constant 3 : i32
      %820 = arith.andi %818, %c3_i32_361 : i32
      %821 = arith.index_cast %819 : i32 to index
      %c0_362 = arith.constant 0 : index
      %822 = vector.load %arg4[%821, %c0_362] : memref<12289x128xf32, #tpu.memory_space<vmem>>, vector<1x128xf32>
      %823 = arith.index_cast %820 : i32 to index
      %c0_363 = arith.constant 0 : index
      %824 = vector.load %arg5[%823, %c0_363] : memref<4x128xf32, #tpu.memory_space<vmem>>, vector<1x128xf32>
      %825 = arith.mulf %822, %824 : vector<1x128xf32>
      %c22 = arith.constant 22 : index
      %c0_364 = arith.constant 0 : index
      %826 = vector.load %arg11[%c22, %c0_364] : memref<32x128xf32, #tpu.memory_space<vmem>>, vector<1x128xf32>
      %827 = vector.broadcast %815 : f32 to vector<1x128xf32>
      %828 = arith.mulf %827, %825 : vector<1x128xf32>
      %829 = arith.addf %826, %828 : vector<1x128xf32>
      %c22_365 = arith.constant 22 : index
      %c0_366 = arith.constant 0 : index
      %830 = vector.load %arg11[%c22_365, %c0_366] : memref<32x128xf32, #tpu.memory_space<vmem>>, vector<1x128xf32>
      tpu.vector_store %arg11[%c22_365, %c0_366], %829 {strides = array<i32>} : memref<32x128xf32, #tpu.memory_space<vmem>>, vector<1x128xf32>,
      %831 = arith.index_cast %23 : i32 to index
      %832 = arith.index_cast %arg13 : i32 to index
      %833 = memref.load %arg2[%831, %832] : memref<64x32xi32, #tpu.memory_space<smem>>
      %c2_i32_367 = arith.constant 2 : i32
      %834 = arith.shrsi %833, %c2_i32_367 : i32
      %c3_i32_368 = arith.constant 3 : i32
      %835 = arith.andi %833, %c3_i32_368 : i32
      %836 = arith.index_cast %834 : i32 to index
      %c0_369 = arith.constant 0 : index
      %837 = vector.load %arg4[%836, %c0_369] : memref<12289x128xf32, #tpu.memory_space<vmem>>, vector<1x128xf32>
      %838 = arith.index_cast %835 : i32 to index
      %c0_370 = arith.constant 0 : index
      %839 = vector.load %arg5[%838, %c0_370] : memref<4x128xf32, #tpu.memory_space<vmem>>, vector<1x128xf32>
      %840 = arith.mulf %837, %839 : vector<1x128xf32>
      %c22_371 = arith.constant 22 : index
      %c0_372 = arith.constant 0 : index
      %841 = vector.load %arg12[%c22_371, %c0_372] : memref<32x128xf32, #tpu.memory_space<vmem>>, vector<1x128xf32>
      %842 = vector.broadcast %815 : f32 to vector<1x128xf32>
      %843 = arith.mulf %842, %840 : vector<1x128xf32>
      %844 = arith.addf %841, %843 : vector<1x128xf32>
      %c22_373 = arith.constant 22 : index
      %c0_374 = arith.constant 0 : index
      %845 = vector.load %arg12[%c22_373, %c0_374] : memref<32x128xf32, #tpu.memory_space<vmem>>, vector<1x128xf32>
      tpu.vector_store %arg12[%c22_373, %c0_374], %844 {strides = array<i32>} : memref<32x128xf32, #tpu.memory_space<vmem>>, vector<1x128xf32>,
      %846 = arith.index_cast %24 : i32 to index
      %847 = arith.index_cast %arg13 : i32 to index
      %848 = memref.load %arg3[%846, %847] : memref<64x32xf32, #tpu.memory_space<smem>>
      %849 = arith.index_cast %24 : i32 to index
      %850 = arith.index_cast %arg13 : i32 to index
      %851 = memref.load %arg1[%849, %850] : memref<64x32xi32, #tpu.memory_space<smem>>
      %c2_i32_375 = arith.constant 2 : i32
      %852 = arith.shrsi %851, %c2_i32_375 : i32
      %c3_i32_376 = arith.constant 3 : i32
      %853 = arith.andi %851, %c3_i32_376 : i32
      %854 = arith.index_cast %852 : i32 to index
      %c0_377 = arith.constant 0 : index
      %855 = vector.load %arg4[%854, %c0_377] : memref<12289x128xf32, #tpu.memory_space<vmem>>, vector<1x128xf32>
      %856 = arith.index_cast %853 : i32 to index
      %c0_378 = arith.constant 0 : index
      %857 = vector.load %arg5[%856, %c0_378] : memref<4x128xf32, #tpu.memory_space<vmem>>, vector<1x128xf32>
      %858 = arith.mulf %855, %857 : vector<1x128xf32>
      %c23 = arith.constant 23 : index
      %c0_379 = arith.constant 0 : index
      %859 = vector.load %arg11[%c23, %c0_379] : memref<32x128xf32, #tpu.memory_space<vmem>>, vector<1x128xf32>
      %860 = vector.broadcast %848 : f32 to vector<1x128xf32>
      %861 = arith.mulf %860, %858 : vector<1x128xf32>
      %862 = arith.addf %859, %861 : vector<1x128xf32>
      %c23_380 = arith.constant 23 : index
      %c0_381 = arith.constant 0 : index
      %863 = vector.load %arg11[%c23_380, %c0_381] : memref<32x128xf32, #tpu.memory_space<vmem>>, vector<1x128xf32>
      tpu.vector_store %arg11[%c23_380, %c0_381], %862 {strides = array<i32>} : memref<32x128xf32, #tpu.memory_space<vmem>>, vector<1x128xf32>,
      %864 = arith.index_cast %24 : i32 to index
      %865 = arith.index_cast %arg13 : i32 to index
      %866 = memref.load %arg2[%864, %865] : memref<64x32xi32, #tpu.memory_space<smem>>
      %c2_i32_382 = arith.constant 2 : i32
      %867 = arith.shrsi %866, %c2_i32_382 : i32
      %c3_i32_383 = arith.constant 3 : i32
      %868 = arith.andi %866, %c3_i32_383 : i32
      %869 = arith.index_cast %867 : i32 to index
      %c0_384 = arith.constant 0 : index
      %870 = vector.load %arg4[%869, %c0_384] : memref<12289x128xf32, #tpu.memory_space<vmem>>, vector<1x128xf32>
      %871 = arith.index_cast %868 : i32 to index
      %c0_385 = arith.constant 0 : index
      %872 = vector.load %arg5[%871, %c0_385] : memref<4x128xf32, #tpu.memory_space<vmem>>, vector<1x128xf32>
      %873 = arith.mulf %870, %872 : vector<1x128xf32>
      %c23_386 = arith.constant 23 : index
      %c0_387 = arith.constant 0 : index
      %874 = vector.load %arg12[%c23_386, %c0_387] : memref<32x128xf32, #tpu.memory_space<vmem>>, vector<1x128xf32>
      %875 = vector.broadcast %848 : f32 to vector<1x128xf32>
      %876 = arith.mulf %875, %873 : vector<1x128xf32>
      %877 = arith.addf %874, %876 : vector<1x128xf32>
      %c23_388 = arith.constant 23 : index
      %c0_389 = arith.constant 0 : index
      %878 = vector.load %arg12[%c23_388, %c0_389] : memref<32x128xf32, #tpu.memory_space<vmem>>, vector<1x128xf32>
      tpu.vector_store %arg12[%c23_388, %c0_389], %877 {strides = array<i32>} : memref<32x128xf32, #tpu.memory_space<vmem>>, vector<1x128xf32>,
      %879 = arith.index_cast %25 : i32 to index
      %880 = arith.index_cast %arg13 : i32 to index
      %881 = memref.load %arg3[%879, %880] : memref<64x32xf32, #tpu.memory_space<smem>>
      %882 = arith.index_cast %25 : i32 to index
      %883 = arith.index_cast %arg13 : i32 to index
      %884 = memref.load %arg1[%882, %883] : memref<64x32xi32, #tpu.memory_space<smem>>
      %c2_i32_390 = arith.constant 2 : i32
      %885 = arith.shrsi %884, %c2_i32_390 : i32
      %c3_i32_391 = arith.constant 3 : i32
      %886 = arith.andi %884, %c3_i32_391 : i32
      %887 = arith.index_cast %885 : i32 to index
      %c0_392 = arith.constant 0 : index
      %888 = vector.load %arg4[%887, %c0_392] : memref<12289x128xf32, #tpu.memory_space<vmem>>, vector<1x128xf32>
      %889 = arith.index_cast %886 : i32 to index
      %c0_393 = arith.constant 0 : index
      %890 = vector.load %arg5[%889, %c0_393] : memref<4x128xf32, #tpu.memory_space<vmem>>, vector<1x128xf32>
      %891 = arith.mulf %888, %890 : vector<1x128xf32>
      %c24 = arith.constant 24 : index
      %c0_394 = arith.constant 0 : index
      %892 = vector.load %arg11[%c24, %c0_394] : memref<32x128xf32, #tpu.memory_space<vmem>>, vector<1x128xf32>
      %893 = vector.broadcast %881 : f32 to vector<1x128xf32>
      %894 = arith.mulf %893, %891 : vector<1x128xf32>
      %895 = arith.addf %892, %894 : vector<1x128xf32>
      %c24_395 = arith.constant 24 : index
      %c0_396 = arith.constant 0 : index
      %896 = vector.load %arg11[%c24_395, %c0_396] : memref<32x128xf32, #tpu.memory_space<vmem>>, vector<1x128xf32>
      tpu.vector_store %arg11[%c24_395, %c0_396], %895 {strides = array<i32>} : memref<32x128xf32, #tpu.memory_space<vmem>>, vector<1x128xf32>,
      %897 = arith.index_cast %25 : i32 to index
      %898 = arith.index_cast %arg13 : i32 to index
      %899 = memref.load %arg2[%897, %898] : memref<64x32xi32, #tpu.memory_space<smem>>
      %c2_i32_397 = arith.constant 2 : i32
      %900 = arith.shrsi %899, %c2_i32_397 : i32
      %c3_i32_398 = arith.constant 3 : i32
      %901 = arith.andi %899, %c3_i32_398 : i32
      %902 = arith.index_cast %900 : i32 to index
      %c0_399 = arith.constant 0 : index
      %903 = vector.load %arg4[%902, %c0_399] : memref<12289x128xf32, #tpu.memory_space<vmem>>, vector<1x128xf32>
      %904 = arith.index_cast %901 : i32 to index
      %c0_400 = arith.constant 0 : index
      %905 = vector.load %arg5[%904, %c0_400] : memref<4x128xf32, #tpu.memory_space<vmem>>, vector<1x128xf32>
      %906 = arith.mulf %903, %905 : vector<1x128xf32>
      %c24_401 = arith.constant 24 : index
      %c0_402 = arith.constant 0 : index
      %907 = vector.load %arg12[%c24_401, %c0_402] : memref<32x128xf32, #tpu.memory_space<vmem>>, vector<1x128xf32>
      %908 = vector.broadcast %881 : f32 to vector<1x128xf32>
      %909 = arith.mulf %908, %906 : vector<1x128xf32>
      %910 = arith.addf %907, %909 : vector<1x128xf32>
      %c24_403 = arith.constant 24 : index
      %c0_404 = arith.constant 0 : index
      %911 = vector.load %arg12[%c24_403, %c0_404] : memref<32x128xf32, #tpu.memory_space<vmem>>, vector<1x128xf32>
      tpu.vector_store %arg12[%c24_403, %c0_404], %910 {strides = array<i32>} : memref<32x128xf32, #tpu.memory_space<vmem>>, vector<1x128xf32>,
      %912 = arith.index_cast %26 : i32 to index
      %913 = arith.index_cast %arg13 : i32 to index
      %914 = memref.load %arg3[%912, %913] : memref<64x32xf32, #tpu.memory_space<smem>>
      %915 = arith.index_cast %26 : i32 to index
      %916 = arith.index_cast %arg13 : i32 to index
      %917 = memref.load %arg1[%915, %916] : memref<64x32xi32, #tpu.memory_space<smem>>
      %c2_i32_405 = arith.constant 2 : i32
      %918 = arith.shrsi %917, %c2_i32_405 : i32
      %c3_i32_406 = arith.constant 3 : i32
      %919 = arith.andi %917, %c3_i32_406 : i32
      %920 = arith.index_cast %918 : i32 to index
      %c0_407 = arith.constant 0 : index
      %921 = vector.load %arg4[%920, %c0_407] : memref<12289x128xf32, #tpu.memory_space<vmem>>, vector<1x128xf32>
      %922 = arith.index_cast %919 : i32 to index
      %c0_408 = arith.constant 0 : index
      %923 = vector.load %arg5[%922, %c0_408] : memref<4x128xf32, #tpu.memory_space<vmem>>, vector<1x128xf32>
      %924 = arith.mulf %921, %923 : vector<1x128xf32>
      %c25 = arith.constant 25 : index
      %c0_409 = arith.constant 0 : index
      %925 = vector.load %arg11[%c25, %c0_409] : memref<32x128xf32, #tpu.memory_space<vmem>>, vector<1x128xf32>
      %926 = vector.broadcast %914 : f32 to vector<1x128xf32>
      %927 = arith.mulf %926, %924 : vector<1x128xf32>
      %928 = arith.addf %925, %927 : vector<1x128xf32>
      %c25_410 = arith.constant 25 : index
      %c0_411 = arith.constant 0 : index
      %929 = vector.load %arg11[%c25_410, %c0_411] : memref<32x128xf32, #tpu.memory_space<vmem>>, vector<1x128xf32>
      tpu.vector_store %arg11[%c25_410, %c0_411], %928 {strides = array<i32>} : memref<32x128xf32, #tpu.memory_space<vmem>>, vector<1x128xf32>,
      %930 = arith.index_cast %26 : i32 to index
      %931 = arith.index_cast %arg13 : i32 to index
      %932 = memref.load %arg2[%930, %931] : memref<64x32xi32, #tpu.memory_space<smem>>
      %c2_i32_412 = arith.constant 2 : i32
      %933 = arith.shrsi %932, %c2_i32_412 : i32
      %c3_i32_413 = arith.constant 3 : i32
      %934 = arith.andi %932, %c3_i32_413 : i32
      %935 = arith.index_cast %933 : i32 to index
      %c0_414 = arith.constant 0 : index
      %936 = vector.load %arg4[%935, %c0_414] : memref<12289x128xf32, #tpu.memory_space<vmem>>, vector<1x128xf32>
      %937 = arith.index_cast %934 : i32 to index
      %c0_415 = arith.constant 0 : index
      %938 = vector.load %arg5[%937, %c0_415] : memref<4x128xf32, #tpu.memory_space<vmem>>, vector<1x128xf32>
      %939 = arith.mulf %936, %938 : vector<1x128xf32>
      %c25_416 = arith.constant 25 : index
      %c0_417 = arith.constant 0 : index
      %940 = vector.load %arg12[%c25_416, %c0_417] : memref<32x128xf32, #tpu.memory_space<vmem>>, vector<1x128xf32>
      %941 = vector.broadcast %914 : f32 to vector<1x128xf32>
      %942 = arith.mulf %941, %939 : vector<1x128xf32>
      %943 = arith.addf %940, %942 : vector<1x128xf32>
      %c25_418 = arith.constant 25 : index
      %c0_419 = arith.constant 0 : index
      %944 = vector.load %arg12[%c25_418, %c0_419] : memref<32x128xf32, #tpu.memory_space<vmem>>, vector<1x128xf32>
      tpu.vector_store %arg12[%c25_418, %c0_419], %943 {strides = array<i32>} : memref<32x128xf32, #tpu.memory_space<vmem>>, vector<1x128xf32>,
      %945 = arith.index_cast %27 : i32 to index
      %946 = arith.index_cast %arg13 : i32 to index
      %947 = memref.load %arg3[%945, %946] : memref<64x32xf32, #tpu.memory_space<smem>>
      %948 = arith.index_cast %27 : i32 to index
      %949 = arith.index_cast %arg13 : i32 to index
      %950 = memref.load %arg1[%948, %949] : memref<64x32xi32, #tpu.memory_space<smem>>
      %c2_i32_420 = arith.constant 2 : i32
      %951 = arith.shrsi %950, %c2_i32_420 : i32
      %c3_i32_421 = arith.constant 3 : i32
      %952 = arith.andi %950, %c3_i32_421 : i32
      %953 = arith.index_cast %951 : i32 to index
      %c0_422 = arith.constant 0 : index
      %954 = vector.load %arg4[%953, %c0_422] : memref<12289x128xf32, #tpu.memory_space<vmem>>, vector<1x128xf32>
      %955 = arith.index_cast %952 : i32 to index
      %c0_423 = arith.constant 0 : index
      %956 = vector.load %arg5[%955, %c0_423] : memref<4x128xf32, #tpu.memory_space<vmem>>, vector<1x128xf32>
      %957 = arith.mulf %954, %956 : vector<1x128xf32>
      %c26 = arith.constant 26 : index
      %c0_424 = arith.constant 0 : index
      %958 = vector.load %arg11[%c26, %c0_424] : memref<32x128xf32, #tpu.memory_space<vmem>>, vector<1x128xf32>
      %959 = vector.broadcast %947 : f32 to vector<1x128xf32>
      %960 = arith.mulf %959, %957 : vector<1x128xf32>
      %961 = arith.addf %958, %960 : vector<1x128xf32>
      %c26_425 = arith.constant 26 : index
      %c0_426 = arith.constant 0 : index
      %962 = vector.load %arg11[%c26_425, %c0_426] : memref<32x128xf32, #tpu.memory_space<vmem>>, vector<1x128xf32>
      tpu.vector_store %arg11[%c26_425, %c0_426], %961 {strides = array<i32>} : memref<32x128xf32, #tpu.memory_space<vmem>>, vector<1x128xf32>,
      %963 = arith.index_cast %27 : i32 to index
      %964 = arith.index_cast %arg13 : i32 to index
      %965 = memref.load %arg2[%963, %964] : memref<64x32xi32, #tpu.memory_space<smem>>
      %c2_i32_427 = arith.constant 2 : i32
      %966 = arith.shrsi %965, %c2_i32_427 : i32
      %c3_i32_428 = arith.constant 3 : i32
      %967 = arith.andi %965, %c3_i32_428 : i32
      %968 = arith.index_cast %966 : i32 to index
      %c0_429 = arith.constant 0 : index
      %969 = vector.load %arg4[%968, %c0_429] : memref<12289x128xf32, #tpu.memory_space<vmem>>, vector<1x128xf32>
      %970 = arith.index_cast %967 : i32 to index
      %c0_430 = arith.constant 0 : index
      %971 = vector.load %arg5[%970, %c0_430] : memref<4x128xf32, #tpu.memory_space<vmem>>, vector<1x128xf32>
      %972 = arith.mulf %969, %971 : vector<1x128xf32>
      %c26_431 = arith.constant 26 : index
      %c0_432 = arith.constant 0 : index
      %973 = vector.load %arg12[%c26_431, %c0_432] : memref<32x128xf32, #tpu.memory_space<vmem>>, vector<1x128xf32>
      %974 = vector.broadcast %947 : f32 to vector<1x128xf32>
      %975 = arith.mulf %974, %972 : vector<1x128xf32>
      %976 = arith.addf %973, %975 : vector<1x128xf32>
      %c26_433 = arith.constant 26 : index
      %c0_434 = arith.constant 0 : index
      %977 = vector.load %arg12[%c26_433, %c0_434] : memref<32x128xf32, #tpu.memory_space<vmem>>, vector<1x128xf32>
      tpu.vector_store %arg12[%c26_433, %c0_434], %976 {strides = array<i32>} : memref<32x128xf32, #tpu.memory_space<vmem>>, vector<1x128xf32>,
      %978 = arith.index_cast %28 : i32 to index
      %979 = arith.index_cast %arg13 : i32 to index
      %980 = memref.load %arg3[%978, %979] : memref<64x32xf32, #tpu.memory_space<smem>>
      %981 = arith.index_cast %28 : i32 to index
      %982 = arith.index_cast %arg13 : i32 to index
      %983 = memref.load %arg1[%981, %982] : memref<64x32xi32, #tpu.memory_space<smem>>
      %c2_i32_435 = arith.constant 2 : i32
      %984 = arith.shrsi %983, %c2_i32_435 : i32
      %c3_i32_436 = arith.constant 3 : i32
      %985 = arith.andi %983, %c3_i32_436 : i32
      %986 = arith.index_cast %984 : i32 to index
      %c0_437 = arith.constant 0 : index
      %987 = vector.load %arg4[%986, %c0_437] : memref<12289x128xf32, #tpu.memory_space<vmem>>, vector<1x128xf32>
      %988 = arith.index_cast %985 : i32 to index
      %c0_438 = arith.constant 0 : index
      %989 = vector.load %arg5[%988, %c0_438] : memref<4x128xf32, #tpu.memory_space<vmem>>, vector<1x128xf32>
      %990 = arith.mulf %987, %989 : vector<1x128xf32>
      %c27 = arith.constant 27 : index
      %c0_439 = arith.constant 0 : index
      %991 = vector.load %arg11[%c27, %c0_439] : memref<32x128xf32, #tpu.memory_space<vmem>>, vector<1x128xf32>
      %992 = vector.broadcast %980 : f32 to vector<1x128xf32>
      %993 = arith.mulf %992, %990 : vector<1x128xf32>
      %994 = arith.addf %991, %993 : vector<1x128xf32>
      %c27_440 = arith.constant 27 : index
      %c0_441 = arith.constant 0 : index
      %995 = vector.load %arg11[%c27_440, %c0_441] : memref<32x128xf32, #tpu.memory_space<vmem>>, vector<1x128xf32>
      tpu.vector_store %arg11[%c27_440, %c0_441], %994 {strides = array<i32>} : memref<32x128xf32, #tpu.memory_space<vmem>>, vector<1x128xf32>,
      %996 = arith.index_cast %28 : i32 to index
      %997 = arith.index_cast %arg13 : i32 to index
      %998 = memref.load %arg2[%996, %997] : memref<64x32xi32, #tpu.memory_space<smem>>
      %c2_i32_442 = arith.constant 2 : i32
      %999 = arith.shrsi %998, %c2_i32_442 : i32
      %c3_i32_443 = arith.constant 3 : i32
      %1000 = arith.andi %998, %c3_i32_443 : i32
      %1001 = arith.index_cast %999 : i32 to index
      %c0_444 = arith.constant 0 : index
      %1002 = vector.load %arg4[%1001, %c0_444] : memref<12289x128xf32, #tpu.memory_space<vmem>>, vector<1x128xf32>
      %1003 = arith.index_cast %1000 : i32 to index
      %c0_445 = arith.constant 0 : index
      %1004 = vector.load %arg5[%1003, %c0_445] : memref<4x128xf32, #tpu.memory_space<vmem>>, vector<1x128xf32>
      %1005 = arith.mulf %1002, %1004 : vector<1x128xf32>
      %c27_446 = arith.constant 27 : index
      %c0_447 = arith.constant 0 : index
      %1006 = vector.load %arg12[%c27_446, %c0_447] : memref<32x128xf32, #tpu.memory_space<vmem>>, vector<1x128xf32>
      %1007 = vector.broadcast %980 : f32 to vector<1x128xf32>
      %1008 = arith.mulf %1007, %1005 : vector<1x128xf32>
      %1009 = arith.addf %1006, %1008 : vector<1x128xf32>
      %c27_448 = arith.constant 27 : index
      %c0_449 = arith.constant 0 : index
      %1010 = vector.load %arg12[%c27_448, %c0_449] : memref<32x128xf32, #tpu.memory_space<vmem>>, vector<1x128xf32>
      tpu.vector_store %arg12[%c27_448, %c0_449], %1009 {strides = array<i32>} : memref<32x128xf32, #tpu.memory_space<vmem>>, vector<1x128xf32>,
      %1011 = arith.index_cast %29 : i32 to index
      %1012 = arith.index_cast %arg13 : i32 to index
      %1013 = memref.load %arg3[%1011, %1012] : memref<64x32xf32, #tpu.memory_space<smem>>
      %1014 = arith.index_cast %29 : i32 to index
      %1015 = arith.index_cast %arg13 : i32 to index
      %1016 = memref.load %arg1[%1014, %1015] : memref<64x32xi32, #tpu.memory_space<smem>>
      %c2_i32_450 = arith.constant 2 : i32
      %1017 = arith.shrsi %1016, %c2_i32_450 : i32
      %c3_i32_451 = arith.constant 3 : i32
      %1018 = arith.andi %1016, %c3_i32_451 : i32
      %1019 = arith.index_cast %1017 : i32 to index
      %c0_452 = arith.constant 0 : index
      %1020 = vector.load %arg4[%1019, %c0_452] : memref<12289x128xf32, #tpu.memory_space<vmem>>, vector<1x128xf32>
      %1021 = arith.index_cast %1018 : i32 to index
      %c0_453 = arith.constant 0 : index
      %1022 = vector.load %arg5[%1021, %c0_453] : memref<4x128xf32, #tpu.memory_space<vmem>>, vector<1x128xf32>
      %1023 = arith.mulf %1020, %1022 : vector<1x128xf32>
      %c28 = arith.constant 28 : index
      %c0_454 = arith.constant 0 : index
      %1024 = vector.load %arg11[%c28, %c0_454] : memref<32x128xf32, #tpu.memory_space<vmem>>, vector<1x128xf32>
      %1025 = vector.broadcast %1013 : f32 to vector<1x128xf32>
      %1026 = arith.mulf %1025, %1023 : vector<1x128xf32>
      %1027 = arith.addf %1024, %1026 : vector<1x128xf32>
      %c28_455 = arith.constant 28 : index
      %c0_456 = arith.constant 0 : index
      %1028 = vector.load %arg11[%c28_455, %c0_456] : memref<32x128xf32, #tpu.memory_space<vmem>>, vector<1x128xf32>
      tpu.vector_store %arg11[%c28_455, %c0_456], %1027 {strides = array<i32>} : memref<32x128xf32, #tpu.memory_space<vmem>>, vector<1x128xf32>,
      %1029 = arith.index_cast %29 : i32 to index
      %1030 = arith.index_cast %arg13 : i32 to index
      %1031 = memref.load %arg2[%1029, %1030] : memref<64x32xi32, #tpu.memory_space<smem>>
      %c2_i32_457 = arith.constant 2 : i32
      %1032 = arith.shrsi %1031, %c2_i32_457 : i32
      %c3_i32_458 = arith.constant 3 : i32
      %1033 = arith.andi %1031, %c3_i32_458 : i32
      %1034 = arith.index_cast %1032 : i32 to index
      %c0_459 = arith.constant 0 : index
      %1035 = vector.load %arg4[%1034, %c0_459] : memref<12289x128xf32, #tpu.memory_space<vmem>>, vector<1x128xf32>
      %1036 = arith.index_cast %1033 : i32 to index
      %c0_460 = arith.constant 0 : index
      %1037 = vector.load %arg5[%1036, %c0_460] : memref<4x128xf32, #tpu.memory_space<vmem>>, vector<1x128xf32>
      %1038 = arith.mulf %1035, %1037 : vector<1x128xf32>
      %c28_461 = arith.constant 28 : index
      %c0_462 = arith.constant 0 : index
      %1039 = vector.load %arg12[%c28_461, %c0_462] : memref<32x128xf32, #tpu.memory_space<vmem>>, vector<1x128xf32>
      %1040 = vector.broadcast %1013 : f32 to vector<1x128xf32>
      %1041 = arith.mulf %1040, %1038 : vector<1x128xf32>
      %1042 = arith.addf %1039, %1041 : vector<1x128xf32>
      %c28_463 = arith.constant 28 : index
      %c0_464 = arith.constant 0 : index
      %1043 = vector.load %arg12[%c28_463, %c0_464] : memref<32x128xf32, #tpu.memory_space<vmem>>, vector<1x128xf32>
      tpu.vector_store %arg12[%c28_463, %c0_464], %1042 {strides = array<i32>} : memref<32x128xf32, #tpu.memory_space<vmem>>, vector<1x128xf32>,
      %1044 = arith.index_cast %30 : i32 to index
      %1045 = arith.index_cast %arg13 : i32 to index
      %1046 = memref.load %arg3[%1044, %1045] : memref<64x32xf32, #tpu.memory_space<smem>>
      %1047 = arith.index_cast %30 : i32 to index
      %1048 = arith.index_cast %arg13 : i32 to index
      %1049 = memref.load %arg1[%1047, %1048] : memref<64x32xi32, #tpu.memory_space<smem>>
      %c2_i32_465 = arith.constant 2 : i32
      %1050 = arith.shrsi %1049, %c2_i32_465 : i32
      %c3_i32_466 = arith.constant 3 : i32
      %1051 = arith.andi %1049, %c3_i32_466 : i32
      %1052 = arith.index_cast %1050 : i32 to index
      %c0_467 = arith.constant 0 : index
      %1053 = vector.load %arg4[%1052, %c0_467] : memref<12289x128xf32, #tpu.memory_space<vmem>>, vector<1x128xf32>
      %1054 = arith.index_cast %1051 : i32 to index
      %c0_468 = arith.constant 0 : index
      %1055 = vector.load %arg5[%1054, %c0_468] : memref<4x128xf32, #tpu.memory_space<vmem>>, vector<1x128xf32>
      %1056 = arith.mulf %1053, %1055 : vector<1x128xf32>
      %c29 = arith.constant 29 : index
      %c0_469 = arith.constant 0 : index
      %1057 = vector.load %arg11[%c29, %c0_469] : memref<32x128xf32, #tpu.memory_space<vmem>>, vector<1x128xf32>
      %1058 = vector.broadcast %1046 : f32 to vector<1x128xf32>
      %1059 = arith.mulf %1058, %1056 : vector<1x128xf32>
      %1060 = arith.addf %1057, %1059 : vector<1x128xf32>
      %c29_470 = arith.constant 29 : index
      %c0_471 = arith.constant 0 : index
      %1061 = vector.load %arg11[%c29_470, %c0_471] : memref<32x128xf32, #tpu.memory_space<vmem>>, vector<1x128xf32>
      tpu.vector_store %arg11[%c29_470, %c0_471], %1060 {strides = array<i32>} : memref<32x128xf32, #tpu.memory_space<vmem>>, vector<1x128xf32>,
      %1062 = arith.index_cast %30 : i32 to index
      %1063 = arith.index_cast %arg13 : i32 to index
      %1064 = memref.load %arg2[%1062, %1063] : memref<64x32xi32, #tpu.memory_space<smem>>
      %c2_i32_472 = arith.constant 2 : i32
      %1065 = arith.shrsi %1064, %c2_i32_472 : i32
      %c3_i32_473 = arith.constant 3 : i32
      %1066 = arith.andi %1064, %c3_i32_473 : i32
      %1067 = arith.index_cast %1065 : i32 to index
      %c0_474 = arith.constant 0 : index
      %1068 = vector.load %arg4[%1067, %c0_474] : memref<12289x128xf32, #tpu.memory_space<vmem>>, vector<1x128xf32>
      %1069 = arith.index_cast %1066 : i32 to index
      %c0_475 = arith.constant 0 : index
      %1070 = vector.load %arg5[%1069, %c0_475] : memref<4x128xf32, #tpu.memory_space<vmem>>, vector<1x128xf32>
      %1071 = arith.mulf %1068, %1070 : vector<1x128xf32>
      %c29_476 = arith.constant 29 : index
      %c0_477 = arith.constant 0 : index
      %1072 = vector.load %arg12[%c29_476, %c0_477] : memref<32x128xf32, #tpu.memory_space<vmem>>, vector<1x128xf32>
      %1073 = vector.broadcast %1046 : f32 to vector<1x128xf32>
      %1074 = arith.mulf %1073, %1071 : vector<1x128xf32>
      %1075 = arith.addf %1072, %1074 : vector<1x128xf32>
      %c29_478 = arith.constant 29 : index
      %c0_479 = arith.constant 0 : index
      %1076 = vector.load %arg12[%c29_478, %c0_479] : memref<32x128xf32, #tpu.memory_space<vmem>>, vector<1x128xf32>
      tpu.vector_store %arg12[%c29_478, %c0_479], %1075 {strides = array<i32>} : memref<32x128xf32, #tpu.memory_space<vmem>>, vector<1x128xf32>,
      %1077 = arith.index_cast %31 : i32 to index
      %1078 = arith.index_cast %arg13 : i32 to index
      %1079 = memref.load %arg3[%1077, %1078] : memref<64x32xf32, #tpu.memory_space<smem>>
      %1080 = arith.index_cast %31 : i32 to index
      %1081 = arith.index_cast %arg13 : i32 to index
      %1082 = memref.load %arg1[%1080, %1081] : memref<64x32xi32, #tpu.memory_space<smem>>
      %c2_i32_480 = arith.constant 2 : i32
      %1083 = arith.shrsi %1082, %c2_i32_480 : i32
      %c3_i32_481 = arith.constant 3 : i32
      %1084 = arith.andi %1082, %c3_i32_481 : i32
      %1085 = arith.index_cast %1083 : i32 to index
      %c0_482 = arith.constant 0 : index
      %1086 = vector.load %arg4[%1085, %c0_482] : memref<12289x128xf32, #tpu.memory_space<vmem>>, vector<1x128xf32>
      %1087 = arith.index_cast %1084 : i32 to index
      %c0_483 = arith.constant 0 : index
      %1088 = vector.load %arg5[%1087, %c0_483] : memref<4x128xf32, #tpu.memory_space<vmem>>, vector<1x128xf32>
      %1089 = arith.mulf %1086, %1088 : vector<1x128xf32>
      %c30 = arith.constant 30 : index
      %c0_484 = arith.constant 0 : index
      %1090 = vector.load %arg11[%c30, %c0_484] : memref<32x128xf32, #tpu.memory_space<vmem>>, vector<1x128xf32>
      %1091 = vector.broadcast %1079 : f32 to vector<1x128xf32>
      %1092 = arith.mulf %1091, %1089 : vector<1x128xf32>
      %1093 = arith.addf %1090, %1092 : vector<1x128xf32>
      %c30_485 = arith.constant 30 : index
      %c0_486 = arith.constant 0 : index
      %1094 = vector.load %arg11[%c30_485, %c0_486] : memref<32x128xf32, #tpu.memory_space<vmem>>, vector<1x128xf32>
      tpu.vector_store %arg11[%c30_485, %c0_486], %1093 {strides = array<i32>} : memref<32x128xf32, #tpu.memory_space<vmem>>, vector<1x128xf32>,
      %1095 = arith.index_cast %31 : i32 to index
      %1096 = arith.index_cast %arg13 : i32 to index
      %1097 = memref.load %arg2[%1095, %1096] : memref<64x32xi32, #tpu.memory_space<smem>>
      %c2_i32_487 = arith.constant 2 : i32
      %1098 = arith.shrsi %1097, %c2_i32_487 : i32
      %c3_i32_488 = arith.constant 3 : i32
      %1099 = arith.andi %1097, %c3_i32_488 : i32
      %1100 = arith.index_cast %1098 : i32 to index
      %c0_489 = arith.constant 0 : index
      %1101 = vector.load %arg4[%1100, %c0_489] : memref<12289x128xf32, #tpu.memory_space<vmem>>, vector<1x128xf32>
      %1102 = arith.index_cast %1099 : i32 to index
      %c0_490 = arith.constant 0 : index
      %1103 = vector.load %arg5[%1102, %c0_490] : memref<4x128xf32, #tpu.memory_space<vmem>>, vector<1x128xf32>
      %1104 = arith.mulf %1101, %1103 : vector<1x128xf32>
      %c30_491 = arith.constant 30 : index
      %c0_492 = arith.constant 0 : index
      %1105 = vector.load %arg12[%c30_491, %c0_492] : memref<32x128xf32, #tpu.memory_space<vmem>>, vector<1x128xf32>
      %1106 = vector.broadcast %1079 : f32 to vector<1x128xf32>
      %1107 = arith.mulf %1106, %1104 : vector<1x128xf32>
      %1108 = arith.addf %1105, %1107 : vector<1x128xf32>
      %c30_493 = arith.constant 30 : index
      %c0_494 = arith.constant 0 : index
      %1109 = vector.load %arg12[%c30_493, %c0_494] : memref<32x128xf32, #tpu.memory_space<vmem>>, vector<1x128xf32>
      tpu.vector_store %arg12[%c30_493, %c0_494], %1108 {strides = array<i32>} : memref<32x128xf32, #tpu.memory_space<vmem>>, vector<1x128xf32>,
      %1110 = arith.index_cast %32 : i32 to index
      %1111 = arith.index_cast %arg13 : i32 to index
      %1112 = memref.load %arg3[%1110, %1111] : memref<64x32xf32, #tpu.memory_space<smem>>
      %1113 = arith.index_cast %32 : i32 to index
      %1114 = arith.index_cast %arg13 : i32 to index
      %1115 = memref.load %arg1[%1113, %1114] : memref<64x32xi32, #tpu.memory_space<smem>>
      %c2_i32_495 = arith.constant 2 : i32
      %1116 = arith.shrsi %1115, %c2_i32_495 : i32
      %c3_i32_496 = arith.constant 3 : i32
      %1117 = arith.andi %1115, %c3_i32_496 : i32
      %1118 = arith.index_cast %1116 : i32 to index
      %c0_497 = arith.constant 0 : index
      %1119 = vector.load %arg4[%1118, %c0_497] : memref<12289x128xf32, #tpu.memory_space<vmem>>, vector<1x128xf32>
      %1120 = arith.index_cast %1117 : i32 to index
      %c0_498 = arith.constant 0 : index
      %1121 = vector.load %arg5[%1120, %c0_498] : memref<4x128xf32, #tpu.memory_space<vmem>>, vector<1x128xf32>
      %1122 = arith.mulf %1119, %1121 : vector<1x128xf32>
      %c31 = arith.constant 31 : index
      %c0_499 = arith.constant 0 : index
      %1123 = vector.load %arg11[%c31, %c0_499] : memref<32x128xf32, #tpu.memory_space<vmem>>, vector<1x128xf32>
      %1124 = vector.broadcast %1112 : f32 to vector<1x128xf32>
      %1125 = arith.mulf %1124, %1122 : vector<1x128xf32>
      %1126 = arith.addf %1123, %1125 : vector<1x128xf32>
      %c31_500 = arith.constant 31 : index
      %c0_501 = arith.constant 0 : index
      %1127 = vector.load %arg11[%c31_500, %c0_501] : memref<32x128xf32, #tpu.memory_space<vmem>>, vector<1x128xf32>
      tpu.vector_store %arg11[%c31_500, %c0_501], %1126 {strides = array<i32>} : memref<32x128xf32, #tpu.memory_space<vmem>>, vector<1x128xf32>,
      %1128 = arith.index_cast %32 : i32 to index
      %1129 = arith.index_cast %arg13 : i32 to index
      %1130 = memref.load %arg2[%1128, %1129] : memref<64x32xi32, #tpu.memory_space<smem>>
      %c2_i32_502 = arith.constant 2 : i32
      %1131 = arith.shrsi %1130, %c2_i32_502 : i32
      %c3_i32_503 = arith.constant 3 : i32
      %1132 = arith.andi %1130, %c3_i32_503 : i32
      %1133 = arith.index_cast %1131 : i32 to index
      %c0_504 = arith.constant 0 : index
      %1134 = vector.load %arg4[%1133, %c0_504] : memref<12289x128xf32, #tpu.memory_space<vmem>>, vector<1x128xf32>
      %1135 = arith.index_cast %1132 : i32 to index
      %c0_505 = arith.constant 0 : index
      %1136 = vector.load %arg5[%1135, %c0_505] : memref<4x128xf32, #tpu.memory_space<vmem>>, vector<1x128xf32>
      %1137 = arith.mulf %1134, %1136 : vector<1x128xf32>
      %c31_506 = arith.constant 31 : index
      %c0_507 = arith.constant 0 : index
      %1138 = vector.load %arg12[%c31_506, %c0_507] : memref<32x128xf32, #tpu.memory_space<vmem>>, vector<1x128xf32>
      %1139 = vector.broadcast %1112 : f32 to vector<1x128xf32>
      %1140 = arith.mulf %1139, %1137 : vector<1x128xf32>
      %1141 = arith.addf %1138, %1140 : vector<1x128xf32>
      %c31_508 = arith.constant 31 : index
      %c0_509 = arith.constant 0 : index
      %1142 = vector.load %arg12[%c31_508, %c0_509] : memref<32x128xf32, #tpu.memory_space<vmem>>, vector<1x128xf32>
      tpu.vector_store %arg12[%c31_508, %c0_509], %1141 {strides = array<i32>} : memref<32x128xf32, #tpu.memory_space<vmem>>, vector<1x128xf32>,
    }
    %c32_i32_7 = arith.constant 32 : i32
    %c0_8 = arith.constant 0 : index
    %c0_9 = arith.constant 0 : index
    %38 = vector.load %arg6[%c0_8, %c0_9] : memref<1x32xf32, #tpu.memory_space<vmem>>, vector<1x32xf32>
    %c0_10 = arith.constant 0 : index
    %c0_11 = arith.constant 0 : index
    %39 = vector.load %arg11[%c0_10, %c0_11] : memref<32x128xf32, #tpu.memory_space<vmem>>, vector<32x128xf32>
    %40 = vector.extract_strided_slice %39 {offsets = [0, 0], sizes = [32, 32], strides = [1, 1]} : vector<32x128xf32> to vector<32x32xf32>
    %41 = vector.extract_strided_slice %39 {offsets = [0, 32], sizes = [32, 32], strides = [1, 1]} : vector<32x128xf32> to vector<32x32xf32>
    %42 = arith.addf %40, %41 : vector<32x32xf32>
    %43 = vector.extract_strided_slice %39 {offsets = [0, 64], sizes = [32, 32], strides = [1, 1]} : vector<32x128xf32> to vector<32x32xf32>
    %44 = arith.addf %42, %43 : vector<32x32xf32>
    %45 = vector.extract_strided_slice %39 {offsets = [0, 96], sizes = [32, 32], strides = [1, 1]} : vector<32x128xf32> to vector<32x32xf32>
    %46 = arith.addf %44, %45 : vector<32x32xf32>
    %47 = vector.broadcast %38 : vector<1x32xf32> to vector<32x32xf32>
    %48 = arith.addf %46, %47 : vector<32x32xf32>
    %cst_12 = arith.constant 0.000000e+00 : f32
    %cst_13 = arith.constant 1.000000e+00 : f32
    %49 = vector.broadcast %cst_12 : f32 to vector<32x32xf32>
    %50 = arith.maximumf %49, %48 : vector<32x32xf32>
    %51 = vector.broadcast %cst_13 : f32 to vector<32x32xf32>
    %52 = arith.minimumf %51, %50 : vector<32x32xf32>
    %c0_14 = arith.constant 0 : index
    %c0_15 = arith.constant 0 : index
    %53 = vector.load %arg12[%c0_14, %c0_15] : memref<32x128xf32, #tpu.memory_space<vmem>>, vector<32x128xf32>
    %54 = vector.extract_strided_slice %53 {offsets = [0, 0], sizes = [32, 32], strides = [1, 1]} : vector<32x128xf32> to vector<32x32xf32>
    %55 = vector.extract_strided_slice %53 {offsets = [0, 32], sizes = [32, 32], strides = [1, 1]} : vector<32x128xf32> to vector<32x32xf32>
    %56 = arith.addf %54, %55 : vector<32x32xf32>
    %57 = vector.extract_strided_slice %53 {offsets = [0, 64], sizes = [32, 32], strides = [1, 1]} : vector<32x128xf32> to vector<32x32xf32>
    %58 = arith.addf %56, %57 : vector<32x32xf32>
    %59 = vector.extract_strided_slice %53 {offsets = [0, 96], sizes = [32, 32], strides = [1, 1]} : vector<32x128xf32> to vector<32x32xf32>
    %60 = arith.addf %58, %59 : vector<32x32xf32>
    %61 = vector.broadcast %38 : vector<1x32xf32> to vector<32x32xf32>
    %62 = arith.addf %60, %61 : vector<32x32xf32>
    %cst_16 = arith.constant 0.000000e+00 : f32
    %cst_17 = arith.constant 1.000000e+00 : f32
    %63 = vector.broadcast %cst_16 : f32 to vector<32x32xf32>
    %64 = arith.maximumf %63, %62 : vector<32x32xf32>
    %65 = vector.broadcast %cst_17 : f32 to vector<32x32xf32>
    %66 = arith.minimumf %65, %64 : vector<32x32xf32>
    %c0_18 = arith.constant 0 : index
    %c0_19 = arith.constant 0 : index
    %67 = vector.load %arg7[%c0_18, %c0_19] : memref<1x32xf32, #tpu.memory_space<vmem>>, vector<1x32xf32>
    %68 = vector.broadcast %67 : vector<1x32xf32> to vector<32x32xf32>
    %69 = arith.mulf %52, %68 : vector<32x32xf32>
    %cst_20 = arith.constant dense<0.000000e+00> : vector<32xf32>
    %70 = vector.multi_reduction <add>, %69, %cst_20 [1] : vector<32x32xf32> to vector<32xf32>
    %71 = vector.shape_cast %70 : vector<32xf32> to vector<32x1xf32>
    %c0_21 = arith.constant 0 : index
    %c0_22 = arith.constant 0 : index
    %72 = vector.load %arg8[%c0_21, %c0_22] : memref<1x32xf32, #tpu.memory_space<vmem>>, vector<1x32xf32>
    %73 = vector.broadcast %72 : vector<1x32xf32> to vector<32x32xf32>
    %74 = arith.mulf %66, %73 : vector<32x32xf32>
    %cst_23 = arith.constant dense<0.000000e+00> : vector<32xf32>
    %75 = vector.multi_reduction <add>, %74, %cst_23 [1] : vector<32x32xf32> to vector<32xf32>
    %76 = vector.shape_cast %75 : vector<32xf32> to vector<32x1xf32>
    %77 = arith.addf %71, %76 : vector<32x1xf32>
    %c0_24 = arith.constant 0 : index
    %c0_25 = arith.constant 0 : index
    %78 = vector.load %arg9[%c0_24, %c0_25] : memref<1x1xf32, #tpu.memory_space<vmem>>, vector<1x1xf32>
    %79 = vector.broadcast %78 : vector<1x1xf32> to vector<32x1xf32>
    %80 = arith.addf %77, %79 : vector<32x1xf32>
    %81 = arith.negf %80 : vector<32x1xf32>
    %82 = math.exp %81 : vector<32x1xf32>
    %cst_26 = arith.constant 1.000000e+00 : f32
    %83 = vector.broadcast %cst_26 : f32 to vector<32x1xf32>
    %84 = arith.addf %83, %82 : vector<32x1xf32>
    %85 = arith.divf %83, %84 : vector<32x1xf32>
    %c0_27 = arith.constant 0 : index
    %c0_28 = arith.constant 0 : index
    %86 = vector.load %arg10[%c0_27, %c0_28] : memref<32x1xf32, #tpu.memory_space<vmem>>, vector<32x1xf32>
    tpu.vector_store %arg10[%c0_27, %c0_28], %85 {strides = array<i32>} : memref<32x1xf32, #tpu.memory_space<vmem>>, vector<32x1xf32>,
    return
  }
  func.func @transform_0(%arg0: i32, %arg1: memref<64x32xi32, #tpu.memory_space<smem>>, %arg2: memref<64x32xi32, #tpu.memory_space<smem>>) -> (i32, i32) {
    %c0_i32 = arith.constant 0 : i32
    %c0_i32_0 = arith.constant 0 : i32
    %c0_i32_1 = arith.constant 0 : i32
    return %c0_i32, %c0_i32_0 : i32, i32
  }
  func.func @transform_1(%arg0: i32, %arg1: memref<64x32xi32, #tpu.memory_space<smem>>, %arg2: memref<64x32xi32, #tpu.memory_space<smem>>) -> (i32, i32) {
    %c0_i32 = arith.constant 0 : i32
    %c0_i32_0 = arith.constant 0 : i32
    %c0_i32_1 = arith.constant 0 : i32
    return %c0_i32, %c0_i32_0 : i32, i32
  }
  func.func @transform_2(%arg0: i32, %arg1: memref<64x32xi32, #tpu.memory_space<smem>>, %arg2: memref<64x32xi32, #tpu.memory_space<smem>>) -> (i32, i32) {
    %c0_i32 = arith.constant 0 : i32
    %c0_i32_0 = arith.constant 0 : i32
    %c0_i32_1 = arith.constant 0 : i32
    return %c0_i32, %c0_i32_0 : i32, i32
  }
  func.func @transform_3(%arg0: i32, %arg1: memref<64x32xi32, #tpu.memory_space<smem>>, %arg2: memref<64x32xi32, #tpu.memory_space<smem>>) -> (i32, i32) {
    %c0_i32 = arith.constant 0 : i32
    %c0_i32_0 = arith.constant 0 : i32
    %c0_i32_1 = arith.constant 0 : i32
    return %c0_i32, %c0_i32_0 : i32, i32
  }
  func.func @transform_4(%arg0: i32, %arg1: memref<64x32xi32, #tpu.memory_space<smem>>, %arg2: memref<64x32xi32, #tpu.memory_space<smem>>) -> (i32, i32) {
    %c0_i32 = arith.constant 0 : i32
    %c0_i32_0 = arith.constant 0 : i32
    %c0_i32_1 = arith.constant 0 : i32
    return %c0_i32, %c0_i32_0 : i32, i32
  }
  func.func @transform_5(%arg0: i32, %arg1: memref<64x32xi32, #tpu.memory_space<smem>>, %arg2: memref<64x32xi32, #tpu.memory_space<smem>>) -> (i32, i32) {
    %c0_i32 = arith.constant 0 : i32
    %c0_i32_0 = arith.constant 0 : i32
    %c0_i32_1 = arith.constant 0 : i32
    return %c0_i32, %c0_i32_0 : i32, i32
  }
  func.func @transform_6(%arg0: i32, %arg1: memref<64x32xi32, #tpu.memory_space<smem>>, %arg2: memref<64x32xi32, #tpu.memory_space<smem>>) -> (i32, i32) {
    %c0_i32 = arith.constant 0 : i32
    %c0_i32_0 = arith.constant 0 : i32
    %c0_i32_1 = arith.constant 0 : i32
    return %c0_i32, %c0_i32_0 : i32, i32
  }
  func.func @transform_7(%arg0: i32, %arg1: memref<64x32xi32, #tpu.memory_space<smem>>, %arg2: memref<64x32xi32, #tpu.memory_space<smem>>) -> (i32, i32) {
    %c0_i32 = arith.constant 0 : i32
    %c0_i32_0 = arith.constant 0 : i32
    return %arg0, %c0_i32 : i32, i32
  }
}

</mosaic_0001>

<bundles_post_ra>
// kernel: tpu_custom_call.1
= control target key start
LH: loop header
LB: loop body
LE: loop exit
PB: predicated region body
PF: predicated region fallthrough
CT: control target
= control target key end

     0   :  { %s3049_s0 = inlined_call_operand.vmem [shape: s32[64,32], index: 0, kind: input, shape index: {}]   ;;  %s3050_s2 = inlined_call_operand.vmem [shape: f32[64,32], index: 2, kind: input, shape index: {}]   ;;  %s3051_s3 = inlined_call_operand.hbm [shape: f32[12289,128], index: 3, kind: input, shape index: {}]   ;;  %s3052_s4 = inlined_call_operand.hbm [shape: f32[4,128], index: 4, kind: input, shape index: {}]   ;;  %s3053_s5 = inlined_call_operand.hbm [shape: f32[1,32], index: 5, kind: input, shape index: {}]   ;;  %s3054_s6 = inlined_call_operand.hbm [shape: f32[1,32], index: 6, kind: input, shape index: {}]   ;;  %s3055_s7 = inlined_call_operand.hbm [shape: f32[1,32], index: 7, kind: input, shape index: {}]   ;;  %s3056_s9 = inlined_call_operand.vmem [shape: f32[64,1], index: 9, kind: output, shape index: {}]   ;;  %s3057_s1 = inlined_call_operand.vmem [shape: s32[64,32], index: 1, kind: input, shape index: {}]   ;;  %s3058_s8 = inlined_call_operand.<no memory space> [shape: f32[1,1], index: 8, kind: input, shape index: {}]  }
   0x1   :  { %3061 = sst [smem:[#allocation23_spill]] %s3050_s2  ;;  %s14_s11 = sshll.u32 %s3049_s0, 4  ;;  %v22_v0 = vstv %s3058_s8  ;;  %s15_s11 = int_to_ptr.vmem [resolvable:$true] %s14_s11 }
   0x2   :  { %3062 = sst [smem:[#allocation24_spill]] %s3051_s3  ;;  %s18_s14 = sshll.u32 %s3057_s1, 4  ;;  %23 = vst [vmem:[#allocation7] sm:$0x1] %v22_v0  ;;  %s19_s14 = int_to_ptr.vmem [resolvable:$true] %s18_s14 }
   0x3   :  { %s1968_s17 = scalar_lea.vmem %s15_s11, 1024  ;;  %p1973_p1 = scmp.lt.s32.totalorder %s15_s11, %s15_s11 }
   0x4   :  { %p1969_p0 = scmp.ne.s32.totalorder %s15_s11, %s1968_s17  ;;  %p1974_p2 = scmp.lt.s32.totalorder %s1968_s17, %s1968_s17 }
   0x6   :  { %p1975_p3 = por %p1974_p2, %p1973_p1 }
   0x8   :  { %p1976_p4 = pnand %p1975_p3, %p1969_p0 }
   0xa   :  { %1979 = shalt.err (!%p1976_p4)  }
   0xb   :  { %s2171_s18 = smov [#allocation5]   ;;  %s1980_s0 = scalar_lea.vmem %s19_s14, 1024 }
   0xc   :  { %17 = dma.vmem_to_smem %s15_s11, 1024, %s2171_s18, [#allocation4] }
   0xd   :  { %p1981_p5 = scmp.ne.s32.totalorder %s19_s14, %s1980_s0  ;;  %p1985_p6 = scmp.lt.s32.totalorder %s19_s14, %s19_s14 }
   0xe   :  { %p1986_p7 = scmp.lt.s32.totalorder %s1980_s0, %s1980_s0 }
  0x10   :  { %p1987_p8 = por %p1986_p7, %p1985_p6 }
  0x12   :  { %p1988_p9 = pnand %p1987_p8, %p1981_p5 }
  0x14   :  { %1991 = shalt.err (!%p1988_p9)  }
  0x15   :  { %s2172_s1 = smov [#allocation6]  }
  0x16   :  { %21 = dma.vmem_to_smem %s19_s14, 1024, %s2172_s1, [#allocation4] }
  0x17   :  { %2145 = dma.done.wait [#allocation4], 2048 }
  0x18   :  { %2146 = vsyncadd [#allocation4], 4294965248 }
  0x19   :  { %25 = sfence }
  0x1a   :  { %26 = vsyncpa [#allocation10], 0 }
  0x1b   :  { %27 = vsyncpa [#allocation9], 0 }
  0x1c   :  { %28 = vsyncpa [#allocation13], 0 }
  0x1d   :  { %29 = vsyncpa [#allocation16], 0  ;;  %s2244_s8 = smov 0  }
  0x1e LB: > { %s2173_s19 = smov [#allocation12]   ;;  %s2250_s21 = sadd.s32 4294967295, %s2165_s8   ;;  %s2165_s8 = sphi %s2244_s8, %s35_s8  }
  0x1f   : > { %s252_s20 = sshll.u32 %s2173_s19, 4  ;;  %p1808_p10 = scmp.ge.s32.totalorder %s2165_s8, 1  ;;  %s253_s20 = int_to_ptr.vmem [resolvable:$true] %s252_s20 }
  0x20   : > { %p213_p11 = scmp.lt.s32.totalorder %s2165_s8, 3  ;;  %p3059_p12 = scmp.eq.s32.totalorder %s2250_s21, 0 }
  0x21   : > { %s2174_s23 = smov [#allocation15]   ;;  %s3064_s2 = sld [smem:[#allocation23_spill]] }
  0x22   : > { %p2255_p13 = pnand %p1808_p10, %p213_p11  ;;  %s274_s24 = sshll.u32 %s2174_s23, 4  ;;  %s275_s24 = int_to_ptr.vmem [resolvable:$true] %s274_s24 }
  0x23   : > { %s2175_s29 = smov [#allocation11]   ;;  %s2003_s11 = scalar_lea.vmem %s253_s20, 64 }
  0x24   : > { %s3063_s22 = scalar_select %p2255_p13, 1, 0 }
  0x25   : > { %p1891_p0 = pneg %p2255_p13  ;;  %s2272_s30 = sshll.u32 %s2175_s29, 4  ;;  %s239_s30 = int_to_ptr.vmem [resolvable:$true] %s2272_s30 }
  0x26   : > { %p2004_p3 = scmp.ne.s32.totalorder %s253_s20, %s2003_s11  ;;  %p2011_p6 = scmp.lt.s32.totalorder %s253_s20, %s253_s20 }
  0x27   : > { %s225_s27 = sshll.u32 %s3064_s2, 4  ;;  %p2268_p1 = pnand %p3059_p12, %p1891_p0  ;;  %s2264_s27 = int_to_ptr.vmem [resolvable:$true] %s225_s27 }
  0x28   : > { %p2012_p7 = scmp.lt.s32.totalorder %s2003_s11, %s2003_s11 }
  0x29   : > { %p2276_p2 = pneg %p2268_p1 }
  0x2a   : > { %p2013_p8 = por %p2012_p7, %p2011_p6 }
  0x2b   : > { %p2006_p4 = pnand %p2004_p3, %p2276_p2 }
  0x2d   : > { %p2007_p5 = pneg %p2006_p4 }
  0x2f   : > { %p2014_p9 = pnand %p2013_p8, %p2007_p5 }
  0x31   : > { %2017 = shalt.err (!%p2014_p9)
}
  0x32   : > { %1900 = dma.hbm_to_vmem [thread:$0]  (!%p2268_p1), %s3052_s4, 64, %s253_s20, [#allocation13]  }
  0x33   : > { %s2029_s14 = scalar_lea.vmem %s275_s24, 16  ;;  %s2036_s15 = scalar_lea.vmem %s275_s24, 32 }
  0x34   : > { %p2030_p10 = scmp.ne.s32.totalorder %s275_s24, %s2029_s14  ;;  %p2037_p3 = scmp.lt.s32.totalorder %s275_s24, %s275_s24 }
  0x35   : > { %p2038_p4 = scmp.lt.s32.totalorder %s2036_s15, %s2029_s14 }
  0x36   : > { %p2032_p11 = pnand %p2030_p10, %p2276_p2 }
  0x37   : > { %p2039_p12 = por %p2038_p4, %p2037_p3 }
  0x38   : > { %p2033_p0 = pneg %p2032_p11 }
  0x3a   : > { %p2040_p13 = pnand %p2039_p12, %p2033_p0 }
  0x3c   : > { %2043 = shalt.err (!%p2040_p13)
}
  0x3d   : > { %1906 = dma.hbm_to_vmem [thread:$0]  (!%p2268_p1), %s3054_s6, 16, %s275_s24, [#allocation16]  }
  0x3e   : > { %s2044_s18 = scalar_lea.vmem %s2264_s27, 1024  ;;  %p2052_p8 = scmp.lt.s32.totalorder %s2264_s27, %s2264_s27 }
  0x3f   : > { %p2045_p5 = scmp.ne.s32.totalorder %s2264_s27, %s2044_s18  ;;  %p2053_p9 = scmp.lt.s32.totalorder %s2044_s18, %s2044_s18 }
  0x41   : > { %p2047_p6 = pnand %p2045_p5, %p2276_p2  ;;  %p2054_p12 = por %p2053_p9, %p2052_p8 }
  0x43   : > { %p2048_p7 = pneg %p2047_p6 }
  0x45   : > { %p2055_p13 = pnand %p2054_p12, %p2048_p7 }
  0x47   : > { %2058 = shalt.err (!%p2055_p13)
}
  0x48   : > { %s2176_s0 = smov [#allocation8]   ;;  %s2177_s1 = smov 128  }
  0x49   : > { %s2178_s19 = smov 8   ;;  %s2070_s20 = scalar_lea.vmem %s239_s30, 196736 }
  0x4a   : > { %1894 = dma.vmem_to_smem (!%p2268_p1), %s2264_s27, 1024, %s2176_s0, [#allocation10], %s2177_s1, %s2177_s1, %s2178_s19  }
  0x4b   : > { %p2071_p10 = scmp.ne.s32.totalorder %s239_s30, %s2070_s20  ;;  %p2078_p3 = scmp.lt.s32.totalorder %s239_s30, %s239_s30 }
  0x4c   : > { %p2079_p4 = scmp.lt.s32.totalorder %s2070_s20, %s2070_s20 }
  0x4d   : > { %p2073_p11 = pnand %p2071_p10, %p2276_p2 }
  0x4e   : > { %p2080_p5 = por %p2079_p4, %p2078_p3 }
  0x4f   : > { %p2074_p0 = pneg %p2073_p11 }
  0x51   : > { %p2081_p6 = pnand %p2080_p5, %p2074_p0 }
  0x53   : > { %2084 = shalt.err (!%p2081_p6)
}
  0x54   : > { %s3067_s3 = sld [smem:[#allocation24_spill]]  ;;  %s2179_s25 = smov [#allocation14]  }
  0x55   : > { %s263_s26 = sshll.u32 %s2179_s25, 4  ;;  %s2180_s27 = smov [#allocation17]   ;;  %s264_s26 = int_to_ptr.vmem [resolvable:$true] %s263_s26 }
  0x56   : > { %s285_s29 = sshll.u32 %s2180_s27, 4  ;;  %s2096_s11 = scalar_lea.vmem %s264_s26, 16  ;;  %s286_s29 = int_to_ptr.vmem [resolvable:$true] %s285_s29 }
  0x57   : > { %p2097_p7 = scmp.ne.s32.totalorder %s264_s26, %s2096_s11  ;;  %s2103_s12 = scalar_lea.vmem %s264_s26, 32 }
  0x58   : > { %p2104_p12 = scmp.lt.s32.totalorder %s264_s26, %s264_s26  ;;  %p2105_p13 = scmp.lt.s32.totalorder %s2103_s12, %s2096_s11 }
  0x59   : > { %p2099_p8 = pnand %p2097_p7, %p2276_p2 }
  0x5a   : > { %1897 = dma.hbm_to_vmem [thread:$0]  (!%p2268_p1), %s3067_s3, 196736, %s239_s30, [#allocation9], %s2177_s1, %s2177_s1, %s2178_s19  }
  0x5b   : > { %p2100_p9 = pneg %p2099_p8  ;;  %p2106_p10 = por %p2105_p13, %p2104_p12 }
  0x5d   : > { %p2107_p11 = pnand %p2106_p10, %p2100_p9 }
  0x5f   : > { %2110 = shalt.err (!%p2107_p11)
}
  0x60   : > { %1903 = dma.hbm_to_vmem [thread:$0]  (!%p2268_p1), %s3053_s5, 16, %s264_s26, [#allocation13]  }
  0x61   : > { %s2122_s14 = scalar_lea.vmem %s286_s29, 16  ;;  %s2129_s15 = scalar_lea.vmem %s286_s29, 32 }
  0x62   : > { %p2123_p0 = scmp.ne.s32.totalorder %s286_s29, %s2122_s14  ;;  %p2130_p5 = scmp.lt.s32.totalorder %s286_s29, %s286_s29 }
  0x63   : > { %p2131_p6 = scmp.lt.s32.totalorder %s2129_s15, %s2122_s14 }
  0x64   : > { %p2125_p3 = pnand %p2123_p0, %p2276_p2 }
  0x65   : > { %p2132_p7 = por %p2131_p6, %p2130_p5 }
  0x66   : > { %p2126_p4 = pneg %p2125_p3 }
  0x68   : > { %p2133_p8 = pnand %p2132_p7, %p2126_p4 }
  0x6a   : > { %2136 = shalt.err (!%p2133_p8)
}
  0x6b   : > { %1909 = dma.hbm_to_vmem [thread:$0]  (!%p2268_p1), %s3055_s7, 16, %s286_s29, [#allocation16]  }
  0x6c   : > { %p3068_p9 = scmp.ne.s32.totalorder %s3063_s22, 0 }
  0x6d   : > { %p3069_p12 = scmp.eq.s32.totalorder (!%p3068_p9), %s2250_s21, 0 }
  0x6e   : > { %301 = sbr.rel (%p3068_p9) target bundleno = 725 (0x2d5), region = 48 }
  0x73   : > { %2148 = dma.done.wait (%p3069_p12), [#allocation10], 1024   ;;  %p3070_p2 = pmov %p3069_p12 }
  0x75   : > { %2150 = vsyncadd (%p3070_p2), [#allocation10], 4294966272  ;;  %p3071_p13 = pmov %p3070_p2 }
  0x76   : > { %p3072_p10 = pmov %p3070_p2 }
  0x77   : > { %2152 = dma.done.wait (%p3071_p13), [#allocation9], 196736  }
  0x78   : > { %2154 = vsyncadd (%p3072_p10), [#allocation9], 4294770560  ;;  %p3073_p11 = pmov %p3070_p2 }
  0x79   : > { %p3074_p1 = pmov %p3070_p2 }
  0x7a   : > { %2156 = dma.done.wait (%p3073_p11), [#allocation13], 80  }
  0x7b   : > { %2158 = vsyncadd (%p3074_p1), [#allocation13], 4294967216  ;;  %p3075_p0 = pmov %p3074_p1 }
  0x7d   : > { %2160 = dma.done.wait (%p3075_p0), [#allocation16], 32   ;;  %p3076_p3 = pmov %p3075_p0 }
  0x7f   : > { %2162 = vsyncadd (%p3076_p3), [#allocation16], 4294967264 }
  0x80   : > { %327 = sfence }
  0x81   : > { %s1822_s22 = sshll.u32 %s2250_s21, 2  ;;  %s2345_s28 = sshll.u32 %s2250_s21, 5  ;;  %v2181_v1 = vmov 0.0  }
  0x82   : > { %p350_p4 = scmp.lt.s32.totalorder %s1822_s22, 7  ;;  %387 = vst [vmem:[#allocation2] sm:$0xff] %v2181_v1  ;;  %388 = vst [vmem:[#allocation2 + $0x8] sm:$0xff] %v2181_v1  ;;  %s2383_s14 = smov 0  }
  0x83   : > { %389 = vst [vmem:[#allocation2 + $0x10] sm:$0xff] %v2181_v1  ;;  %390 = vst [vmem:[#allocation2 + $0x18] sm:$0xff] %v2181_v1 }
  0x84   : > { %391 = vst [vmem:[#allocation3] sm:$0xff] %v2181_v1  ;;  %392 = vst [vmem:[#allocation3 + $0x8] sm:$0xff] %v2181_v1  ;;  %s3109_s22 = smov (!%p350_p4, %s1822_s22), 7 }
  0x85   : > { %393 = vst [vmem:[#allocation3 + $0x10] sm:$0xff] %v2181_v1  ;;  %394 = vst [vmem:[#allocation3 + $0x18] sm:$0xff] %v2181_v1  ;;  %s1823_s19 = sshll.u32 %s3109_s22, 3 }
  0x86   : > { %s2356_s25 = scalar_lea.vmem %s3056_s9, %s1823_s19 }
  0x87 LB: >> { %s2389_s26 = sshra.s32 %s2169_s14, 7  ;;  %s2392_s0 = sand.u32 127, %s2169_s14  ;;  %s2169_s14 = sphi %s2383_s14, %s400_s14  }
  0x88   : >> { %s403_s30 = sadd.s32 %s2345_s28, %s2389_s26  ;;  %s3077_s10 = sadd.s32 1, %s2345_s28 }
  0x89   : >> { %s434_s1 = sadd.s32 %s2389_s26, %s3077_s10  ;;  %s1825_s13 = sshll.u32 %s403_s30, 7  ;;  %v417_v6 = vld [vmem:[#allocation2] sm:$0x1]  ;;  %v446_v18 = vld [vmem:[#allocation2 + $0x1] sm:$0x1] }
  0x8a   : >> { %s1826_s20 = sshll.u32 %s434_s1, 7  ;;  %s407_s12 = sadd.s32 %s1825_s13, %s2392_s0  ;;  %v475_v32 = vld [vmem:[#allocation2 + $0x2] sm:$0x1]  ;;  %v504_v44 = vld [vmem:[#allocation2 + $0x3] sm:$0x1] }
  0x8b   : >> { %s436_s11 = sadd.s32 %s1826_s20, %s2392_s0  ;;  %s2401_s27 = sld [smem:[#allocation8 + %s407_s12]]  ;;  %v430_v11 = vld [vmem:[#allocation3] sm:$0x1]  ;;  %v459_v24 = vld [vmem:[#allocation3 + $0x1] sm:$0x1] }
  0x8c   : >> { %s3078_s21 = sadd.s32 2, %s2345_s28  ;;  %s409_s24 = sld [smem:[#allocation5 + %s407_s12]]  ;;  %v488_v37 = vld [vmem:[#allocation3 + $0x2] sm:$0x1]  ;;  %v517_v50 = vld [vmem:[#allocation3 + $0x3] sm:$0x1] }
  0x8d   : >> { %s463_s29 = sadd.s32 %s2389_s26, %s3078_s21  ;;  %s422_s19 = sld [smem:[#allocation6 + %s407_s12]]  ;;  %v533_v58 = vld [vmem:[#allocation2 + $0x4] sm:$0x1] }
  0x8e   : >> { %s1827_s23 = sshll.u32 %s463_s29, 7  ;;  %s2409_s17 = sld [smem:[#allocation8 + %s436_s11]]  ;;  %v546_v63 = vld [vmem:[#allocation3 + $0x4] sm:$0x1] }
  0x8f   : >> { %s2407_s22 = sadd.s32 %s1827_s23, %s2392_s0  ;;  %s3079_s18 = sadd.s32 3, %s2345_s28 }
  0x90   : >> { %s492_s30 = sadd.s32 %s2389_s26, %s3079_s18  ;;  %s438_s1 = sld [smem:[#allocation5 + %s436_s11]] }
  0x91   : >> { %s1828_s10 = sshll.u32 %s492_s30, 7  ;;  %s2414_s16 = sld [smem:[#allocation6 + %s436_s11]]  ;;  %v418_v4 = vstv %s2401_s27 }
  0x92   : >> { %s2417_s20 = sadd.s32 %s1828_s10, %s2392_s0  ;;  %s2420_s13 = sld [smem:[#allocation8 + %s2407_s22]] }
  0x93   : >> { %s3080_s21 = sadd.s32 4, %s2345_s28  ;;  %s410_s29 = sshra.s32 %s409_s24, 2 }
  0x94   : >> { %s2425_s15 = sadd.s32 %s2389_s26, %s3080_s21  ;;  %s411_s12 = sand.u32 3, %s409_s24  ;;  %v447_v14 = vstv %s2409_s17 }
  0x95   : >> { %s412_s23 = scalar_lea.vmem [#allocation11], %s410_s29  ;;  %s414_s2 = scalar_lea.vmem [#allocation12], %s411_s12 }
  0x96   : >> { %v413_v2 = vld [vmem:[%s412_s23] sm:$0x1]  ;;  %s423_s3 = sshra.s32 %s422_s19, 2  ;;  %s424_s18 = sand.u32 3, %s422_s19 }
  0x97   : >> { %v415_v3 = vld [vmem:[%s414_s2] sm:$0x1]  ;;  %s425_s10 = scalar_lea.vmem [#allocation11], %s423_s3  ;;  %s427_s11 = scalar_lea.vmem [#allocation12], %s424_s18 }
  0x98   : >> { %v416_v5 = vmul.f32 %v415_v3, %v413_v2  ;;  %v426_v7 = vld [vmem:[%s425_s10] sm:$0x1]  ;;  %s439_s21 = sshra.s32 %s438_s1, 2  ;;  %s440_s30 = sand.u32 3, %s438_s1  ;;  %v476_v30 = vstv %s2420_s13 }
  0x99   : >> { %v428_v8 = vld [vmem:[%s427_s11] sm:$0x1]  ;;  %s441_s24 = scalar_lea.vmem [#allocation11], %s439_s21  ;;  %s443_s2 = scalar_lea.vmem [#allocation12], %s440_s30 }
  0x9a   : >> { %v419_v9 = vmul.f32 %v418_v4, %v416_v5  ;;  %v429_v10 = vmul.f32 %v428_v8, %v426_v7  ;;  %v442_v12 = vld [vmem:[%s441_s24] sm:$0x1]  ;;  %s452_s27 = sshra.s32 %s2414_s16, 2  ;;  %s453_s19 = sand.u32 3, %s2414_s16 }
  0x9b   : >> { %v444_v13 = vld [vmem:[%s443_s2] sm:$0x1]  ;;  %s454_s3 = scalar_lea.vmem [#allocation11], %s452_s27  ;;  %s456_s18 = scalar_lea.vmem [#allocation12], %s453_s19 }
  0x9c   : >> { %v420_v15 = vadd.f32 %v419_v9, %v417_v6  ;;  %v431_v16 = vmul.f32 %v429_v10, %v418_v4  ;;  %v445_v17 = vmul.f32 %v444_v13, %v442_v12  ;;  %v455_v19 = vld [vmem:[%s454_s3] sm:$0x1]  ;;  %s467_s1 = sld [smem:[#allocation5 + %s2407_s22]]  ;;  %s1829_s29 = sshll.u32 %s2425_s15, 7  ;;  %v562_v6 = vld [vmem:[#allocation2 + $0x5] sm:$0x1] }
  0x9d   : >> { %v457_v20 = vld [vmem:[%s456_s18] sm:$0x1]  ;;  %s2434_s16 = sld [smem:[#allocation6 + %s2407_s22]]  ;;  %s2437_s17 = sadd.s32 %s1829_s29, %s2392_s0  ;;  %v575_v12 = vld [vmem:[#allocation3 + $0x5] sm:$0x1] }
  0x9e   : >> { %421 = vst [vmem:[#allocation2] sm:$0x1] %v420_v15  ;;  %v432_v21 = vadd.f32 %v431_v16, %v430_v11  ;;  %v448_v22 = vmul.f32 %v447_v14, %v445_v17  ;;  %v458_v23 = vmul.f32 %v457_v20, %v455_v19  ;;  %s2440_s12 = sld [smem:[#allocation8 + %s2417_s20]]  ;;  %s3081_s23 = sadd.s32 5, %s2345_s28  ;;  %v591_v20 = vld [vmem:[#allocation2 + $0x6] sm:$0x1] }
  0x9f   : >> { %s550_s10 = sadd.s32 %s2389_s26, %s3081_s23  ;;  %s2446_s15 = sld [smem:[#allocation5 + %s2417_s20]] }
  0xa0   : >> { %433 = vst [vmem:[#allocation3] sm:$0x1] %v432_v21  ;;  %v449_v25 = vadd.f32 %v448_v22, %v446_v18  ;;  %v460_v26 = vmul.f32 %v458_v23, %v447_v14  ;;  %s1830_s11 = sshll.u32 %s550_s10, 7  ;;  %s2449_s21 = sld [smem:[#allocation6 + %s2417_s20]] }
  0xa1   : >> { %s2452_s22 = sadd.s32 %s1830_s11, %s2392_s0  ;;  %s2455_s30 = sld [smem:[#allocation8 + %s2437_s17]] }
  0xa2   : >> { %450 = vst [vmem:[#allocation2 + $0x1] sm:$0x1] %v449_v25  ;;  %v461_v27 = vadd.f32 %v460_v26, %v459_v24  ;;  %s3082_s24 = sadd.s32 6, %s2345_s28  ;;  %s468_s27 = sshra.s32 %s467_s1, 2  ;;  %v604_v25 = vld [vmem:[#allocation3 + $0x6] sm:$0x1] }
  0xa3   : >> { %s2460_s2 = sadd.s32 %s2389_s26, %s3082_s24  ;;  %s469_s19 = sand.u32 3, %s467_s1 }
  0xa4   : >> { %462 = vst [vmem:[#allocation3 + $0x1] sm:$0x1] %v461_v27  ;;  %s470_s3 = scalar_lea.vmem [#allocation11], %s468_s27  ;;  %s472_s18 = scalar_lea.vmem [#allocation12], %s469_s19  ;;  %v505_v40 = vstv %s2440_s12 }
  0xa5   : >> { %v471_v28 = vld [vmem:[%s470_s3] sm:$0x1]  ;;  %s481_s20 = sshra.s32 %s2434_s16, 2  ;;  %s482_s29 = sand.u32 3, %s2434_s16 }
  0xa6   : >> { %v473_v29 = vld [vmem:[%s472_s18] sm:$0x1]  ;;  %s483_s23 = scalar_lea.vmem [#allocation11], %s481_s20  ;;  %s485_s10 = scalar_lea.vmem [#allocation12], %s482_s29 }
  0xa7   : >> { %v474_v31 = vmul.f32 %v473_v29, %v471_v28  ;;  %v484_v33 = vld [vmem:[%s483_s23] sm:$0x1]  ;;  %s497_s11 = sshra.s32 %s2446_s15, 2  ;;  %s498_s1 = sand.u32 3, %s2446_s15  ;;  %v534_v56 = vstv %s2455_s30 }
  0xa8   : >> { %v486_v34 = vld [vmem:[%s485_s10] sm:$0x1]  ;;  %s499_s24 = scalar_lea.vmem [#allocation11], %s497_s11  ;;  %s501_s13 = scalar_lea.vmem [#allocation12], %s498_s1 }
  0xa9   : >> { %v477_v35 = vmul.f32 %v476_v30, %v474_v31  ;;  %v487_v36 = vmul.f32 %v486_v34, %v484_v33  ;;  %v500_v38 = vld [vmem:[%s499_s24] sm:$0x1]  ;;  %s510_s16 = sshra.s32 %s2449_s21, 2  ;;  %s511_s27 = sand.u32 3, %s2449_s21 }
  0xaa   : >> { %v502_v39 = vld [vmem:[%s501_s13] sm:$0x1]  ;;  %s512_s15 = scalar_lea.vmem [#allocation11], %s510_s16  ;;  %s514_s19 = scalar_lea.vmem [#allocation12], %s511_s27 }
  0xab   : >> { %v478_v41 = vadd.f32 %v477_v35, %v475_v32  ;;  %v489_v42 = vmul.f32 %v487_v36, %v476_v30  ;;  %v503_v43 = vmul.f32 %v502_v39, %v500_v38  ;;  %v513_v45 = vld [vmem:[%s512_s15] sm:$0x1]  ;;  %s525_s3 = sld [smem:[#allocation5 + %s2437_s17]]  ;;  %s1831_s18 = sshll.u32 %s2460_s2, 7  ;;  %v620_v32 = vld [vmem:[#allocation2 + $0x7] sm:$0x1] }
  0xac   : >> { %v515_v46 = vld [vmem:[%s514_s19] sm:$0x1]  ;;  %s2473_s12 = sld [smem:[#allocation6 + %s2437_s17]]  ;;  %s2476_s21 = sadd.s32 %s1831_s18, %s2392_s0  ;;  %v633_v38 = vld [vmem:[#allocation3 + $0x7] sm:$0x1] }
  0xad   : >> { %479 = vst [vmem:[#allocation2 + $0x2] sm:$0x1] %v478_v41  ;;  %v490_v47 = vadd.f32 %v489_v42, %v488_v37  ;;  %v506_v48 = vmul.f32 %v505_v40, %v503_v43  ;;  %v516_v49 = vmul.f32 %v515_v46, %v513_v45  ;;  %s2479_s20 = sld [smem:[#allocation8 + %s2452_s22]]  ;;  %s3083_s29 = sadd.s32 7, %s2345_s28  ;;  %v649_v46 = vld [vmem:[#allocation2 + $0x8] sm:$0x1] }
  0xae   : >> { %s608_s23 = sadd.s32 %s2389_s26, %s3083_s29  ;;  %s2485_s2 = sld [smem:[#allocation5 + %s2452_s22]] }
  0xaf   : >> { %491 = vst [vmem:[#allocation3 + $0x2] sm:$0x1] %v490_v47  ;;  %v507_v51 = vadd.f32 %v506_v48, %v504_v44  ;;  %v518_v52 = vmul.f32 %v516_v49, %v505_v40  ;;  %s1832_s10 = sshll.u32 %s608_s23, 7  ;;  %s2488_s11 = sld [smem:[#allocation6 + %s2452_s22]] }
  0xb0   : >> { %s2491_s17 = sadd.s32 %s1832_s10, %s2392_s0  ;;  %s2494_s1 = sld [smem:[#allocation8 + %s2476_s21]] }
  0xb1   : >> { %508 = vst [vmem:[#allocation2 + $0x3] sm:$0x1] %v507_v51  ;;  %v519_v53 = vadd.f32 %v518_v52, %v517_v50  ;;  %s3084_s24 = sadd.s32 8, %s2345_s28  ;;  %s526_s16 = sshra.s32 %s525_s3, 2  ;;  %v662_v51 = vld [vmem:[#allocation3 + $0x8] sm:$0x1] }
  0xb2   : >> { %s2499_s13 = sadd.s32 %s2389_s26, %s3084_s24  ;;  %s527_s27 = sand.u32 3, %s525_s3 }
  0xb3   : >> { %520 = vst [vmem:[#allocation3 + $0x3] sm:$0x1] %v519_v53  ;;  %s528_s15 = scalar_lea.vmem [#allocation11], %s526_s16  ;;  %s530_s19 = scalar_lea.vmem [#allocation12], %s527_s27  ;;  %v563_v2 = vstv %s2479_s20 }
  0xb4   : >> { %v529_v54 = vld [vmem:[%s528_s15] sm:$0x1]  ;;  %s539_s22 = sshra.s32 %s2473_s12, 2  ;;  %s540_s18 = sand.u32 3, %s2473_s12 }
  0xb5   : >> { %v531_v55 = vld [vmem:[%s530_s19] sm:$0x1]  ;;  %s541_s29 = scalar_lea.vmem [#allocation11], %s539_s22  ;;  %s543_s23 = scalar_lea.vmem [#allocation12], %s540_s18 }
  0xb6   : >> { %v532_v57 = vmul.f32 %v531_v55, %v529_v54  ;;  %v542_v59 = vld [vmem:[%s541_s29] sm:$0x1]  ;;  %s555_s10 = sshra.s32 %s2485_s2, 2  ;;  %s556_s3 = sand.u32 3, %s2485_s2  ;;  %v592_v18 = vstv %s2494_s1 }
  0xb7   : >> { %v544_v60 = vld [vmem:[%s543_s23] sm:$0x1]  ;;  %s557_s24 = scalar_lea.vmem [#allocation11], %s555_s10  ;;  %s559_s30 = scalar_lea.vmem [#allocation12], %s556_s3 }
  0xb8   : >> { %v535_v61 = vmul.f32 %v534_v56, %v532_v57  ;;  %v545_v62 = vmul.f32 %v544_v60, %v542_v59  ;;  %v558_v0 = vld [vmem:[%s557_s24] sm:$0x1]  ;;  %s568_s12 = sshra.s32 %s2488_s11, 2  ;;  %s569_s16 = sand.u32 3, %s2488_s11 }
  0xb9   : >> { %v560_v1 = vld [vmem:[%s559_s30] sm:$0x1]  ;;  %s570_s2 = scalar_lea.vmem [#allocation11], %s568_s12  ;;  %s572_s27 = scalar_lea.vmem [#allocation12], %s569_s16 }
  0xba   : >> { %v536_v3 = vadd.f32 %v535_v61, %v533_v58  ;;  %v547_v4 = vmul.f32 %v545_v62, %v534_v56  ;;  %v561_v5 = vmul.f32 %v560_v1, %v558_v0  ;;  %v571_v7 = vld [vmem:[%s570_s2] sm:$0x1]  ;;  %s583_s15 = sld [smem:[#allocation5 + %s2476_s21]]  ;;  %s1833_s19 = sshll.u32 %s2499_s13, 7  ;;  %v678_v58 = vld [vmem:[#allocation2 + $0x9] sm:$0x1] }
  0xbb   : >> { %v573_v8 = vld [vmem:[%s572_s27] sm:$0x1]  ;;  %s2512_s20 = sld [smem:[#allocation6 + %s2476_s21]]  ;;  %s2515_s11 = sadd.s32 %s1833_s19, %s2392_s0  ;;  %v691_v0 = vld [vmem:[#allocation3 + $0x9] sm:$0x1] }
  0xbc   : >> { %537 = vst [vmem:[#allocation2 + $0x4] sm:$0x1] %v536_v3  ;;  %v548_v9 = vadd.f32 %v547_v4, %v546_v63  ;;  %v564_v10 = vmul.f32 %v563_v2, %v561_v5  ;;  %v574_v11 = vmul.f32 %v573_v8, %v571_v7  ;;  %s2518_s22 = sld [smem:[#allocation8 + %s2491_s17]]  ;;  %s3085_s18 = sadd.s32 9, %s2345_s28  ;;  %v707_v8 = vld [vmem:[#allocation2 + $0xa] sm:$0x1] }
  0xbd   : >> { %s666_s29 = sadd.s32 %s2389_s26, %s3085_s18  ;;  %s2524_s13 = sld [smem:[#allocation5 + %s2491_s17]] }
  0xbe   : >> { %549 = vst [vmem:[#allocation3 + $0x4] sm:$0x1] %v548_v9  ;;  %v565_v13 = vadd.f32 %v564_v10, %v562_v6  ;;  %v576_v14 = vmul.f32 %v574_v11, %v563_v2  ;;  %s1834_s23 = sshll.u32 %s666_s29, 7  ;;  %s2527_s10 = sld [smem:[#allocation6 + %s2491_s17]] }
  0xbf   : >> { %s2530_s21 = sadd.s32 %s1834_s23, %s2392_s0  ;;  %s2533_s3 = sld [smem:[#allocation8 + %s2515_s11]] }
  0xc0   : >> { %566 = vst [vmem:[#allocation2 + $0x5] sm:$0x1] %v565_v13  ;;  %v577_v15 = vadd.f32 %v576_v14, %v575_v12  ;;  %s3086_s24 = sadd.s32 10, %s2345_s28  ;;  %s584_s12 = sshra.s32 %s583_s15, 2  ;;  %v720_v13 = vld [vmem:[#allocation3 + $0xa] sm:$0x1] }
  0xc1   : >> { %s2538_s30 = sadd.s32 %s2389_s26, %s3086_s24  ;;  %s585_s16 = sand.u32 3, %s583_s15 }
  0xc2   : >> { %578 = vst [vmem:[#allocation3 + $0x5] sm:$0x1] %v577_v15  ;;  %s586_s2 = scalar_lea.vmem [#allocation11], %s584_s12  ;;  %s588_s27 = scalar_lea.vmem [#allocation12], %s585_s16  ;;  %v621_v28 = vstv %s2518_s22 }
  0xc3   : >> { %v587_v16 = vld [vmem:[%s586_s2] sm:$0x1]  ;;  %s597_s17 = sshra.s32 %s2512_s20, 2  ;;  %s598_s19 = sand.u32 3, %s2512_s20 }
  0xc4   : >> { %v589_v17 = vld [vmem:[%s588_s27] sm:$0x1]  ;;  %s599_s18 = scalar_lea.vmem [#allocation11], %s597_s17  ;;  %s601_s29 = scalar_lea.vmem [#allocation12], %s598_s19 }
  0xc5   : >> { %v590_v19 = vmul.f32 %v589_v17, %v587_v16  ;;  %v600_v21 = vld [vmem:[%s599_s18] sm:$0x1]  ;;  %s613_s23 = sshra.s32 %s2524_s13, 2  ;;  %s614_s15 = sand.u32 3, %s2524_s13  ;;  %v650_v44 = vstv %s2533_s3 }
  0xc6   : >> { %v602_v22 = vld [vmem:[%s601_s29] sm:$0x1]  ;;  %s615_s24 = scalar_lea.vmem [#allocation11], %s613_s23  ;;  %s617_s1 = scalar_lea.vmem [#allocation12], %s614_s15 }
  0xc7   : >> { %v593_v23 = vmul.f32 %v592_v18, %v590_v19  ;;  %v603_v24 = vmul.f32 %v602_v22, %v600_v21  ;;  %v616_v26 = vld [vmem:[%s615_s24] sm:$0x1]  ;;  %s626_s20 = sshra.s32 %s2527_s10, 2  ;;  %s627_s12 = sand.u32 3, %s2527_s10 }
  0xc8   : >> { %v618_v27 = vld [vmem:[%s617_s1] sm:$0x1]  ;;  %s628_s13 = scalar_lea.vmem [#allocation11], %s626_s20  ;;  %s630_s16 = scalar_lea.vmem [#allocation12], %s627_s12 }
  0xc9   : >> { %v594_v29 = vadd.f32 %v593_v23, %v591_v20  ;;  %v605_v30 = vmul.f32 %v603_v24, %v592_v18  ;;  %v619_v31 = vmul.f32 %v618_v27, %v616_v26  ;;  %v629_v33 = vld [vmem:[%s628_s13] sm:$0x1]  ;;  %s641_s2 = sld [smem:[#allocation5 + %s2515_s11]]  ;;  %s1835_s27 = sshll.u32 %s2538_s30, 7  ;;  %v736_v20 = vld [vmem:[#allocation2 + $0xb] sm:$0x1] }
  0xca   : >> { %v631_v34 = vld [vmem:[%s630_s16] sm:$0x1]  ;;  %s2551_s22 = sld [smem:[#allocation6 + %s2515_s11]]  ;;  %s2554_s10 = sadd.s32 %s1835_s27, %s2392_s0  ;;  %v749_v26 = vld [vmem:[#allocation3 + $0xb] sm:$0x1] }
  0xcb   : >> { %595 = vst [vmem:[#allocation2 + $0x6] sm:$0x1] %v594_v29  ;;  %v606_v35 = vadd.f32 %v605_v30, %v604_v25  ;;  %v622_v36 = vmul.f32 %v621_v28, %v619_v31  ;;  %v632_v37 = vmul.f32 %v631_v34, %v629_v33  ;;  %s2557_s17 = sld [smem:[#allocation8 + %s2530_s21]]  ;;  %s3087_s19 = sadd.s32 11, %s2345_s28  ;;  %v765_v34 = vld [vmem:[#allocation2 + $0xc] sm:$0x1] }
  0xcc   : >> { %s724_s18 = sadd.s32 %s2389_s26, %s3087_s19  ;;  %s2563_s30 = sld [smem:[#allocation5 + %s2530_s21]] }
  0xcd   : >> { %607 = vst [vmem:[#allocation3 + $0x6] sm:$0x1] %v606_v35  ;;  %v623_v39 = vadd.f32 %v622_v36, %v620_v32  ;;  %v634_v40 = vmul.f32 %v632_v37, %v621_v28  ;;  %s1836_s29 = sshll.u32 %s724_s18, 7  ;;  %s2566_s23 = sld [smem:[#allocation6 + %s2530_s21]] }
  0xce   : >> { %s2569_s11 = sadd.s32 %s1836_s29, %s2392_s0  ;;  %s2572_s15 = sld [smem:[#allocation8 + %s2554_s10]] }
  0xcf   : >> { %624 = vst [vmem:[#allocation2 + $0x7] sm:$0x1] %v623_v39  ;;  %v635_v41 = vadd.f32 %v634_v40, %v633_v38  ;;  %s3088_s24 = sadd.s32 12, %s2345_s28  ;;  %s642_s20 = sshra.s32 %s641_s2, 2  ;;  %v778_v39 = vld [vmem:[#allocation3 + $0xc] sm:$0x1] }
  0xd0   : >> { %s2577_s1 = sadd.s32 %s2389_s26, %s3088_s24  ;;  %s643_s12 = sand.u32 3, %s641_s2 }
  0xd1   : >> { %636 = vst [vmem:[#allocation3 + $0x7] sm:$0x1] %v635_v41  ;;  %s644_s13 = scalar_lea.vmem [#allocation11], %s642_s20  ;;  %s646_s16 = scalar_lea.vmem [#allocation12], %s643_s12  ;;  %v679_v54 = vstv %s2557_s17 }
  0xd2   : >> { %v645_v42 = vld [vmem:[%s644_s13] sm:$0x1]  ;;  %s655_s21 = sshra.s32 %s2551_s22, 2  ;;  %s656_s27 = sand.u32 3, %s2551_s22 }
  0xd3   : >> { %v647_v43 = vld [vmem:[%s646_s16] sm:$0x1]  ;;  %s657_s19 = scalar_lea.vmem [#allocation11], %s655_s21  ;;  %s659_s18 = scalar_lea.vmem [#allocation12], %s656_s27 }
  0xd4   : >> { %v648_v45 = vmul.f32 %v647_v43, %v645_v42  ;;  %v658_v47 = vld [vmem:[%s657_s19] sm:$0x1]  ;;  %s671_s29 = sshra.s32 %s2563_s30, 2  ;;  %s672_s2 = sand.u32 3, %s2563_s30  ;;  %v708_v6 = vstv %s2572_s15 }
  0xd5   : >> { %v660_v48 = vld [vmem:[%s659_s18] sm:$0x1]  ;;  %s673_s24 = scalar_lea.vmem [#allocation11], %s671_s29  ;;  %s675_s3 = scalar_lea.vmem [#allocation12], %s672_s2 }
  0xd6   : >> { %v651_v49 = vmul.f32 %v650_v44, %v648_v45  ;;  %v661_v50 = vmul.f32 %v660_v48, %v658_v47  ;;  %v674_v52 = vld [vmem:[%s673_s24] sm:$0x1]  ;;  %s684_s22 = sshra.s32 %s2566_s23, 2  ;;  %s685_s20 = sand.u32 3, %s2566_s23 }
  0xd7   : >> { %v676_v53 = vld [vmem:[%s675_s3] sm:$0x1]  ;;  %s686_s30 = scalar_lea.vmem [#allocation11], %s684_s22  ;;  %s688_s12 = scalar_lea.vmem [#allocation12], %s685_s20 }
  0xd8   : >> { %v652_v55 = vadd.f32 %v651_v49, %v649_v46  ;;  %v663_v56 = vmul.f32 %v661_v50, %v650_v44  ;;  %v677_v57 = vmul.f32 %v676_v53, %v674_v52  ;;  %v687_v59 = vld [vmem:[%s686_s30] sm:$0x1]  ;;  %s699_s13 = sld [smem:[#allocation5 + %s2554_s10]]  ;;  %s1837_s16 = sshll.u32 %s2577_s1, 7  ;;  %v794_v46 = vld [vmem:[#allocation2 + $0xd] sm:$0x1] }
  0xd9   : >> { %v689_v60 = vld [vmem:[%s688_s12] sm:$0x1]  ;;  %s2590_s17 = sld [smem:[#allocation6 + %s2554_s10]]  ;;  %s2593_s23 = sadd.s32 %s1837_s16, %s2392_s0  ;;  %v807_v52 = vld [vmem:[#allocation3 + $0xd] sm:$0x1] }
  0xda   : >> { %653 = vst [vmem:[#allocation2 + $0x8] sm:$0x1] %v652_v55  ;;  %v664_v61 = vadd.f32 %v663_v56, %v662_v51  ;;  %v680_v62 = vmul.f32 %v679_v54, %v677_v57  ;;  %v690_v63 = vmul.f32 %v689_v60, %v687_v59  ;;  %s2596_s21 = sld [smem:[#allocation8 + %s2569_s11]]  ;;  %s3089_s27 = sadd.s32 13, %s2345_s28  ;;  %v823_v60 = vld [vmem:[#allocation2 + $0xe] sm:$0x1] }
  0xdb   : >> { %s782_s19 = sadd.s32 %s2389_s26, %s3089_s27  ;;  %s2602_s1 = sld [smem:[#allocation5 + %s2569_s11]] }
  0xdc   : >> { %665 = vst [vmem:[#allocation3 + $0x8] sm:$0x1] %v664_v61  ;;  %v681_v1 = vadd.f32 %v680_v62, %v678_v58  ;;  %v692_v2 = vmul.f32 %v690_v63, %v679_v54  ;;  %s1838_s18 = sshll.u32 %s782_s19, 7  ;;  %s2605_s29 = sld [smem:[#allocation6 + %s2569_s11]] }
  0xdd   : >> { %s2608_s10 = sadd.s32 %s1838_s18, %s2392_s0  ;;  %s2611_s2 = sld [smem:[#allocation8 + %s2593_s23]] }
  0xde   : >> { %682 = vst [vmem:[#allocation2 + $0x9] sm:$0x1] %v681_v1  ;;  %v693_v3 = vadd.f32 %v692_v2, %v691_v0  ;;  %s3090_s24 = sadd.s32 14, %s2345_s28  ;;  %s700_s22 = sshra.s32 %s699_s13, 2  ;;  %v836_v1 = vld [vmem:[#allocation3 + $0xe] sm:$0x1] }
  0xdf   : >> { %s2616_s3 = sadd.s32 %s2389_s26, %s3090_s24  ;;  %s701_s20 = sand.u32 3, %s699_s13 }
  0xe0   : >> { %694 = vst [vmem:[#allocation3 + $0x9] sm:$0x1] %v693_v3  ;;  %s702_s30 = scalar_lea.vmem [#allocation11], %s700_s22  ;;  %s704_s12 = scalar_lea.vmem [#allocation12], %s701_s20  ;;  %v737_v16 = vstv %s2596_s21 }
  0xe1   : >> { %v703_v4 = vld [vmem:[%s702_s30] sm:$0x1]  ;;  %s713_s11 = sshra.s32 %s2590_s17, 2  ;;  %s714_s16 = sand.u32 3, %s2590_s17 }
  0xe2   : >> { %v705_v5 = vld [vmem:[%s704_s12] sm:$0x1]  ;;  %s715_s27 = scalar_lea.vmem [#allocation11], %s713_s11  ;;  %s717_s19 = scalar_lea.vmem [#allocation12], %s714_s16 }
  0xe3   : >> { %v706_v7 = vmul.f32 %v705_v5, %v703_v4  ;;  %v716_v9 = vld [vmem:[%s715_s27] sm:$0x1]  ;;  %s729_s18 = sshra.s32 %s2602_s1, 2  ;;  %s730_s13 = sand.u32 3, %s2602_s1  ;;  %v766_v32 = vstv %s2611_s2 }
  0xe4   : >> { %v718_v10 = vld [vmem:[%s717_s19] sm:$0x1]  ;;  %s731_s24 = scalar_lea.vmem [#allocation11], %s729_s18  ;;  %s733_s15 = scalar_lea.vmem [#allocation12], %s730_s13 }
  0xe5   : >> { %v709_v11 = vmul.f32 %v708_v6, %v706_v7  ;;  %v719_v12 = vmul.f32 %v718_v10, %v716_v9  ;;  %v732_v14 = vld [vmem:[%s731_s24] sm:$0x1]  ;;  %s742_s17 = sshra.s32 %s2605_s29, 2  ;;  %s743_s22 = sand.u32 3, %s2605_s29 }
  0xe6   : >> { %v734_v15 = vld [vmem:[%s733_s15] sm:$0x1]  ;;  %s744_s1 = scalar_lea.vmem [#allocation11], %s742_s17  ;;  %s746_s20 = scalar_lea.vmem [#allocation12], %s743_s22 }
  0xe7   : >> { %v710_v17 = vadd.f32 %v709_v11, %v707_v8  ;;  %v721_v18 = vmul.f32 %v719_v12, %v708_v6  ;;  %v735_v19 = vmul.f32 %v734_v15, %v732_v14  ;;  %v745_v21 = vld [vmem:[%s744_s1] sm:$0x1]  ;;  %s757_s30 = sld [smem:[#allocation5 + %s2593_s23]]  ;;  %s1839_s12 = sshll.u32 %s2616_s3, 7  ;;  %v852_v8 = vld [vmem:[#allocation2 + $0xf] sm:$0x1] }
  0xe8   : >> { %v747_v22 = vld [vmem:[%s746_s20] sm:$0x1]  ;;  %s2629_s21 = sld [smem:[#allocation6 + %s2593_s23]]  ;;  %s2632_s29 = sadd.s32 %s1839_s12, %s2392_s0  ;;  %v865_v14 = vld [vmem:[#allocation3 + $0xf] sm:$0x1] }
  0xe9   : >> { %711 = vst [vmem:[#allocation2 + $0xa] sm:$0x1] %v710_v17  ;;  %v722_v23 = vadd.f32 %v721_v18, %v720_v13  ;;  %v738_v24 = vmul.f32 %v737_v16, %v735_v19  ;;  %v748_v25 = vmul.f32 %v747_v22, %v745_v21  ;;  %s2635_s11 = sld [smem:[#allocation8 + %s2608_s10]]  ;;  %s3091_s16 = sadd.s32 15, %s2345_s28  ;;  %v881_v22 = vld [vmem:[#allocation2 + $0x10] sm:$0x1] }
  0xea   : >> { %s840_s27 = sadd.s32 %s2389_s26, %s3091_s16  ;;  %s2641_s3 = sld [smem:[#allocation5 + %s2608_s10]] }
  0xeb   : >> { %723 = vst [vmem:[#allocation3 + $0xa] sm:$0x1] %v722_v23  ;;  %v739_v27 = vadd.f32 %v738_v24, %v736_v20  ;;  %v750_v28 = vmul.f32 %v748_v25, %v737_v16  ;;  %s1840_s19 = sshll.u32 %s840_s27, 7  ;;  %s2644_s18 = sld [smem:[#allocation6 + %s2608_s10]] }
  0xec   : >> { %s2647_s23 = sadd.s32 %s1840_s19, %s2392_s0  ;;  %s2650_s13 = sld [smem:[#allocation8 + %s2632_s29]] }
  0xed   : >> { %740 = vst [vmem:[#allocation2 + $0xb] sm:$0x1] %v739_v27  ;;  %v751_v29 = vadd.f32 %v750_v28, %v749_v26  ;;  %s3092_s24 = sadd.s32 16, %s2345_s28  ;;  %s758_s17 = sshra.s32 %s757_s30, 2  ;;  %v894_v27 = vld [vmem:[#allocation3 + $0x10] sm:$0x1] }
  0xee   : >> { %s2655_s15 = sadd.s32 %s2389_s26, %s3092_s24  ;;  %s759_s22 = sand.u32 3, %s757_s30 }
  0xef   : >> { %752 = vst [vmem:[#allocation3 + $0xb] sm:$0x1] %v751_v29  ;;  %s760_s1 = scalar_lea.vmem [#allocation11], %s758_s17  ;;  %s762_s20 = scalar_lea.vmem [#allocation12], %s759_s22  ;;  %v795_v42 = vstv %s2635_s11 }
  0xf0   : >> { %v761_v30 = vld [vmem:[%s760_s1] sm:$0x1]  ;;  %s771_s10 = sshra.s32 %s2629_s21, 2  ;;  %s772_s12 = sand.u32 3, %s2629_s21 }
  0xf1   : >> { %v763_v31 = vld [vmem:[%s762_s20] sm:$0x1]  ;;  %s773_s16 = scalar_lea.vmem [#allocation11], %s771_s10  ;;  %s775_s27 = scalar_lea.vmem [#allocation12], %s772_s12 }
  0xf2   : >> { %v764_v33 = vmul.f32 %v763_v31, %v761_v30  ;;  %v774_v35 = vld [vmem:[%s773_s16] sm:$0x1]  ;;  %s787_s19 = sshra.s32 %s2641_s3, 2  ;;  %s788_s30 = sand.u32 3, %s2641_s3  ;;  %v824_v58 = vstv %s2650_s13 }
  0xf3   : >> { %v776_v36 = vld [vmem:[%s775_s27] sm:$0x1]  ;;  %s789_s24 = scalar_lea.vmem [#allocation11], %s787_s19  ;;  %s791_s2 = scalar_lea.vmem [#allocation12], %s788_s30 }
  0xf4   : >> { %v767_v37 = vmul.f32 %v766_v32, %v764_v33  ;;  %v777_v38 = vmul.f32 %v776_v36, %v774_v35  ;;  %v790_v40 = vld [vmem:[%s789_s24] sm:$0x1]  ;;  %s800_s21 = sshra.s32 %s2644_s18, 2  ;;  %s801_s17 = sand.u32 3, %s2644_s18 }
  0xf5   : >> { %v792_v41 = vld [vmem:[%s791_s2] sm:$0x1]  ;;  %s802_s3 = scalar_lea.vmem [#allocation11], %s800_s21  ;;  %s804_s22 = scalar_lea.vmem [#allocation12], %s801_s17 }
  0xf6   : >> { %v768_v43 = vadd.f32 %v767_v37, %v765_v34  ;;  %v779_v44 = vmul.f32 %v777_v38, %v766_v32  ;;  %v793_v45 = vmul.f32 %v792_v41, %v790_v40  ;;  %v803_v47 = vld [vmem:[%s802_s3] sm:$0x1]  ;;  %s815_s1 = sld [smem:[#allocation5 + %s2632_s29]]  ;;  %s1841_s20 = sshll.u32 %s2655_s15, 7  ;;  %v910_v34 = vld [vmem:[#allocation2 + $0x11] sm:$0x1] }
  0xf7   : >> { %v805_v48 = vld [vmem:[%s804_s22] sm:$0x1]  ;;  %s2668_s11 = sld [smem:[#allocation6 + %s2632_s29]]  ;;  %s2671_s18 = sadd.s32 %s1841_s20, %s2392_s0  ;;  %v923_v40 = vld [vmem:[#allocation3 + $0x11] sm:$0x1] }
  0xf8   : >> { %769 = vst [vmem:[#allocation2 + $0xc] sm:$0x1] %v768_v43  ;;  %v780_v49 = vadd.f32 %v779_v44, %v778_v39  ;;  %v796_v50 = vmul.f32 %v795_v42, %v793_v45  ;;  %v806_v51 = vmul.f32 %v805_v48, %v803_v47  ;;  %s2674_s10 = sld [smem:[#allocation8 + %s2647_s23]]  ;;  %s3093_s12 = sadd.s32 17, %s2345_s28  ;;  %v939_v48 = vld [vmem:[#allocation2 + $0x12] sm:$0x1] }
  0xf9   : >> { %s898_s16 = sadd.s32 %s2389_s26, %s3093_s12  ;;  %s2680_s15 = sld [smem:[#allocation5 + %s2647_s23]] }
  0xfa   : >> { %781 = vst [vmem:[#allocation3 + $0xc] sm:$0x1] %v780_v49  ;;  %v797_v53 = vadd.f32 %v796_v50, %v794_v46  ;;  %v808_v54 = vmul.f32 %v806_v51, %v795_v42  ;;  %s1842_s27 = sshll.u32 %s898_s16, 7  ;;  %s2683_s19 = sld [smem:[#allocation6 + %s2647_s23]] }
  0xfb   : >> { %s2686_s29 = sadd.s32 %s1842_s27, %s2392_s0  ;;  %s2689_s30 = sld [smem:[#allocation8 + %s2671_s18]] }
  0xfc   : >> { %798 = vst [vmem:[#allocation2 + $0xd] sm:$0x1] %v797_v53  ;;  %v809_v55 = vadd.f32 %v808_v54, %v807_v52  ;;  %s3094_s24 = sadd.s32 18, %s2345_s28  ;;  %s816_s21 = sshra.s32 %s815_s1, 2  ;;  %v952_v53 = vld [vmem:[#allocation3 + $0x12] sm:$0x1] }
  0xfd   : >> { %s2694_s2 = sadd.s32 %s2389_s26, %s3094_s24  ;;  %s817_s17 = sand.u32 3, %s815_s1 }
  0xfe   : >> { %810 = vst [vmem:[#allocation3 + $0xd] sm:$0x1] %v809_v55  ;;  %s818_s3 = scalar_lea.vmem [#allocation11], %s816_s21  ;;  %s820_s22 = scalar_lea.vmem [#allocation12], %s817_s17  ;;  %v853_v4 = vstv %s2674_s10 }
  0xff   : >> { %v819_v56 = vld [vmem:[%s818_s3] sm:$0x1]  ;;  %s829_s23 = sshra.s32 %s2668_s11, 2  ;;  %s830_s20 = sand.u32 3, %s2668_s11 }
 0x100   : >> { %v821_v57 = vld [vmem:[%s820_s22] sm:$0x1]  ;;  %s831_s12 = scalar_lea.vmem [#allocation11], %s829_s23  ;;  %s833_s16 = scalar_lea.vmem [#allocation12], %s830_s20 }
 0x101   : >> { %v822_v59 = vmul.f32 %v821_v57, %v819_v56  ;;  %v832_v61 = vld [vmem:[%s831_s12] sm:$0x1]  ;;  %s845_s27 = sshra.s32 %s2680_s15, 2  ;;  %s846_s1 = sand.u32 3, %s2680_s15  ;;  %v882_v20 = vstv %s2689_s30 }
 0x102   : >> { %v834_v62 = vld [vmem:[%s833_s16] sm:$0x1]  ;;  %s847_s24 = scalar_lea.vmem [#allocation11], %s845_s27  ;;  %s849_s13 = scalar_lea.vmem [#allocation12], %s846_s1 }
 0x103   : >> { %v825_v63 = vmul.f32 %v824_v58, %v822_v59  ;;  %v835_v0 = vmul.f32 %v834_v62, %v832_v61  ;;  %v848_v2 = vld [vmem:[%s847_s24] sm:$0x1]  ;;  %s858_s11 = sshra.s32 %s2683_s19, 2  ;;  %s859_s21 = sand.u32 3, %s2683_s19 }
 0x104   : >> { %v850_v3 = vld [vmem:[%s849_s13] sm:$0x1]  ;;  %s860_s15 = scalar_lea.vmem [#allocation11], %s858_s11  ;;  %s862_s17 = scalar_lea.vmem [#allocation12], %s859_s21 }
 0x105   : >> { %v826_v5 = vadd.f32 %v825_v63, %v823_v60  ;;  %v837_v6 = vmul.f32 %v835_v0, %v824_v58  ;;  %v851_v7 = vmul.f32 %v850_v3, %v848_v2  ;;  %v861_v9 = vld [vmem:[%s860_s15] sm:$0x1]  ;;  %s873_s3 = sld [smem:[#allocation5 + %s2671_s18]]  ;;  %s1843_s22 = sshll.u32 %s2694_s2, 7  ;;  %v968_v60 = vld [vmem:[#allocation2 + $0x13] sm:$0x1] }
 0x106   : >> { %v863_v10 = vld [vmem:[%s862_s17] sm:$0x1]  ;;  %s2707_s10 = sld [smem:[#allocation6 + %s2671_s18]]  ;;  %s2710_s19 = sadd.s32 %s1843_s22, %s2392_s0  ;;  %v981_v2 = vld [vmem:[#allocation3 + $0x13] sm:$0x1] }
 0x107   : >> { %827 = vst [vmem:[#allocation2 + $0xe] sm:$0x1] %v826_v5  ;;  %v838_v11 = vadd.f32 %v837_v6, %v836_v1  ;;  %v854_v12 = vmul.f32 %v853_v4, %v851_v7  ;;  %v864_v13 = vmul.f32 %v863_v10, %v861_v9  ;;  %s2713_s23 = sld [smem:[#allocation8 + %s2686_s29]]  ;;  %s3095_s20 = sadd.s32 19, %s2345_s28  ;;  %v997_v10 = vld [vmem:[#allocation2 + $0x14] sm:$0x1] }
 0x108   : >> { %s956_s12 = sadd.s32 %s2389_s26, %s3095_s20  ;;  %s2719_s2 = sld [smem:[#allocation5 + %s2686_s29]] }
 0x109   : >> { %839 = vst [vmem:[#allocation3 + $0xe] sm:$0x1] %v838_v11  ;;  %v855_v15 = vadd.f32 %v854_v12, %v852_v8  ;;  %v866_v16 = vmul.f32 %v864_v13, %v853_v4  ;;  %s1844_s16 = sshll.u32 %s956_s12, 7  ;;  %s2722_s27 = sld [smem:[#allocation6 + %s2686_s29]] }
 0x10a   : >> { %s2725_s18 = sadd.s32 %s1844_s16, %s2392_s0  ;;  %s2728_s1 = sld [smem:[#allocation8 + %s2710_s19]] }
 0x10b   : >> { %856 = vst [vmem:[#allocation2 + $0xf] sm:$0x1] %v855_v15  ;;  %v867_v17 = vadd.f32 %v866_v16, %v865_v14  ;;  %s3096_s24 = sadd.s32 20, %s2345_s28  ;;  %s874_s11 = sshra.s32 %s873_s3, 2  ;;  %v1010_v15 = vld [vmem:[#allocation3 + $0x14] sm:$0x1] }
 0x10c   : >> { %s2733_s13 = sadd.s32 %s2389_s26, %s3096_s24  ;;  %s875_s21 = sand.u32 3, %s873_s3 }
 0x10d   : >> { %868 = vst [vmem:[#allocation3 + $0xf] sm:$0x1] %v867_v17  ;;  %s876_s15 = scalar_lea.vmem [#allocation11], %s874_s11  ;;  %s878_s17 = scalar_lea.vmem [#allocation12], %s875_s21  ;;  %v911_v30 = vstv %s2713_s23 }
 0x10e   : >> { %v877_v18 = vld [vmem:[%s876_s15] sm:$0x1]  ;;  %s887_s29 = sshra.s32 %s2707_s10, 2  ;;  %s888_s22 = sand.u32 3, %s2707_s10 }
 0x10f   : >> { %v879_v19 = vld [vmem:[%s878_s17] sm:$0x1]  ;;  %s889_s20 = scalar_lea.vmem [#allocation11], %s887_s29  ;;  %s891_s12 = scalar_lea.vmem [#allocation12], %s888_s22 }
 0x110   : >> { %v880_v21 = vmul.f32 %v879_v19, %v877_v18  ;;  %v890_v23 = vld [vmem:[%s889_s20] sm:$0x1]  ;;  %s903_s16 = sshra.s32 %s2719_s2, 2  ;;  %s904_s3 = sand.u32 3, %s2719_s2  ;;  %v940_v46 = vstv %s2728_s1 }
 0x111   : >> { %v892_v24 = vld [vmem:[%s891_s12] sm:$0x1]  ;;  %s905_s24 = scalar_lea.vmem [#allocation11], %s903_s16  ;;  %s907_s30 = scalar_lea.vmem [#allocation12], %s904_s3 }
 0x112   : >> { %v883_v25 = vmul.f32 %v882_v20, %v880_v21  ;;  %v893_v26 = vmul.f32 %v892_v24, %v890_v23  ;;  %v906_v28 = vld [vmem:[%s905_s24] sm:$0x1]  ;;  %s916_s10 = sshra.s32 %s2722_s27, 2  ;;  %s917_s11 = sand.u32 3, %s2722_s27 }
 0x113   : >> { %v908_v29 = vld [vmem:[%s907_s30] sm:$0x1]  ;;  %s918_s2 = scalar_lea.vmem [#allocation11], %s916_s10  ;;  %s920_s21 = scalar_lea.vmem [#allocation12], %s917_s11 }
 0x114   : >> { %v884_v31 = vadd.f32 %v883_v25, %v881_v22  ;;  %v895_v32 = vmul.f32 %v893_v26, %v882_v20  ;;  %v909_v33 = vmul.f32 %v908_v29, %v906_v28  ;;  %v919_v35 = vld [vmem:[%s918_s2] sm:$0x1]  ;;  %s931_s15 = sld [smem:[#allocation5 + %s2710_s19]]  ;;  %s1845_s17 = sshll.u32 %s2733_s13, 7  ;;  %v1026_v22 = vld [vmem:[#allocation2 + $0x15] sm:$0x1] }
 0x115   : >> { %v921_v36 = vld [vmem:[%s920_s21] sm:$0x1]  ;;  %s2746_s23 = sld [smem:[#allocation6 + %s2710_s19]]  ;;  %s2749_s27 = sadd.s32 %s1845_s17, %s2392_s0  ;;  %v1039_v28 = vld [vmem:[#allocation3 + $0x15] sm:$0x1] }
 0x116   : >> { %885 = vst [vmem:[#allocation2 + $0x10] sm:$0x1] %v884_v31  ;;  %v896_v37 = vadd.f32 %v895_v32, %v894_v27  ;;  %v912_v38 = vmul.f32 %v911_v30, %v909_v33  ;;  %v922_v39 = vmul.f32 %v921_v36, %v919_v35  ;;  %s2752_s29 = sld [smem:[#allocation8 + %s2725_s18]]  ;;  %s3097_s22 = sadd.s32 21, %s2345_s28  ;;  %v1055_v36 = vld [vmem:[#allocation2 + $0x16] sm:$0x1] }
 0x117   : >> { %s1014_s20 = sadd.s32 %s2389_s26, %s3097_s22  ;;  %s2758_s13 = sld [smem:[#allocation5 + %s2725_s18]] }
 0x118   : >> { %897 = vst [vmem:[#allocation3 + $0x10] sm:$0x1] %v896_v37  ;;  %v913_v41 = vadd.f32 %v912_v38, %v910_v34  ;;  %v924_v42 = vmul.f32 %v922_v39, %v911_v30  ;;  %s1846_s12 = sshll.u32 %s1014_s20, 7  ;;  %s2761_s16 = sld [smem:[#allocation6 + %s2725_s18]] }
 0x119   : >> { %s2764_s19 = sadd.s32 %s1846_s12, %s2392_s0  ;;  %s2767_s3 = sld [smem:[#allocation8 + %s2749_s27]] }
 0x11a   : >> { %914 = vst [vmem:[#allocation2 + $0x11] sm:$0x1] %v913_v41  ;;  %v925_v43 = vadd.f32 %v924_v42, %v923_v40  ;;  %s3098_s24 = sadd.s32 22, %s2345_s28  ;;  %s932_s10 = sshra.s32 %s931_s15, 2  ;;  %v1068_v41 = vld [vmem:[#allocation3 + $0x16] sm:$0x1] }
 0x11b   : >> { %s2772_s30 = sadd.s32 %s2389_s26, %s3098_s24  ;;  %s933_s11 = sand.u32 3, %s931_s15 }
 0x11c   : >> { %926 = vst [vmem:[#allocation3 + $0x11] sm:$0x1] %v925_v43  ;;  %s934_s2 = scalar_lea.vmem [#allocation11], %s932_s10  ;;  %s936_s21 = scalar_lea.vmem [#allocation12], %s933_s11  ;;  %v969_v56 = vstv %s2752_s29 }
 0x11d   : >> { %v935_v44 = vld [vmem:[%s934_s2] sm:$0x1]  ;;  %s945_s18 = sshra.s32 %s2746_s23, 2  ;;  %s946_s17 = sand.u32 3, %s2746_s23 }
 0x11e   : >> { %v937_v45 = vld [vmem:[%s936_s21] sm:$0x1]  ;;  %s947_s22 = scalar_lea.vmem [#allocation11], %s945_s18  ;;  %s949_s20 = scalar_lea.vmem [#allocation12], %s946_s17 }
 0x11f   : >> { %v938_v47 = vmul.f32 %v937_v45, %v935_v44  ;;  %v948_v49 = vld [vmem:[%s947_s22] sm:$0x1]  ;;  %s961_s12 = sshra.s32 %s2758_s13, 2  ;;  %s962_s15 = sand.u32 3, %s2758_s13  ;;  %v998_v8 = vstv %s2767_s3 }
 0x120   : >> { %v950_v50 = vld [vmem:[%s949_s20] sm:$0x1]  ;;  %s963_s24 = scalar_lea.vmem [#allocation11], %s961_s12  ;;  %s965_s1 = scalar_lea.vmem [#allocation12], %s962_s15 }
 0x121   : >> { %v941_v51 = vmul.f32 %v940_v46, %v938_v47  ;;  %v951_v52 = vmul.f32 %v950_v50, %v948_v49  ;;  %v964_v54 = vld [vmem:[%s963_s24] sm:$0x1]  ;;  %s974_s23 = sshra.s32 %s2761_s16, 2  ;;  %s975_s10 = sand.u32 3, %s2761_s16 }
 0x122   : >> { %v966_v55 = vld [vmem:[%s965_s1] sm:$0x1]  ;;  %s976_s13 = scalar_lea.vmem [#allocation11], %s974_s23  ;;  %s978_s11 = scalar_lea.vmem [#allocation12], %s975_s10 }
 0x123   : >> { %v942_v57 = vadd.f32 %v941_v51, %v939_v48  ;;  %v953_v58 = vmul.f32 %v951_v52, %v940_v46  ;;  %v967_v59 = vmul.f32 %v966_v55, %v964_v54  ;;  %v977_v61 = vld [vmem:[%s976_s13] sm:$0x1]  ;;  %s989_s2 = sld [smem:[#allocation5 + %s2749_s27]]  ;;  %s1847_s21 = sshll.u32 %s2772_s30, 7  ;;  %v1084_v48 = vld [vmem:[#allocation2 + $0x17] sm:$0x1] }
 0x124   : >> { %v979_v62 = vld [vmem:[%s978_s11] sm:$0x1]  ;;  %s2785_s29 = sld [smem:[#allocation6 + %s2749_s27]]  ;;  %s2788_s16 = sadd.s32 %s1847_s21, %s2392_s0  ;;  %v1097_v54 = vld [vmem:[#allocation3 + $0x17] sm:$0x1] }
 0x125   : >> { %943 = vst [vmem:[#allocation2 + $0x12] sm:$0x1] %v942_v57  ;;  %v954_v63 = vadd.f32 %v953_v58, %v952_v53  ;;  %v970_v0 = vmul.f32 %v969_v56, %v967_v59  ;;  %v980_v1 = vmul.f32 %v979_v62, %v977_v61  ;;  %s2791_s18 = sld [smem:[#allocation8 + %s2764_s19]]  ;;  %s3099_s17 = sadd.s32 23, %s2345_s28  ;;  %v1113_v62 = vld [vmem:[#allocation2 + $0x18] sm:$0x1] }
 0x126   : >> { %s1072_s22 = sadd.s32 %s2389_s26, %s3099_s17  ;;  %s2797_s30 = sld [smem:[#allocation5 + %s2764_s19]] }
 0x127   : >> { %955 = vst [vmem:[#allocation3 + $0x12] sm:$0x1] %v954_v63  ;;  %v971_v3 = vadd.f32 %v970_v0, %v968_v60  ;;  %v982_v4 = vmul.f32 %v980_v1, %v969_v56  ;;  %s1848_s20 = sshll.u32 %s1072_s22, 7  ;;  %s2800_s12 = sld [smem:[#allocation6 + %s2764_s19]] }
 0x128   : >> { %s2803_s27 = sadd.s32 %s1848_s20, %s2392_s0  ;;  %s2806_s15 = sld [smem:[#allocation8 + %s2788_s16]] }
 0x129   : >> { %972 = vst [vmem:[#allocation2 + $0x13] sm:$0x1] %v971_v3  ;;  %v983_v5 = vadd.f32 %v982_v4, %v981_v2  ;;  %s3100_s24 = sadd.s32 24, %s2345_s28  ;;  %s990_s23 = sshra.s32 %s989_s2, 2  ;;  %v1126_v3 = vld [vmem:[#allocation3 + $0x18] sm:$0x1] }
 0x12a   : >> { %s2811_s1 = sadd.s32 %s2389_s26, %s3100_s24  ;;  %s991_s10 = sand.u32 3, %s989_s2 }
 0x12b   : >> { %984 = vst [vmem:[#allocation3 + $0x13] sm:$0x1] %v983_v5  ;;  %s992_s13 = scalar_lea.vmem [#allocation11], %s990_s23  ;;  %s994_s11 = scalar_lea.vmem [#allocation12], %s991_s10  ;;  %v1027_v18 = vstv %s2791_s18 }
 0x12c   : >> { %v993_v6 = vld [vmem:[%s992_s13] sm:$0x1]  ;;  %s1003_s19 = sshra.s32 %s2785_s29, 2  ;;  %s1004_s21 = sand.u32 3, %s2785_s29 }
 0x12d   : >> { %v995_v7 = vld [vmem:[%s994_s11] sm:$0x1]  ;;  %s1005_s17 = scalar_lea.vmem [#allocation11], %s1003_s19  ;;  %s1007_s22 = scalar_lea.vmem [#allocation12], %s1004_s21 }
 0x12e   : >> { %v996_v9 = vmul.f32 %v995_v7, %v993_v6  ;;  %v1006_v11 = vld [vmem:[%s1005_s17] sm:$0x1]  ;;  %s1019_s20 = sshra.s32 %s2797_s30, 2  ;;  %s1020_s2 = sand.u32 3, %s2797_s30  ;;  %v1056_v34 = vstv %s2806_s15 }
 0x12f   : >> { %v1008_v12 = vld [vmem:[%s1007_s22] sm:$0x1]  ;;  %s1021_s24 = scalar_lea.vmem [#allocation11], %s1019_s20  ;;  %s1023_s3 = scalar_lea.vmem [#allocation12], %s1020_s2 }
 0x130   : >> { %v999_v13 = vmul.f32 %v998_v8, %v996_v9  ;;  %v1009_v14 = vmul.f32 %v1008_v12, %v1006_v11  ;;  %v1022_v16 = vld [vmem:[%s1021_s24] sm:$0x1]  ;;  %s1032_s29 = sshra.s32 %s2800_s12, 2  ;;  %s1033_s23 = sand.u32 3, %s2800_s12 }
 0x131   : >> { %v1024_v17 = vld [vmem:[%s1023_s3] sm:$0x1]  ;;  %s1034_s30 = scalar_lea.vmem [#allocation11], %s1032_s29  ;;  %s1036_s10 = scalar_lea.vmem [#allocation12], %s1033_s23 }
 0x132   : >> { %v1000_v19 = vadd.f32 %v999_v13, %v997_v10  ;;  %v1011_v20 = vmul.f32 %v1009_v14, %v998_v8  ;;  %v1025_v21 = vmul.f32 %v1024_v17, %v1022_v16  ;;  %v1035_v23 = vld [vmem:[%s1034_s30] sm:$0x1]  ;;  %s1047_s13 = sld [smem:[#allocation5 + %s2788_s16]]  ;;  %s1849_s11 = sshll.u32 %s2811_s1, 7  ;;  %v1142_v10 = vld [vmem:[#allocation2 + $0x19] sm:$0x1] }
 0x133   : >> { %v1037_v24 = vld [vmem:[%s1036_s10] sm:$0x1]  ;;  %s2824_s18 = sld [smem:[#allocation6 + %s2788_s16]]  ;;  %s2827_s12 = sadd.s32 %s1849_s11, %s2392_s0  ;;  %v1155_v16 = vld [vmem:[#allocation3 + $0x19] sm:$0x1] }
 0x134   : >> { %1001 = vst [vmem:[#allocation2 + $0x14] sm:$0x1] %v1000_v19  ;;  %v1012_v25 = vadd.f32 %v1011_v20, %v1010_v15  ;;  %v1028_v26 = vmul.f32 %v1027_v18, %v1025_v21  ;;  %v1038_v27 = vmul.f32 %v1037_v24, %v1035_v23  ;;  %s2830_s19 = sld [smem:[#allocation8 + %s2803_s27]]  ;;  %s3101_s21 = sadd.s32 25, %s2345_s28  ;;  %v1171_v24 = vld [vmem:[#allocation2 + $0x1a] sm:$0x1] }
 0x135   : >> { %s1130_s17 = sadd.s32 %s2389_s26, %s3101_s21  ;;  %s2836_s1 = sld [smem:[#allocation5 + %s2803_s27]] }
 0x136   : >> { %1013 = vst [vmem:[#allocation3 + $0x14] sm:$0x1] %v1012_v25  ;;  %v1029_v29 = vadd.f32 %v1028_v26, %v1026_v22  ;;  %v1040_v30 = vmul.f32 %v1038_v27, %v1027_v18  ;;  %s1850_s22 = sshll.u32 %s1130_s17, 7  ;;  %s2839_s20 = sld [smem:[#allocation6 + %s2803_s27]] }
 0x137   : >> { %s2842_s16 = sadd.s32 %s1850_s22, %s2392_s0  ;;  %s2845_s2 = sld [smem:[#allocation8 + %s2827_s12]] }
 0x138   : >> { %1030 = vst [vmem:[#allocation2 + $0x15] sm:$0x1] %v1029_v29  ;;  %v1041_v31 = vadd.f32 %v1040_v30, %v1039_v28  ;;  %s3102_s24 = sadd.s32 26, %s2345_s28  ;;  %s1048_s29 = sshra.s32 %s1047_s13, 2  ;;  %v1184_v29 = vld [vmem:[#allocation3 + $0x1a] sm:$0x1] }
 0x139   : >> { %s2850_s3 = sadd.s32 %s2389_s26, %s3102_s24  ;;  %s1049_s23 = sand.u32 3, %s1047_s13 }
 0x13a   : >> { %1042 = vst [vmem:[#allocation3 + $0x15] sm:$0x1] %v1041_v31  ;;  %s1050_s30 = scalar_lea.vmem [#allocation11], %s1048_s29  ;;  %s1052_s10 = scalar_lea.vmem [#allocation12], %s1049_s23  ;;  %v1085_v44 = vstv %s2830_s19 }
 0x13b   : >> { %v1051_v32 = vld [vmem:[%s1050_s30] sm:$0x1]  ;;  %s1061_s27 = sshra.s32 %s2824_s18, 2  ;;  %s1062_s11 = sand.u32 3, %s2824_s18 }
 0x13c   : >> { %v1053_v33 = vld [vmem:[%s1052_s10] sm:$0x1]  ;;  %s1063_s21 = scalar_lea.vmem [#allocation11], %s1061_s27  ;;  %s1065_s17 = scalar_lea.vmem [#allocation12], %s1062_s11 }
 0x13d   : >> { %v1054_v35 = vmul.f32 %v1053_v33, %v1051_v32  ;;  %v1064_v37 = vld [vmem:[%s1063_s21] sm:$0x1]  ;;  %s1077_s22 = sshra.s32 %s2836_s1, 2  ;;  %s1078_s13 = sand.u32 3, %s2836_s1  ;;  %v1114_v60 = vstv %s2845_s2 }
 0x13e   : >> { %v1066_v38 = vld [vmem:[%s1065_s17] sm:$0x1]  ;;  %s1079_s24 = scalar_lea.vmem [#allocation11], %s1077_s22  ;;  %s1081_s15 = scalar_lea.vmem [#allocation12], %s1078_s13 }
 0x13f   : >> { %v1057_v39 = vmul.f32 %v1056_v34, %v1054_v35  ;;  %v1067_v40 = vmul.f32 %v1066_v38, %v1064_v37  ;;  %v1080_v42 = vld [vmem:[%s1079_s24] sm:$0x1]  ;;  %s1090_s18 = sshra.s32 %s2839_s20, 2  ;;  %s1091_s29 = sand.u32 3, %s2839_s20 }
 0x140   : >> { %v1082_v43 = vld [vmem:[%s1081_s15] sm:$0x1]  ;;  %s1092_s1 = scalar_lea.vmem [#allocation11], %s1090_s18  ;;  %s1094_s23 = scalar_lea.vmem [#allocation12], %s1091_s29 }
 0x141   : >> { %v1058_v45 = vadd.f32 %v1057_v39, %v1055_v36  ;;  %v1069_v46 = vmul.f32 %v1067_v40, %v1056_v34  ;;  %v1083_v47 = vmul.f32 %v1082_v43, %v1080_v42  ;;  %v1093_v49 = vld [vmem:[%s1092_s1] sm:$0x1]  ;;  %s1105_s30 = sld [smem:[#allocation5 + %s2827_s12]]  ;;  %s1851_s10 = sshll.u32 %s2850_s3, 7  ;;  %v1200_v36 = vld [vmem:[#allocation2 + $0x1b] sm:$0x1] }
 0x142   : >> { %v1095_v50 = vld [vmem:[%s1094_s23] sm:$0x1]  ;;  %s2863_s19 = sld [smem:[#allocation6 + %s2827_s12]]  ;;  %s2866_s20 = sadd.s32 %s1851_s10, %s2392_s0  ;;  %v1213_v42 = vld [vmem:[#allocation3 + $0x1b] sm:$0x1] }
 0x143   : >> { %1059 = vst [vmem:[#allocation2 + $0x16] sm:$0x1] %v1058_v45  ;;  %v1070_v51 = vadd.f32 %v1069_v46, %v1068_v41  ;;  %v1086_v52 = vmul.f32 %v1085_v44, %v1083_v47  ;;  %v1096_v53 = vmul.f32 %v1095_v50, %v1093_v49  ;;  %s2869_s27 = sld [smem:[#allocation8 + %s2842_s16]]  ;;  %s3103_s11 = sadd.s32 27, %s2345_s28  ;;  %v1229_v50 = vld [vmem:[#allocation2 + $0x1c] sm:$0x1] }
 0x144   : >> { %s1188_s21 = sadd.s32 %s2389_s26, %s3103_s11  ;;  %s2875_s3 = sld [smem:[#allocation5 + %s2842_s16]] }
 0x145   : >> { %1071 = vst [vmem:[#allocation3 + $0x16] sm:$0x1] %v1070_v51  ;;  %v1087_v55 = vadd.f32 %v1086_v52, %v1084_v48  ;;  %v1098_v56 = vmul.f32 %v1096_v53, %v1085_v44  ;;  %s1852_s17 = sshll.u32 %s1188_s21, 7  ;;  %s2878_s22 = sld [smem:[#allocation6 + %s2842_s16]] }
 0x146   : >> { %s2881_s12 = sadd.s32 %s1852_s17, %s2392_s0  ;;  %s2884_s13 = sld [smem:[#allocation8 + %s2866_s20]] }
 0x147   : >> { %1088 = vst [vmem:[#allocation2 + $0x17] sm:$0x1] %v1087_v55  ;;  %v1099_v57 = vadd.f32 %v1098_v56, %v1097_v54  ;;  %s3104_s24 = sadd.s32 28, %s2345_s28  ;;  %s1106_s18 = sshra.s32 %s1105_s30, 2  ;;  %v1242_v55 = vld [vmem:[#allocation3 + $0x1c] sm:$0x1] }
 0x148   : >> { %s2889_s15 = sadd.s32 %s2389_s26, %s3104_s24  ;;  %s1107_s29 = sand.u32 3, %s1105_s30 }
 0x149   : >> { %1100 = vst [vmem:[#allocation3 + $0x17] sm:$0x1] %v1099_v57  ;;  %s1108_s1 = scalar_lea.vmem [#allocation11], %s1106_s18  ;;  %s1110_s23 = scalar_lea.vmem [#allocation12], %s1107_s29  ;;  %v1143_v6 = vstv %s2869_s27 }
 0x14a   : >> { %v1109_v58 = vld [vmem:[%s1108_s1] sm:$0x1]  ;;  %s1119_s16 = sshra.s32 %s2863_s19, 2  ;;  %s1120_s10 = sand.u32 3, %s2863_s19 }
 0x14b   : >> { %v1111_v59 = vld [vmem:[%s1110_s23] sm:$0x1]  ;;  %s1121_s11 = scalar_lea.vmem [#allocation11], %s1119_s16  ;;  %s1123_s21 = scalar_lea.vmem [#allocation12], %s1120_s10 }
 0x14c   : >> { %v1112_v61 = vmul.f32 %v1111_v59, %v1109_v58  ;;  %v1122_v63 = vld [vmem:[%s1121_s11] sm:$0x1]  ;;  %s1135_s17 = sshra.s32 %s2875_s3, 2  ;;  %s1136_s30 = sand.u32 3, %s2875_s3  ;;  %v1172_v22 = vstv %s2884_s13 }
 0x14d   : >> { %v1124_v0 = vld [vmem:[%s1123_s21] sm:$0x1]  ;;  %s1137_s24 = scalar_lea.vmem [#allocation11], %s1135_s17  ;;  %s1139_s2 = scalar_lea.vmem [#allocation12], %s1136_s30 }
 0x14e   : >> { %v1115_v1 = vmul.f32 %v1114_v60, %v1112_v61  ;;  %v1125_v2 = vmul.f32 %v1124_v0, %v1122_v63  ;;  %v1138_v4 = vld [vmem:[%s1137_s24] sm:$0x1]  ;;  %s1148_s19 = sshra.s32 %s2878_s22, 2  ;;  %s1149_s18 = sand.u32 3, %s2878_s22 }
 0x14f   : >> { %v1140_v5 = vld [vmem:[%s1139_s2] sm:$0x1]  ;;  %s1150_s3 = scalar_lea.vmem [#allocation11], %s1148_s19  ;;  %s1152_s29 = scalar_lea.vmem [#allocation12], %s1149_s18 }
 0x150   : >> { %v1116_v7 = vadd.f32 %v1115_v1, %v1113_v62  ;;  %v1127_v8 = vmul.f32 %v1125_v2, %v1114_v60  ;;  %v1141_v9 = vmul.f32 %v1140_v5, %v1138_v4  ;;  %v1151_v11 = vld [vmem:[%s1150_s3] sm:$0x1]  ;;  %s1163_s1 = sld [smem:[#allocation5 + %s2866_s20]]  ;;  %s1853_s23 = sshll.u32 %s2889_s15, 7  ;;  %v1258_v62 = vld [vmem:[#allocation2 + $0x1d] sm:$0x1] }
 0x151   : >> { %v1153_v12 = vld [vmem:[%s1152_s29] sm:$0x1]  ;;  %s2902_s27 = sld [smem:[#allocation6 + %s2866_s20]]  ;;  %s3105_s16 = sadd.s32 29, %s2345_s28  ;;  %v1271_v4 = vld [vmem:[#allocation3 + $0x1d] sm:$0x1] }
 0x152   : >> { %1117 = vst [vmem:[#allocation2 + $0x18] sm:$0x1] %v1116_v7  ;;  %v1128_v13 = vadd.f32 %v1127_v8, %v1126_v3  ;;  %v1144_v14 = vmul.f32 %v1143_v6, %v1141_v9  ;;  %v1154_v15 = vmul.f32 %v1153_v12, %v1151_v11  ;;  %s2905_s22 = sld [smem:[#allocation8 + %s2881_s12]]  ;;  %s2910_s10 = sadd.s32 %s2389_s26, %s3105_s16  ;;  %v1287_v12 = vld [vmem:[#allocation2 + $0x1e] sm:$0x1] }
 0x153   : >> { %s2913_s15 = sld [smem:[#allocation5 + %s2881_s12]]  ;;  %s2916_s11 = sadd.s32 %s1853_s23, %s2392_s0 }
 0x154   : >> { %1129 = vst [vmem:[#allocation3 + $0x18] sm:$0x1] %v1128_v13  ;;  %v1145_v17 = vadd.f32 %v1144_v14, %v1142_v10  ;;  %v1156_v18 = vmul.f32 %v1154_v15, %v1143_v6  ;;  %s2919_s20 = sld [smem:[#allocation6 + %s2881_s12]]  ;;  %s1854_s21 = sshll.u32 %s2910_s10, 7 }
 0x155   : >> { %s2923_s17 = sld [smem:[#allocation8 + %s2916_s11]]  ;;  %s3106_s30 = sadd.s32 30, %s2345_s28 }
 0x156   : >> { %1146 = vst [vmem:[#allocation2 + $0x19] sm:$0x1] %v1145_v17  ;;  %v1157_v19 = vadd.f32 %v1156_v18, %v1155_v16  ;;  %s2928_s24 = sadd.s32 %s2389_s26, %s3106_s30  ;;  %s1164_s2 = sshra.s32 %s1163_s1, 2  ;;  %v1300_v17 = vld [vmem:[#allocation3 + $0x1e] sm:$0x1] }
 0x157   : >> { %s1165_s19 = sand.u32 3, %s1163_s1  ;;  %s1166_s18 = scalar_lea.vmem [#allocation11], %s1164_s2 }
 0x158   : >> { %1158 = vst [vmem:[#allocation3 + $0x19] sm:$0x1] %v1157_v19  ;;  %v1167_v20 = vld [vmem:[%s1166_s18] sm:$0x1]  ;;  %s1168_s3 = scalar_lea.vmem [#allocation12], %s1165_s19  ;;  %s1177_s12 = sshra.s32 %s2902_s27, 2  ;;  %v1201_v32 = vstv %s2905_s22 }
 0x159   : >> { %v1169_v21 = vld [vmem:[%s1168_s3] sm:$0x1]  ;;  %s1178_s29 = sand.u32 3, %s2902_s27  ;;  %s1179_s23 = scalar_lea.vmem [#allocation11], %s1177_s12 }
 0x15a   : >> { %v1170_v23 = vmul.f32 %v1169_v21, %v1167_v20  ;;  %v1180_v25 = vld [vmem:[%s1179_s23] sm:$0x1]  ;;  %s1181_s16 = scalar_lea.vmem [#allocation12], %s1178_s29  ;;  %s1193_s30 = sshra.s32 %s2913_s15, 2 }
 0x15b   : >> { %v1182_v26 = vld [vmem:[%s1181_s16] sm:$0x1]  ;;  %s1194_s1 = sand.u32 3, %s2913_s15  ;;  %s1195_s2 = scalar_lea.vmem [#allocation11], %s1193_s30  ;;  %v1230_v48 = vstv %s2923_s17 }
 0x15c   : >> { %v1173_v27 = vmul.f32 %v1172_v22, %v1170_v23  ;;  %v1183_v28 = vmul.f32 %v1182_v26, %v1180_v25  ;;  %v1196_v30 = vld [vmem:[%s1195_s2] sm:$0x1]  ;;  %s1197_s13 = scalar_lea.vmem [#allocation12], %s1194_s1  ;;  %s1206_s27 = sshra.s32 %s2919_s20, 2 }
 0x15d   : >> { %v1198_v31 = vld [vmem:[%s1197_s13] sm:$0x1]  ;;  %s1207_s19 = sand.u32 3, %s2919_s20  ;;  %s1208_s15 = scalar_lea.vmem [#allocation11], %s1206_s27 }
 0x15e   : >> { %v1174_v33 = vadd.f32 %v1173_v27, %v1171_v24  ;;  %v1185_v34 = vmul.f32 %v1183_v28, %v1172_v22  ;;  %v1199_v35 = vmul.f32 %v1198_v31, %v1196_v30  ;;  %v1209_v37 = vld [vmem:[%s1208_s15] sm:$0x1]  ;;  %s1210_s18 = scalar_lea.vmem [#allocation12], %s1207_s19  ;;  %s1221_s3 = sld [smem:[#allocation5 + %s2916_s11]]  ;;  %v1316_v24 = vld [vmem:[#allocation2 + $0x1f] sm:$0x1] }
 0x15f   : >> { %v1211_v38 = vld [vmem:[%s1210_s18] sm:$0x1]  ;;  %s1248_s12 = sadd.s32 %s1854_s21, %s2392_s0  ;;  %s2943_s22 = sld [smem:[#allocation6 + %s2916_s11]]  ;;  %v1329_v30 = vld [vmem:[#allocation3 + $0x1f] sm:$0x1] }
 0x160   : >> { %1175 = vst [vmem:[#allocation2 + $0x1a] sm:$0x1] %v1174_v33  ;;  %v1186_v39 = vadd.f32 %v1185_v34, %v1184_v29  ;;  %v1202_v40 = vmul.f32 %v1201_v32, %v1199_v35  ;;  %v1212_v41 = vmul.f32 %v1211_v38, %v1209_v37  ;;  %s1855_s20 = sshll.u32 %s2928_s24, 7  ;;  %s2946_s29 = sld [smem:[#allocation8 + %s1248_s12]] }
 0x161   : >> { %s3107_s23 = sadd.s32 31, %s2345_s28  ;;  %s2953_s10 = sld [smem:[#allocation5 + %s1248_s12]] }
 0x162   : >> { %s2951_s16 = sadd.s32 %s2389_s26, %s3107_s23  ;;  %1187 = vst [vmem:[#allocation3 + $0x1a] sm:$0x1] %v1186_v39  ;;  %v1203_v43 = vadd.f32 %v1202_v40, %v1200_v36  ;;  %v1214_v44 = vmul.f32 %v1212_v41, %v1201_v32  ;;  %s2955_s21 = sld [smem:[#allocation6 + %s1248_s12]] }
 0x163   : >> { %s2958_s11 = sadd.s32 %s1855_s20, %s2392_s0  ;;  %s1856_s26 = sshll.u32 %s2951_s16, 7 }
 0x164   : >> { %1204 = vst [vmem:[#allocation2 + $0x1b] sm:$0x1] %v1203_v43  ;;  %v1215_v45 = vadd.f32 %v1214_v44, %v1213_v42  ;;  %s2961_s24 = sld [smem:[#allocation8 + %s2958_s11]]  ;;  %s1222_s30 = sshra.s32 %s1221_s3, 2 }
 0x165   : >> { %s1223_s1 = sand.u32 3, %s1221_s3  ;;  %s1224_s2 = scalar_lea.vmem [#allocation11], %s1222_s30 }
 0x166   : >> { %1216 = vst [vmem:[#allocation3 + $0x1b] sm:$0x1] %v1215_v45  ;;  %v1225_v46 = vld [vmem:[%s1224_s2] sm:$0x1]  ;;  %s1226_s13 = scalar_lea.vmem [#allocation12], %s1223_s1  ;;  %s1235_s27 = sshra.s32 %s2943_s22, 2  ;;  %v1259_v58 = vstv %s2946_s29 }
 0x167   : >> { %v1227_v47 = vld [vmem:[%s1226_s13] sm:$0x1]  ;;  %s1236_s19 = sand.u32 3, %s2943_s22  ;;  %s1237_s15 = scalar_lea.vmem [#allocation11], %s1235_s27 }
 0x168   : >> { %v1228_v49 = vmul.f32 %v1227_v47, %v1225_v46  ;;  %v1238_v51 = vld [vmem:[%s1237_s15] sm:$0x1]  ;;  %s1239_s18 = scalar_lea.vmem [#allocation12], %s1236_s19  ;;  %s1251_s12 = sshra.s32 %s2953_s10, 2 }
 0x169   : >> { %v1240_v52 = vld [vmem:[%s1239_s18] sm:$0x1]  ;;  %s1252_s3 = sand.u32 3, %s2953_s10  ;;  %s1253_s20 = scalar_lea.vmem [#allocation11], %s1251_s12 }
 0x16a   : >> { %v1231_v53 = vmul.f32 %v1230_v48, %v1228_v49  ;;  %v1241_v54 = vmul.f32 %v1240_v52, %v1238_v51  ;;  %v1254_v56 = vld [vmem:[%s1253_s20] sm:$0x1]  ;;  %s1255_s17 = scalar_lea.vmem [#allocation12], %s1252_s3  ;;  %s1264_s22 = sshra.s32 %s2955_s21, 2  ;;  %v1288_v10 = vstv %s2961_s24 }
 0x16b   : >> { %v1256_v57 = vld [vmem:[%s1255_s17] sm:$0x1]  ;;  %s1265_s23 = sand.u32 3, %s2955_s21  ;;  %s1266_s30 = scalar_lea.vmem [#allocation11], %s1264_s22 }
 0x16c   : >> { %v1232_v59 = vadd.f32 %v1231_v53, %v1229_v50  ;;  %v1243_v60 = vmul.f32 %v1241_v54, %v1230_v48  ;;  %v1257_v61 = vmul.f32 %v1256_v57, %v1254_v56  ;;  %v1267_v63 = vld [vmem:[%s1266_s30] sm:$0x1]  ;;  %s1268_s10 = scalar_lea.vmem [#allocation12], %s1265_s23  ;;  %s1279_s1 = sld [smem:[#allocation5 + %s2958_s11]] }
 0x16d   : >> { %v1269_v0 = vld [vmem:[%s1268_s10] sm:$0x1]  ;;  %s1306_s2 = sadd.s32 %s1856_s26, %s2392_s0  ;;  %s1292_s13 = sld [smem:[#allocation6 + %s2958_s11]] }
 0x16e   : >> { %1233 = vst [vmem:[#allocation2 + $0x1c] sm:$0x1] %v1232_v59  ;;  %v1244_v1 = vadd.f32 %v1243_v60, %v1242_v55  ;;  %v1260_v2 = vmul.f32 %v1259_v58, %v1257_v61  ;;  %v1270_v3 = vmul.f32 %v1269_v0, %v1267_v63  ;;  %s2977_s29 = sld [smem:[#allocation8 + %s1306_s2]]  ;;  %s400_s14 = sadd.s32 1, %s2169_s14  }
 0x16f   : >> { %s1308_s21 = sld [smem:[#allocation5 + %s1306_s2]]  ;;  %p397_p5 = scmp.ge.s32.totalorder %s400_s14, 32  }
 0x170   : >> { %1245 = vst [vmem:[#allocation3 + $0x1c] sm:$0x1] %v1244_v1  ;;  %v1261_v5 = vadd.f32 %v1260_v2, %v1258_v62  ;;  %v1272_v6 = vmul.f32 %v1270_v3, %v1259_v58  ;;  %s2979_s27 = sld [smem:[#allocation6 + %s1306_s2]]  ;;  %v1335_v34 = vld [vmem:[#allocation2 + $0x8] sm:$0xff] (%p397_p5)  ;;  %v1334_v35 = vld [vmem:[#allocation2] sm:$0xff] (%p397_p5)  ;;  %v2991_v38 = vld [vmem:[#allocation2 + $0x10] sm:$0xff] (%p397_p5) }
 0x171   : > { %v2988_v36 = vld [vmem:[#allocation3 + $0x8] sm:$0xff] (%p397_p5)  ;;  %v1408_v37 = vld [vmem:[#allocation3] sm:$0xff] (%p397_p5)  ;;  %s2183_s2 = smov (%p397_p5), 64   ;;  %v2994_v39 = vld [vmem:[#allocation3 + $0x10] sm:$0xff] (%p397_p5)  ;;  %s2184_s28 = smov (%p397_p5), 32   ;;  %vm1487_vm0 = vcmask (%p397_p5), 261120  }
 0x172   : >> { %1262 = vst [vmem:[#allocation2 + $0x1d] sm:$0x1] %v1261_v5  ;;  %v1273_v7 = vadd.f32 %v1272_v6, %v1271_v4  ;;  %s1280_s19 = sshra.s32 %s1279_s1, 2  ;;  %s1281_s16 = sand.u32 3, %s1279_s1  ;;  %v3013_v57 = vld [vmem:[#allocation14] ss:$0 sm:$0xff] (%p397_p5) }
 0x173   : >> { %s1282_s0 = scalar_lea.vmem [#allocation11], %s1280_s19  ;;  %s1284_s26 = scalar_lea.vmem [#allocation12], %s1281_s16  ;;  %v3016_v4 = vld [vmem:[#allocation15] ss:$0 sm:$0xff] (%p397_p5)  ;;  %vm1562_vm1 = vcmask (%p397_p5), 7168  }
 0x174   : >> { %1274 = vst [vmem:[#allocation3 + $0x1d] sm:$0x1] %v1273_v7  ;;  %v1283_v8 = vld [vmem:[%s1282_s0] sm:$0x1]  ;;  %s1293_s11 = sshra.s32 %s1292_s13, 2  ;;  %s1294_s15 = sand.u32 3, %s1292_s13  ;;  %v1317_v20 = vstv %s2977_s29 }
 0x175   : >> { %v1285_v9 = vld [vmem:[%s1284_s26] sm:$0x1]  ;;  %s1295_s18 = scalar_lea.vmem [#allocation11], %s1293_s11  ;;  %s1297_s12 = scalar_lea.vmem [#allocation12], %s1294_s15 }
 0x176   : >> { %v1286_v11 = vmul.f32 %v1285_v9, %v1283_v8  ;;  %v1296_v13 = vld [vmem:[%s1295_s18] sm:$0x1]  ;;  %s1309_s3 = sshra.s32 %s1308_s21, 2  ;;  %s1310_s20 = sand.u32 3, %s1308_s21 }
 0x177   : >> { %v1298_v14 = vld [vmem:[%s1297_s12] sm:$0x1]  ;;  %s1311_s17 = scalar_lea.vmem [#allocation11], %s1309_s3  ;;  %s1313_s22 = scalar_lea.vmem [#allocation12], %s1310_s20 }
 0x178   : >> { %v1289_v15 = vmul.f32 %v1288_v10, %v1286_v11  ;;  %v1299_v16 = vmul.f32 %v1298_v14, %v1296_v13  ;;  %v1312_v18 = vld [vmem:[%s1311_s17] sm:$0x1]  ;;  %s1322_s24 = sshra.s32 %s2979_s27, 2  ;;  %s1323_s23 = sand.u32 3, %s2979_s27  ;;  %v1859_v14 = vld [vmem:[#allocation17] ss:$0 sm:$0xff] (%p397_p5) }
 0x179   : >> { %v1314_v19 = vld [vmem:[%s1313_s22] sm:$0x1]  ;;  %s1324_s30 = scalar_lea.vmem [#allocation11], %s1322_s24  ;;  %s1326_s10 = scalar_lea.vmem [#allocation12], %s1323_s23 }
 0x17a   : >> { %v1290_v21 = vadd.f32 %v1289_v15, %v1287_v12  ;;  %v1301_v22 = vmul.f32 %v1299_v16, %v1288_v10  ;;  %v1315_v23 = vmul.f32 %v1314_v19, %v1312_v18  ;;  %v1325_v25 = vld [vmem:[%s1324_s30] sm:$0x1]  ;;  %s2182_s1 = smov (%p397_p5), 96  }
 0x17b   : >> { %v1327_v26 = vld [vmem:[%s1326_s10] sm:$0x1]  ;;  %1344 = vrot.lane.b32.xlu1 (%p397_p5), %v1335_v34, %s2182_s1  ;;  %1342 = vrot.lane.b32.xlu0 (%p397_p5), %v1334_v35, %s2182_s1 }
 0x17c   : >> { %1291 = vst [vmem:[#allocation2 + $0x1e] sm:$0x1] %v1290_v21  ;;  %v1302_v27 = vadd.f32 %v1301_v22, %v1300_v17  ;;  %v1318_v28 = vmul.f32 %v1317_v20, %v1315_v23  ;;  %v1328_v29 = vmul.f32 %v1327_v26, %v1325_v25 }
 0x17e   : >> { %1303 = vst [vmem:[#allocation3 + $0x1e] sm:$0x1] %v1302_v27  ;;  %v1319_v31 = vadd.f32 %v1318_v28, %v1316_v24  ;;  %v1330_v32 = vmul.f32 %v1328_v29, %v1317_v20  ;;  %399 = sbr.rel (!%p397_p5) target bundleno = 135 (0x87), region = 236 }
 0x17f   : > { %1418 = vrot.lane.b32.xlu1 (%p397_p5), %v2988_v36, %s2182_s1  ;;  %1416 = vrot.lane.b32.xlu0 (%p397_p5), %v1408_v37, %s2182_s1 }
 0x180   : >> { %1320 = vst [vmem:[#allocation2 + $0x1f] sm:$0x1] %v1319_v31  ;;  %v1331_v33 = vadd.f32 %v1330_v32, %v1329_v30 }
 0x182   : >> { %1332 = vst [vmem:[#allocation3 + $0x1f] sm:$0x1] %v1331_v33 }
 0x183   : > { %1358 = vrot.lane.b32.xlu1 %v1334_v35, %s2183_s2  ;;  %1346 = vrot.lane.b32.xlu0 %v2991_v38, %s2182_s1 }
 0x187   : > { %1432 = vrot.lane.b32.xlu1 %v1408_v37, %s2183_s2  ;;  %1420 = vrot.lane.b32.xlu0 %v2994_v39, %s2182_s1  ;;  %v2997_v40 = vld [vmem:[#allocation2 + $0x18] sm:$0xff] }
 0x189   : > { %v3000_v41 = vld [vmem:[#allocation3 + $0x18] sm:$0xff] }
 0x18b   : > { %1360 = vrot.lane.b32.xlu1 %v1335_v34, %s2183_s2  ;;  %1348 = vrot.lane.b32.xlu0 %v2997_v40, %s2182_s1 }
 0x18f   : > { %1434 = vrot.lane.b32.xlu1 %v2988_v36, %s2183_s2  ;;  %1422 = vrot.lane.b32.xlu0 %v3000_v41, %s2182_s1 }
 0x193   : > { %1374 = vrot.lane.b32.xlu1 %v1334_v35, %s2184_s28  ;;  %1362 = vrot.lane.b32.xlu0 %v2991_v38, %s2183_s2 }
 0x197   : > { %1448 = vrot.lane.b32.xlu1 %v1408_v37, %s2184_s28  ;;  %1436 = vrot.lane.b32.xlu0 %v2994_v39, %s2183_s2 }
 0x19b   : > { %1376 = vrot.lane.b32.xlu1 %v1335_v34, %s2184_s28  ;;  %1364 = vrot.lane.b32.xlu0 %v2997_v40, %s2183_s2 }
 0x19f   : > { %1450 = vrot.lane.b32.xlu1 %v2988_v36, %s2184_s28  ;;  %1438 = vrot.lane.b32.xlu0 %v3000_v41, %s2183_s2 }
 0x1a3   : > { %1452 = vrot.lane.b32.xlu1 %v2994_v39, %s2184_s28  ;;  %1378 = vrot.lane.b32.xlu0 %v2991_v38, %s2184_s28 }
 0x1a7   : > { %1454 = vrot.lane.b32.xlu1 %v3000_v41, %s2184_s28  ;;  %1380 = vrot.lane.b32.xlu0 %v2997_v40, %s2184_s28 }
 0x1ed   : > { %v1345_v42 = vpop.permute.xlu1 %1344  ;;  %v1343_v43 = vpop.permute.xlu0 %1342 }
 0x1ee   : > { %v1354_v54 = vadd.f32 %v1343_v43, %v1334_v35  ;;  %v1355_v1 = vadd.f32 %v1345_v42, %v1335_v34 }
 0x1f1   : > { %v1419_v44 = vpop.permute.xlu1 %1418  ;;  %v1417_v45 = vpop.permute.xlu0 %1416 }
 0x1f2   : > { %v1428_v59 = vadd.f32 %v1417_v45, %v1408_v37  ;;  %v1429_v10 = vadd.f32 %v1419_v44, %v2988_v36 }
 0x1f5   : > { %v1359_v46 = vpop.permute.xlu1 %1358  ;;  %v1347_v47 = vpop.permute.xlu0 %1346 }
 0x1f6   : > { %v1370_v55 = vadd.f32 %v1359_v46, %v1354_v54  ;;  %v1356_v19 = vadd.f32 %v1347_v47, %v2991_v38 }
 0x1f9   : > { %v1433_v48 = vpop.permute.xlu1 %1432  ;;  %v1421_v49 = vpop.permute.xlu0 %1420 }
 0x1fa   : > { %v1444_v61 = vadd.f32 %v1433_v48, %v1428_v59  ;;  %v1430_v22 = vadd.f32 %v1421_v49, %v2994_v39 }
 0x1fd   : > { %v1361_v50 = vpop.permute.xlu1 %1360  ;;  %v1349_v51 = vpop.permute.xlu0 %1348 }
 0x1fe   : > { %v1371_v5 = vadd.f32 %v1361_v50, %v1355_v1  ;;  %v1357_v31 = vadd.f32 %v1349_v51, %v2997_v40 }
 0x201   : > { %v1435_v52 = vpop.permute.xlu1 %1434  ;;  %v1423_v53 = vpop.permute.xlu0 %1422 }
 0x202   : > { %v1445_v15 = vadd.f32 %v1435_v52, %v1429_v10  ;;  %v1431_v32 = vadd.f32 %v1423_v53, %v3000_v41 }
 0x205   : > { %v1375_v56 = vpop.permute.xlu1 %1374  ;;  %v1363_v58 = vpop.permute.xlu0 %1362 }
 0x206   : > { %v1386_v60 = vadd.f32 %v1375_v56, %v1370_v55  ;;  %v1372_v26 = vadd.f32 %v1363_v58, %v1356_v19 }
 0x208   : > { %v1396_v62 = vadd.f32 %v3013_v57, %v1386_v60 }
 0x209   : > { %v1449_v63 = vpop.permute.xlu1 %1448  ;;  %v1437_v0 = vpop.permute.xlu0 %1436 }
 0x20a   : > { %v1400_v2 = vmax.f32 %v1396_v62, 0.0  ;;  %v1460_v3 = vadd.f32 %v1449_v63, %v1444_v61  ;;  %v1446_v27 = vadd.f32 %v1437_v0, %v1430_v22 }
 0x20c   : > { %v1404_v6 = vmin.f32 %v1400_v2, 1.0  ;;  %v1464_v7 = vadd.f32 %v3013_v57, %v1460_v3 }
 0x20d   : > { %v1377_v8 = vpop.permute.xlu1 %1376  ;;  %v1365_v9 = vpop.permute.xlu0 %1364 }
 0x20e   : > { %v1468_v11 = vmax.f32 %v1464_v7, 0.0  ;;  %v1387_v12 = vadd.f32 %v1377_v8, %v1371_v5  ;;  %v1483_v13 = vmul.f32 %v3016_v4, %v1404_v6  ;;  %v1373_v39 = vadd.f32 %v1365_v9, %v1357_v31  ;;  %v1860_v7 = vld [vmem:[#allocation7] ss:$0 sm:$0xff] }
 0x210   : > { %v1472_v16 = vmin.f32 %v1468_v11, 1.0  ;;  %v1397_v17 = vadd.f32 %v3013_v57, %v1387_v12  ;;  %v1488_v18 = vsel %vm1487_vm0, %v1483_v13, 0.0 }
 0x211   : > { %v1451_v20 = vpop.permute.xlu1 %1450  ;;  %v1439_v21 = vpop.permute.xlu0 %1438  ;;  %1489 = vadd.xlane.f32.xlu0 %v1488_v18 }
 0x212   : > { %v1401_v23 = vmax.f32 %v1397_v17, 0.0  ;;  %v1461_v24 = vadd.f32 %v1451_v20, %v1445_v15  ;;  %v1507_v25 = vmul.f32 %v1859_v14, %v1472_v16  ;;  %v1447_v42 = vadd.f32 %v1439_v21, %v1431_v32 }
 0x214   : > { %v1405_v28 = vmin.f32 %v1401_v23, 1.0  ;;  %v1465_v29 = vadd.f32 %v3013_v57, %v1461_v24  ;;  %v1511_v30 = vsel %vm1487_vm0, %v1507_v25, 0.0 }
 0x215   : > { %v1453_v33 = vpop.permute.xlu1 %1452  ;;  %v1379_v34 = vpop.permute.xlu0 %1378  ;;  %1512 = vadd.xlane.f32.xlu1 %v1511_v30 }
 0x216   : > { %v1469_v35 = vmax.f32 %v1465_v29, 0.0  ;;  %v1462_v36 = vadd.f32 %v1453_v33, %v1446_v27  ;;  %v1388_v37 = vadd.f32 %v1379_v34, %v1372_v26  ;;  %v1484_v38 = vmul.f32 %v3016_v4, %v1405_v28 }
 0x218   : > { %v1473_v43 = vmin.f32 %v1469_v35, 1.0  ;;  %v1466_v44 = vadd.f32 %v3013_v57, %v1462_v36  ;;  %v1398_v45 = vadd.f32 %v3013_v57, %v1388_v37  ;;  %v1491_v46 = vsel %vm1487_vm0, %v1484_v38, 0.0 }
 0x219   : > { %v1455_v40 = vpop.permute.xlu1 %1454  ;;  %v1381_v47 = vpop.permute.xlu0 %1380  ;;  %1492 = vadd.xlane.f32.xlu0 %v1491_v46 }
 0x21a   : > { %v1470_v41 = vmax.f32 %v1466_v44, 0.0  ;;  %v1402_v48 = vmax.f32 %v1398_v45, 0.0  ;;  %v1463_v49 = vadd.f32 %v1455_v40, %v1447_v42  ;;  %v1389_v50 = vadd.f32 %v1381_v47, %v1373_v39 }
 0x21b   : > { %v1508_v51 = vmul.f32 %v1859_v14, %v1473_v43 }
 0x21c   : > { %v1474_v52 = vmin.f32 %v1470_v41, 1.0  ;;  %v1406_v53 = vmin.f32 %v1402_v48, 1.0  ;;  %v1467_v54 = vadd.f32 %v3013_v57, %v1463_v49  ;;  %v1399_v55 = vadd.f32 %v3013_v57, %v1389_v50 }
 0x21d   : > { %v1514_v56 = vsel %vm1487_vm0, %v1508_v51, 0.0 }
 0x21e   : > { %v1471_v58 = vmax.f32 %v1467_v54, 0.0  ;;  %v1403_v59 = vmax.f32 %v1399_v55, 0.0  ;;  %1515 = vadd.xlane.f32.xlu0 %v1514_v56  ;;  %v1485_v60 = vmul.f32 %v3016_v4, %v1406_v53  ;;  %v1509_v61 = vmul.f32 %v1859_v14, %v1474_v52 }
 0x220   : > { %v1475_v62 = vmin.f32 %v1471_v58, 1.0  ;;  %v1407_v63 = vmin.f32 %v1403_v59, 1.0  ;;  %v1494_v0 = vsel %vm1487_vm0, %v1485_v60, 0.0  ;;  %v1517_v1 = vsel %vm1487_vm0, %v1509_v61, 0.0 }
 0x221   : > { %1495 = vadd.xlane.f32.xlu1 %v1494_v0 }
 0x222   : > { %1518 = vadd.xlane.f32.xlu0 %v1517_v1  ;;  %v1486_v2 = vmul.f32 %v3016_v4, %v1407_v63  ;;  %v1510_v3 = vmul.f32 %v1859_v14, %v1475_v62 }
 0x224   : > { %v1497_v57 = vsel %vm1487_vm0, %v1486_v2, 0.0  ;;  %v1520_v5 = vsel %vm1487_vm0, %v1510_v3, 0.0 }
 0x225   : > { %1498 = vadd.xlane.f32.xlu1 %v1497_v57 }
 0x226   : > { %1521 = vadd.xlane.f32.xlu0 %v1520_v5 }
 0x29a   : > { %v1490_v6 = vpop.xlane.xlu0 %1489 }
 0x29e   : > { %v1513_v8 = vpop.xlane.xlu1 %1512 }
 0x29f   : > { %v1523_v9 = vadd.f32 %v1513_v8, %v1490_v6 }
 0x2a1   : > { %v1534_v10 = vadd.f32 %v1860_v7, %v1523_v9 }
 0x2a2   : > { %v1493_v11 = vpop.xlane.xlu0 %1492 }
 0x2a3   : > { %v1861_v12 = vmul.f32 -1.442695, %v1534_v10 }
 0x2a5   : > { %1952 = vpow2.f32 %v1861_v12 }
 0x2a7   : > { %v1516_v13 = vpop.xlane.xlu0 %1515 }
 0x2a8   : > { %v1524_v15 = vadd.f32 %v1516_v13, %v1493_v11 }
 0x2aa   : > { %v1535_v16 = vadd.f32 %v1860_v7, %v1524_v15  ;;  %v1496_v17 = vpop.xlane.xlu1 %1495 }
 0x2ab   : > { %v1519_v4 = vpop.xlane.xlu0 %1518 }
 0x2ac   : > { %v1862_v14 = vmul.f32 -1.442695, %v1535_v16  ;;  %v1525_v18 = vadd.f32 %v1519_v4, %v1496_v17 }
 0x2ae   : > { %1954 = vpow2.f32 %v1862_v14  ;;  %v1536_v19 = vadd.f32 %v1860_v7, %v1525_v18  ;;  %v1499_v20 = vpop.xlane.xlu1 %1498 }
 0x2af   : > { %v1522_v21 = vpop.xlane.xlu0 %1521 }
 0x2b0   : > { %v1863_v22 = vmul.f32 -1.442695, %v1536_v19  ;;  %v1526_v23 = vadd.f32 %v1522_v21, %v1499_v20 }
 0x2b2   : > { %v1953_v24 = vpop.eup %1952  ;;  %1956 = vpow2.f32 %v1863_v22  ;;  %v1537_v25 = vadd.f32 %v1860_v7, %v1526_v23 }
 0x2b3   : > { %v1550_v26 = vadd.f32 1.0, %v1953_v24 }
 0x2b4   : > { %v1864_v27 = vmul.f32 -1.442695, %v1537_v25 }
 0x2b5   : > { %1958 = vrcp.f32 %v1550_v26 }
 0x2b6   : > { %1960 = vpow2.f32 %v1864_v27 }
 0x2bb   : > { %v1955_v28 = vpop.eup %1954 }
 0x2bc   : > { %v1551_v29 = vadd.f32 1.0, %v1955_v28 }
 0x2be   : > { %1962 = vrcp.f32 %v1551_v29 }
 0x2bf   : > { %v1957_v30 = vpop.eup %1956 }
 0x2c0   : > { %v1552_v31 = vadd.f32 1.0, %v1957_v30 }
 0x2c2   : > { %v1959_v32 = vpop.eup %1958  ;;  %1964 = vrcp.f32 %v1552_v31 }
 0x2c3   : > { %v1961_v33 = vpop.eup %1960  ;;  %1563 = vst.msk [vmem:[%s2356_s25] sm:$0xff] %vm1562_vm1, %v1959_v32 }
 0x2c4   : > { %v1553_v34 = vadd.f32 1.0, %v1961_v33 }
 0x2c6   : > { %1966 = vrcp.f32 %v1553_v34 }
 0x2cb   : > { %v1963_v35 = vpop.eup %1962 }
 0x2cc   : > { %1564 = vst.msk [vmem:[%s2356_s25 + $0x8] sm:$0xff] %vm1562_vm1, %v1963_v35 }
 0x2cf   : > { %v1965_v36 = vpop.eup %1964 }
 0x2d0   : > { %1565 = vst.msk [vmem:[%s2356_s25 + $0x10] sm:$0xff] %vm1562_vm1, %v1965_v36 }
 0x2d3   : > { %v1967_v37 = vpop.eup %1966 }
 0x2d4   : > { %1566 = vst.msk [vmem:[%s2356_s25 + $0x18] sm:$0xff] %vm1562_vm1, %v1967_v37 }
 0x2d5 PF: > { %s35_s8 = sadd.s32 1, %s2165_s8  }
 0x2d6   : > { %p32_p6 = scmp.ge.s32.totalorder %s35_s8, 4  }
 0x2d8   :  { %34 = sbr.rel (!%p32_p6) target bundleno = 30 (0x1e), region = 247 }
 0x2dd   :  { %1589 = vsyncpa [#allocation9], 1 }
 0x2de   :  { %1591 = vsyncpa [#allocation9 + $0x1], 1 }
 0x2df   :  { %1592 = vsyncpa [#allocation13], 1 }
 0x2e0   :  { %1593 = vsyncpa [#allocation16], 1 }
 0x2e1   :  { %1594 = vsyncpa [#allocation10], 1 }
 0x2e2   :  { %1596 = vsyncpa [#allocation10 + $0x1], 1 }

</bundles_post_ra>
